<compile_context>
chip_gen: v7x
topology: tpu7x:2x2x1
jax: 0.10.0
libtpu: 0.0.40
codegen_flags: <defaults>
</compile_context>

<pallas_src>
import numpy as np
import jax
import jax.numpy as jnp
from jax.experimental import pallas as pl
from jax.experimental.pallas import tpu as pltpu  # noqa: F401  (TPU backend assumed)

# ------------------------- configuration (small shapes) ----------------------
B = 2          # batch
DAY = 4        # "day" sequence length
ND = 8         # n // day  (per-day feature size)
N = DAY * ND   # module arg `n`
D = 32         # dim[0]  (embedding width)
NBLK = 2       # len(dim) transformer Blocks
H = 2          # num_heads in Block(dim, 2, ...)
HD = D // H
HID = 4 * D    # timm Block mlp_ratio = 4
M = 8          # module arg `m`
P = 3          # ensemble size `p`
EPS = 1e-5     # nn.LayerNorm default eps
SCALE = HD ** -0.5
INV_P = 1.0 / P

R = P * B * DAY        # 24 rows  (model-major, then batch, then day)
GRP = P * B            # 6 (model, batch) groups of DAY rows each
PP = 4                 # model blocks incl. one all-zero pad block -> 128 lanes
PWP = PP * D           # 128 padded feature lanes
PINP = PP * ND         # 32  padded input lanes
HIDP = PP * HID        # 512 padded MLP hidden lanes

PARAM_ORDER = ["pw", "pb", "ln1w", "ln1b", "qkvw", "qkvb", "prw", "prb",
               "ln2w", "ln2b", "f1w", "f1b", "f2w", "f2b", "hw", "hb"]
PACKED_ORDER = ["pw", "pbpos", "lnw", "lnb", "qkvw", "qkvb", "prw", "prb",
                "f1w", "f1b", "f2w", "f2b", "hw0", "hb6", "sel6", "hm", "abias"]


# ------------------------------- shared math ---------------------------------
def _layernorm(x, w, b):
    mu = jnp.mean(x, axis=-1, keepdims=True)
    var = jnp.mean(jnp.square(x - mu), axis=-1, keepdims=True)
    return (x - mu) * jax.lax.rsqrt(var + EPS) * w + b


def _gelu(x):
    # tanh-approximate GELU (see TODO above)
    return 0.5 * x * (1.0 + jnp.tanh(0.7978845608028654 * (x + 0.044715 * x * x * x)))


# --------------------------------- kernel ------------------------------------
def ensemble_kernel(x_ref, pw_ref, pbpos_ref,
                    lnw_ref, lnb_ref, qkvw_ref, qkvb_ref, prw_ref, prb_ref,
                    f1w_ref, f1b_ref, f2w_ref, f2b_ref,
                    hw0_ref, hb_ref, sel_ref, hm_ref, abias_ref, out_ref):
    f32 = jnp.float32
    hm = hm_ref[...]        # [2R, PWP]: per-head lane masks (head 0 rows 0:R, head 1 rows R:2R)
    abias = abias_ref[...]  # [2R, R]:  0 within a (model,batch) group of DAY rows, -1e9 elsewhere

    def layernorm(x, w_t, b_t):
        # per-row stats over the D active lanes (off-block lanes are exactly zero);
        # E[x^2]-mu^2 form needs no block mask, and the zero off-block w_t/b_t row-tiles
        # keep the output block-sparse.
        mu = jnp.sum(x, axis=-1, keepdims=True) * (1.0 / D)
        var = jnp.sum(x * x, axis=-1, keepdims=True) * (1.0 / D) - mu * mu
        return (x - mu) * jax.lax.rsqrt(var + EPS) * w_t + b_t

    # ---- patch embedding: block-laid input @ block-diagonal weight (+bias +pos), no mask ----
    h = jnp.dot(x_ref[...], pw_ref[...], preferred_element_type=f32) + pbpos_ref[...]   # [R, PWP]

    # ---- transformer Blocks (LN -> MHSA -> +res ; LN -> MLP -> +res) ----
    for l in range(NBLK):
        # attention (fused QKV; fused 2-head score & AV dots; scale pre-folded into q)
        y = layernorm(h, lnw_ref[l, 0], lnb_ref[l, 0])
        qkv = jnp.dot(y, qkvw_ref[l], preferred_element_type=f32) + qkvb_ref[l]          # [R, 3*PWP]
        q = qkv[:, 0:PWP]
        k = qkv[:, PWP:2 * PWP]
        v = qkv[:, 2 * PWP:3 * PWP]
        qs = jnp.concatenate([q, q], axis=0) * hm                                        # [2R, PWP]
        s = jax.lax.dot_general(qs, k, (((1,), (1,)), ((), ())),
                                preferred_element_type=f32) + abias                      # [2R, R]
        e = jnp.exp(s - jnp.max(s, axis=-1, keepdims=True))
        a = e * pl.reciprocal(jnp.sum(e, axis=-1, keepdims=True), approx=True)
        av = jnp.dot(a, v, preferred_element_type=f32) * hm                              # [2R, PWP]
        attn = av[0:R] + av[R:2 * R]                                                     # [R, PWP]
        h = h + jnp.dot(attn, prw_ref[l], preferred_element_type=f32) + prb_ref[l]

        # MLP
        y = layernorm(h, lnw_ref[l, 1], lnb_ref[l, 1])
        z = _gelu(jnp.dot(y, f1w_ref[l], preferred_element_type=f32) + f1b_ref[l])
        h = h + jnp.dot(z, f2w_ref[l], preferred_element_type=f32) + f2b_ref[l]

    # ---- head: only output column 0 is ever used (clamp + ensemble mean) ----
    rowsum = jnp.sum(h * hw0_ref[...], axis=-1, keepdims=True)                           # [R, 1]
    grp = jnp.dot(sel_ref[...], rowsum, preferred_element_type=f32)                      # [GRP, 1]
    val = jnp.minimum(grp + hb_ref[...], 0.0)                                            # clamp(max=0)
    out_ref[...] = (val[0:B] + val[B:2 * B] + val[2 * B:3 * B]) * INV_P                  # mean over P


# -------------------------------- wrapper -------------------------------------
def ensemble_encoder_forward(x, packed):
    # layout plumbing: block-lay the shared input rows for each of the P models
    xb = x.reshape(B * DAY, ND)
    x_blk = jnp.zeros((R, PINP), jnp.float32)
    for p in range(P):
        x_blk = x_blk.at[p * B * DAY:(p + 1) * B * DAY, p * ND:(p + 1) * ND].set(xb)
    args = [x_blk] + [packed[k] for k in PACKED_ORDER]
    return pl.pallas_call(
        ensemble_kernel,
        out_shape=jax.ShapeDtypeStruct((B, 1), jnp.float32),
    )(*args)


# ------------------- one-time parameter repacking (params are frozen) --------
def _block_diag(w, rows, cols):     # [P, i, o] -> [rows, cols] block-diagonal (zero padded)
    Pn, i, o = w.shape
    out = jnp.zeros((rows, cols), jnp.float32)
    for p in range(Pn):
        out = out.at[p * i:(p + 1) * i, p * o:(p + 1) * o].set(w[p])
    return out


def _row_tile(v, cols):             # [P, o] -> [R, cols] (model-block placement, zeros elsewhere)
    Pn, o = v.shape
    t = jnp.zeros((Pn, cols), jnp.float32)
    for p in range(Pn):
        t = t.at[p, p * o:(p + 1) * o].set(v[p])
    return jnp.repeat(t, B * DAY, axis=0)


def _rowd_tile(v, cols):            # [P, B*DAY, o] -> [R, cols]
    Pn, rows, o = v.shape
    t = jnp.zeros((Pn, rows, cols), jnp.float32)
    for p in range(Pn):
        t = t.at[p, :, p * o:(p + 1) * o].set(v[p])
    return t.reshape(Pn * rows, cols)


def pack_params(params, pos):
    pk = {}
    # patch embedding: block-diagonal weight over the block-laid input, bias+pos row tile
    pk["pw"] = _block_diag(params["pw"], PINP, PWP)                               # [32, 128]
    pos_bd = jnp.tile(pos, (B, 1))                                                # [B*DAY, D]
    pbpos = jnp.stack([params["pb"][p, 0][None, :] + pos_bd for p in range(P)])
    pk["pbpos"] = _rowd_tile(pbpos, PWP)                                          # [R, 128]

    lnw, lnb, qkvw, qkvb, prw, prb = [], [], [], [], [], []
    f1w, f1b, f2w, f2b = [], [], [], []
    for l in range(NBLK):
        lnw.append(jnp.stack([_row_tile(params["ln1w"][:, l, 0], PWP),
                              _row_tile(params["ln2w"][:, l, 0], PWP)]))
        lnb.append(jnp.stack([_row_tile(params["ln1b"][:, l, 0], PWP),
                              _row_tile(params["ln2b"][:, l, 0], PWP)]))
        # fused QKV with the attention scale folded into the q third
        qw = params["qkvw"][:, l, :, 0 * D:1 * D] * SCALE
        kw = params["qkvw"][:, l, :, 1 * D:2 * D]
        vw = params["qkvw"][:, l, :, 2 * D:3 * D]
        qkvw.append(jnp.concatenate([_block_diag(qw, PWP, PWP),
                                     _block_diag(kw, PWP, PWP),
                                     _block_diag(vw, PWP, PWP)], axis=1))         # [128, 384]
        qb = params["qkvb"][:, l, 0, 0 * D:1 * D] * SCALE
        kb = params["qkvb"][:, l, 0, 1 * D:2 * D]
        vb = params["qkvb"][:, l, 0, 2 * D:3 * D]
        qkvb.append(jnp.concatenate([_row_tile(qb, PWP), _row_tile(kb, PWP),
                                     _row_tile(vb, PWP)], axis=1))                # [R, 384]
        prw.append(_block_diag(params["prw"][:, l], PWP, PWP))
        prb.append(_row_tile(params["prb"][:, l, 0], PWP))
        f1w.append(_block_diag(params["f1w"][:, l], PWP, HIDP))
        f1b.append(_row_tile(params["f1b"][:, l, 0], HIDP))
        f2w.append(_block_diag(params["f2w"][:, l], HIDP, PWP))
        f2b.append(_row_tile(params["f2b"][:, l, 0], PWP))
    pk["lnw"] = jnp.stack(lnw);   pk["lnb"] = jnp.stack(lnb)      # [NBLK, 2, R, 128]
    pk["qkvw"] = jnp.stack(qkvw); pk["qkvb"] = jnp.stack(qkvb)    # [NBLK, 128, 384] / [NBLK, R, 384]
    pk["prw"] = jnp.stack(prw);   pk["prb"] = jnp.stack(prb)
    pk["f1w"] = jnp.stack(f1w);   pk["f1b"] = jnp.stack(f1b)
    pk["f2w"] = jnp.stack(f2w);   pk["f2b"] = jnp.stack(f2b)

    # head: only column 0 of the [DAY*D, M] weight is needed
    hw0 = jnp.tile(params["hw"][:, :, :, 0], (1, B, 1))           # [P, B*DAY, D]
    pk["hw0"] = _rowd_tile(hw0, PWP)                              # [R, 128]
    pk["hb6"] = jnp.repeat(params["hb"][:, 0, 0], B)[:, None]     # [GRP, 1]

    # static group-sum selection matrix (sum the DAY rows of each (model, batch) group)
    sel6 = np.zeros((GRP, R), np.float32)
    for g in range(GRP):
        sel6[g, g * DAY:(g + 1) * DAY] = 1.0
    pk["sel6"] = jnp.asarray(sel6)

    # precomputed per-head lane masks (head h active on lanes with (c % D)//HD == h, real models only)
    hm = np.zeros((2 * R, PWP), np.float32)
    for c in range(P * D):
        hh = (c % D) // HD
        hm[hh * R:(hh + 1) * R, c] = 1.0
    pk["hm"] = jnp.asarray(hm)

    # precomputed attention bias: 0 within a (model, batch) group of DAY rows, -1e9 elsewhere
    ab = np.full((R, R), -1e9, np.float32)
    for g in range(GRP):
        ab[g * DAY:(g + 1) * DAY, g * DAY:(g + 1) * DAY] = 0.0
    pk["abias"] = jnp.asarray(np.concatenate([ab, ab], axis=0))   # [2R, R]
    return pk


# ------------------------- deterministic parameter init ----------------------
def _xavier(key, fan_in, fan_out):
    limit = float(np.sqrt(6.0 / (fan_in + fan_out)))
    return jax.random.uniform(key, (fan_in, fan_out), jnp.float32, -limit, limit)


def _init_one_model(key):
    ks = iter(jax.random.split(key, 2 + 4 * NBLK))
    p = {}
    p["pw"] = _xavier(next(ks), ND, D)                  # patch_embd weight^T
    p["pb"] = jnp.zeros((1, D), jnp.float32)
    p["ln1w"] = jnp.ones((NBLK, 1, D), jnp.float32)
    p["ln1b"] = jnp.zeros((NBLK, 1, D), jnp.float32)
    p["qkvw"] = jnp.stack([_xavier(next(ks), D, 3 * D) for _ in range(NBLK)])
    p["qkvb"] = jnp.zeros((NBLK, 1, 3 * D), jnp.float32)
    p["prw"] = jnp.stack([_xavier(next(ks), D, D) for _ in range(NBLK)])
    p["prb"] = jnp.zeros((NBLK, 1, D), jnp.float32)
    p["ln2w"] = jnp.ones((NBLK, 1, D), jnp.float32)
    p["ln2b"] = jnp.zeros((NBLK, 1, D), jnp.float32)
    p["f1w"] = jnp.stack([_xavier(next(ks), D, HID) for _ in range(NBLK)])
    p["f1b"] = jnp.zeros((NBLK, 1, HID), jnp.float32)
    p["f2w"] = jnp.stack([_xavier(next(ks), HID, D) for _ in range(NBLK)])
    p["f2b"] = jnp.zeros((NBLK, 1, D), jnp.float32)
    p["hw"] = _xavier(next(ks), DAY * D, M).reshape(DAY, D, M)  # head weight^T
    p["hb"] = jnp.zeros((1, M), jnp.float32)
    return p


def init_params(key):
    models = [_init_one_model(k) for k in jax.random.split(key, P)]
    return {name: jnp.stack([m[name] for m in models]) for name in PARAM_ORDER}


def _sincos_1d(embed_dim, pos):
    omega = np.arange(embed_dim // 2, dtype=np.float64)
    omega /= embed_dim / 2.0
    omega = 1.0 / 10000 ** omega
    pos = pos.reshape(-1).astype(np.float64)
    out = np.einsum("m,d->md", pos, omega)
    return np.concatenate([np.sin(out), np.cos(out)], axis=1)


def get_2d_sincos_pos_embed(embed_dim, grid_size):
    gh, gw = grid_size
    grid_h = np.arange(gh, dtype=np.float32)
    grid_w = np.arange(gw, dtype=np.float32)
    grid = np.meshgrid(grid_w, grid_h)                  # w varies fastest (MAE)
    grid = np.stack(grid, axis=0).reshape([2, 1, gh, gw])
    emb_h = _sincos_1d(embed_dim // 2, grid[0])
    emb_w = _sincos_1d(embed_dim // 2, grid[1])
    return np.concatenate([emb_h, emb_w], axis=1).astype(np.float32)  # [gh*gw, D]


# ---------------------------- pure-JAX reference ------------------------------
def reference(x, pos, params):
    outs = []
    for j in range(P):
        h = x.reshape(B, DAY, ND)
        h = jnp.einsum("bdn,nk->bdk", h, params["pw"][j]) + params["pb"][j][0]
        h = h + pos[None]
        for l in range(NBLK):
            y = _layernorm(h, params["ln1w"][j, l, 0], params["ln1b"][j, l, 0])
            qkv = y @ params["qkvw"][j, l] + params["qkvb"][j, l, 0]
            q, k, v = jnp.split(qkv, 3, axis=-1)
            q = q.reshape(B, DAY, H, HD)
            k = k.reshape(B, DAY, H, HD)
            v = v.reshape(B, DAY, H, HD)
            a = jnp.einsum("bqhd,bkhd->bhqk", q, k) * SCALE
            a = jax.nn.softmax(a, axis=-1)
            o = jnp.einsum("bhqk,bkhd->bqhd", a, v).reshape(B, DAY, D)
            h = h + o @ params["prw"][j, l] + params["prb"][j, l, 0]
            y = _layernorm(h, params["ln2w"][j, l, 0], params["ln2b"][j, l, 0])
            z = _gelu(y @ params["f1w"][j, l] + params["f1b"][j, l, 0])
            h = h + z @ params["f2w"][j, l] + params["f2b"][j, l, 0]
        flat = h.reshape(B, DAY * D)
        o = flat @ params["hw"][j].reshape(DAY * D, M) + params["hb"][j, 0]
        outs.append(jnp.minimum(o[:, 0:1], 0.0))
    return jnp.mean(jnp.stack(outs, axis=0), axis=0)


# ----------------------------------- main -------------------------------------
if __name__ == "__main__":
    key = jax.random.PRNGKey(0)
    kx, kp = jax.random.split(key)
    x = jax.random.normal(kx, (B, N), jnp.float32)            # module input [B, n]
    params = init_params(kp)
    pos = jnp.asarray(get_2d_sincos_pos_embed(D, (DAY, 1)))   # [DAY, D], frozen

    packed = pack_params(params, pos)   # one-time repack (the module freezes all params)

    out = ensemble_encoder_forward(x, packed)
    out = jax.block_until_ready(out)

    ref = reference(x, pos, params)
    assert out.shape == (B, 1), out.shape
    # tolerance covers the EUP approx-reciprocal softmax and the E[x^2]-mu^2 LayerNorm form
    np.testing.assert_allclose(np.asarray(out), np.asarray(ref), atol=2e-3, rtol=2e-3)
    print("KERNEL_OK")
</pallas_src>

<mosaic_0001>
module attributes {stable_mosaic.version = 11 : i64} {
  func.func @ensemble_kernel(%arg0: memref<24x32xf32, #tpu.memory_space<vmem>>, %arg1: memref<32x128xf32, #tpu.memory_space<vmem>>, %arg2: memref<24x128xf32, #tpu.memory_space<vmem>>, %arg3: memref<2x2x24x128xf32, #tpu.memory_space<vmem>>, %arg4: memref<2x2x24x128xf32, #tpu.memory_space<vmem>>, %arg5: memref<2x128x384xf32, #tpu.memory_space<vmem>>, %arg6: memref<2x24x384xf32, #tpu.memory_space<vmem>>, %arg7: memref<2x128x128xf32, #tpu.memory_space<vmem>>, %arg8: memref<2x24x128xf32, #tpu.memory_space<vmem>>, %arg9: memref<2x128x512xf32, #tpu.memory_space<vmem>>, %arg10: memref<2x24x512xf32, #tpu.memory_space<vmem>>, %arg11: memref<2x512x128xf32, #tpu.memory_space<vmem>>, %arg12: memref<2x24x128xf32, #tpu.memory_space<vmem>>, %arg13: memref<24x128xf32, #tpu.memory_space<vmem>>, %arg14: memref<6x1xf32, #tpu.memory_space<vmem>>, %arg15: memref<6x24xf32, #tpu.memory_space<vmem>>, %arg16: memref<48x128xf32, #tpu.memory_space<vmem>>, %arg17: memref<48x24xf32, #tpu.memory_space<vmem>>, %arg18: memref<2x1xf32, #tpu.memory_space<vmem>>) attributes {dimension_semantics = [], scalar_prefetch = 0 : i64, scratch_operands = 0 : i64, tpu.core_type = #tpu.core_type<tc>} {
    %c0 = arith.constant 0 : index
    %c0_0 = arith.constant 0 : index
    %0 = vector.load %arg16[%c0, %c0_0] : memref<48x128xf32, #tpu.memory_space<vmem>>, vector<48x128xf32>
    %c0_1 = arith.constant 0 : index
    %c0_2 = arith.constant 0 : index
    %1 = vector.load %arg17[%c0_1, %c0_2] : memref<48x24xf32, #tpu.memory_space<vmem>>, vector<48x24xf32>
    %c0_3 = arith.constant 0 : index
    %c0_4 = arith.constant 0 : index
    %2 = vector.load %arg0[%c0_3, %c0_4] : memref<24x32xf32, #tpu.memory_space<vmem>>, vector<24x32xf32>
    %c0_5 = arith.constant 0 : index
    %c0_6 = arith.constant 0 : index
    %3 = vector.load %arg1[%c0_5, %c0_6] : memref<32x128xf32, #tpu.memory_space<vmem>>, vector<32x128xf32>
    %cst = arith.constant dense<0.000000e+00> : vector<24x128xf32>
    %4 = tpu.matmul %2, %3, %cst {dimension_numbers = #tpu.dot_dimension_numbers<[1], [0], [0], [1], [0, 0, 1, 1], [], []>} : vector<24x32xf32>, vector<32x128xf32>, vector<24x128xf32> -> vector<24x128xf32>
    %c0_7 = arith.constant 0 : index
    %c0_8 = arith.constant 0 : index
    %5 = vector.load %arg2[%c0_7, %c0_8] : memref<24x128xf32, #tpu.memory_space<vmem>>, vector<24x128xf32>
    %6 = arith.addf %4, %5 : vector<24x128xf32>
    %c0_9 = arith.constant 0 : index
    %c0_10 = arith.constant 0 : index
    %c0_11 = arith.constant 0 : index
    %c0_12 = arith.constant 0 : index
    %7 = vector.load %arg3[%c0_9, %c0_10, %c0_11, %c0_12] : memref<2x2x24x128xf32, #tpu.memory_space<vmem>>, vector<1x1x24x128xf32>
    %8 = vector.shape_cast %7 : vector<1x1x24x128xf32> to vector<24x128xf32>
    %c0_13 = arith.constant 0 : index
    %c0_14 = arith.constant 0 : index
    %c0_15 = arith.constant 0 : index
    %c0_16 = arith.constant 0 : index
    %9 = vector.load %arg4[%c0_13, %c0_14, %c0_15, %c0_16] : memref<2x2x24x128xf32, #tpu.memory_space<vmem>>, vector<1x1x24x128xf32>
    %10 = vector.shape_cast %9 : vector<1x1x24x128xf32> to vector<24x128xf32>
    %cst_17 = arith.constant dense<0.000000e+00> : vector<24xf32>
    %11 = vector.multi_reduction <add>, %6, %cst_17 [1] : vector<24x128xf32> to vector<24xf32>
    %12 = vector.shape_cast %11 : vector<24xf32> to vector<24x1xf32>
    %cst_18 = arith.constant 3.125000e-02 : f32
    %13 = vector.broadcast %cst_18 : f32 to vector<24x1xf32>
    %14 = arith.mulf %12, %13 : vector<24x1xf32>
    %15 = arith.mulf %6, %6 : vector<24x128xf32>
    %cst_19 = arith.constant dense<0.000000e+00> : vector<24xf32>
    %16 = vector.multi_reduction <add>, %15, %cst_19 [1] : vector<24x128xf32> to vector<24xf32>
    %17 = vector.shape_cast %16 : vector<24xf32> to vector<24x1xf32>
    %cst_20 = arith.constant 3.125000e-02 : f32
    %18 = vector.broadcast %cst_20 : f32 to vector<24x1xf32>
    %19 = arith.mulf %17, %18 : vector<24x1xf32>
    %20 = arith.mulf %14, %14 : vector<24x1xf32>
    %21 = arith.subf %19, %20 : vector<24x1xf32>
    %22 = vector.broadcast %14 : vector<24x1xf32> to vector<24x128xf32>
    %23 = arith.subf %6, %22 : vector<24x128xf32>
    %cst_21 = arith.constant 9.99999974E-6 : f32
    %24 = vector.broadcast %cst_21 : f32 to vector<24x1xf32>
    %25 = arith.addf %21, %24 : vector<24x1xf32>
    %26 = math.rsqrt %25 : vector<24x1xf32>
    %27 = vector.broadcast %26 : vector<24x1xf32> to vector<24x128xf32>
    %28 = arith.mulf %23, %27 : vector<24x128xf32>
    %29 = arith.mulf %28, %8 : vector<24x128xf32>
    %30 = arith.addf %29, %10 : vector<24x128xf32>
    %c0_22 = arith.constant 0 : index
    %c0_23 = arith.constant 0 : index
    %c0_24 = arith.constant 0 : index
    %31 = vector.load %arg5[%c0_22, %c0_23, %c0_24] : memref<2x128x384xf32, #tpu.memory_space<vmem>>, vector<1x128x384xf32>
    %32 = vector.shape_cast %31 : vector<1x128x384xf32> to vector<128x384xf32>
    %cst_25 = arith.constant dense<0.000000e+00> : vector<24x384xf32>
    %33 = tpu.matmul %30, %32, %cst_25 {dimension_numbers = #tpu.dot_dimension_numbers<[1], [0], [0], [1], [0, 0, 1, 1], [], []>} : vector<24x128xf32>, vector<128x384xf32>, vector<24x384xf32> -> vector<24x384xf32>
    %c0_26 = arith.constant 0 : index
    %c0_27 = arith.constant 0 : index
    %c0_28 = arith.constant 0 : index
    %34 = vector.load %arg6[%c0_26, %c0_27, %c0_28] : memref<2x24x384xf32, #tpu.memory_space<vmem>>, vector<1x24x384xf32>
    %35 = vector.shape_cast %34 : vector<1x24x384xf32> to vector<24x384xf32>
    %36 = arith.addf %33, %35 : vector<24x384xf32>
    %37 = vector.extract_strided_slice %36 {offsets = [0, 0], sizes = [24, 128], strides = [1, 1]} : vector<24x384xf32> to vector<24x128xf32>
    %38 = vector.extract_strided_slice %36 {offsets = [0, 128], sizes = [24, 128], strides = [1, 1]} : vector<24x384xf32> to vector<24x128xf32>
    %39 = vector.extract_strided_slice %36 {offsets = [0, 256], sizes = [24, 128], strides = [1, 1]} : vector<24x384xf32> to vector<24x128xf32>
    %40 = tpu.concatenate %37, %37 in 0 : vector<24x128xf32>, vector<24x128xf32> -> vector<48x128xf32>
    %41 = arith.mulf %40, %0 : vector<48x128xf32>
    %cst_29 = arith.constant dense<0.000000e+00> : vector<48x24xf32>
    %42 = tpu.matmul %41, %38, %cst_29 {dimension_numbers = #tpu.dot_dimension_numbers<[1], [1], [0], [0], [0, 0, 1, 0], [], []>} : vector<48x128xf32>, vector<24x128xf32>, vector<48x24xf32> -> vector<48x24xf32>
    %43 = arith.addf %42, %1 : vector<48x24xf32>
    %cst_30 = arith.constant dense<0xFF800000> : vector<48xf32>
    %44 = vector.multi_reduction <maximumf>, %43, %cst_30 [1] : vector<48x24xf32> to vector<48xf32>
    %45 = vector.shape_cast %44 : vector<48xf32> to vector<48x1xf32>
    %46 = vector.broadcast %45 : vector<48x1xf32> to vector<48x24xf32>
    %47 = arith.subf %43, %46 : vector<48x24xf32>
    %48 = math.exp %47 : vector<48x24xf32>
    %cst_31 = arith.constant dense<0.000000e+00> : vector<48xf32>
    %49 = vector.multi_reduction <add>, %48, %cst_31 [1] : vector<48x24xf32> to vector<48xf32>
    %50 = vector.shape_cast %49 : vector<48xf32> to vector<48x1xf32>
    %51 = tpu.reciprocal %50 {approx = true} : vector<48x1xf32> -> vector<48x1xf32>
    %52 = vector.broadcast %51 : vector<48x1xf32> to vector<48x24xf32>
    %53 = arith.mulf %48, %52 : vector<48x24xf32>
    %cst_32 = arith.constant dense<0.000000e+00> : vector<48x128xf32>
    %54 = tpu.matmul %53, %39, %cst_32 {dimension_numbers = #tpu.dot_dimension_numbers<[1], [0], [0], [1], [0, 0, 1, 1], [], []>} : vector<48x24xf32>, vector<24x128xf32>, vector<48x128xf32> -> vector<48x128xf32>
    %55 = arith.mulf %54, %0 : vector<48x128xf32>
    %56 = vector.extract_strided_slice %55 {offsets = [0, 0], sizes = [24, 128], strides = [1, 1]} : vector<48x128xf32> to vector<24x128xf32>
    %57 = vector.extract_strided_slice %55 {offsets = [24, 0], sizes = [24, 128], strides = [1, 1]} : vector<48x128xf32> to vector<24x128xf32>
    %58 = arith.addf %56, %57 : vector<24x128xf32>
    %c0_33 = arith.constant 0 : index
    %c0_34 = arith.constant 0 : index
    %c0_35 = arith.constant 0 : index
    %59 = vector.load %arg7[%c0_33, %c0_34, %c0_35] : memref<2x128x128xf32, #tpu.memory_space<vmem>>, vector<1x128x128xf32>
    %60 = vector.shape_cast %59 : vector<1x128x128xf32> to vector<128x128xf32>
    %cst_36 = arith.constant dense<0.000000e+00> : vector<24x128xf32>
    %61 = tpu.matmul %58, %60, %cst_36 {dimension_numbers = #tpu.dot_dimension_numbers<[1], [0], [0], [1], [0, 0, 1, 1], [], []>} : vector<24x128xf32>, vector<128x128xf32>, vector<24x128xf32> -> vector<24x128xf32>
    %62 = arith.addf %6, %61 : vector<24x128xf32>
    %c0_37 = arith.constant 0 : index
    %c0_38 = arith.constant 0 : index
    %c0_39 = arith.constant 0 : index
    %63 = vector.load %arg8[%c0_37, %c0_38, %c0_39] : memref<2x24x128xf32, #tpu.memory_space<vmem>>, vector<1x24x128xf32>
    %64 = vector.shape_cast %63 : vector<1x24x128xf32> to vector<24x128xf32>
    %65 = arith.addf %62, %64 : vector<24x128xf32>
    %c0_40 = arith.constant 0 : index
    %c1 = arith.constant 1 : index
    %c0_41 = arith.constant 0 : index
    %c0_42 = arith.constant 0 : index
    %66 = vector.load %arg3[%c0_40, %c1, %c0_41, %c0_42] : memref<2x2x24x128xf32, #tpu.memory_space<vmem>>, vector<1x1x24x128xf32>
    %67 = vector.shape_cast %66 : vector<1x1x24x128xf32> to vector<24x128xf32>
    %c0_43 = arith.constant 0 : index
    %c1_44 = arith.constant 1 : index
    %c0_45 = arith.constant 0 : index
    %c0_46 = arith.constant 0 : index
    %68 = vector.load %arg4[%c0_43, %c1_44, %c0_45, %c0_46] : memref<2x2x24x128xf32, #tpu.memory_space<vmem>>, vector<1x1x24x128xf32>
    %69 = vector.shape_cast %68 : vector<1x1x24x128xf32> to vector<24x128xf32>
    %cst_47 = arith.constant dense<0.000000e+00> : vector<24xf32>
    %70 = vector.multi_reduction <add>, %65, %cst_47 [1] : vector<24x128xf32> to vector<24xf32>
    %71 = vector.shape_cast %70 : vector<24xf32> to vector<24x1xf32>
    %cst_48 = arith.constant 3.125000e-02 : f32
    %72 = vector.broadcast %cst_48 : f32 to vector<24x1xf32>
    %73 = arith.mulf %71, %72 : vector<24x1xf32>
    %74 = arith.mulf %65, %65 : vector<24x128xf32>
    %cst_49 = arith.constant dense<0.000000e+00> : vector<24xf32>
    %75 = vector.multi_reduction <add>, %74, %cst_49 [1] : vector<24x128xf32> to vector<24xf32>
    %76 = vector.shape_cast %75 : vector<24xf32> to vector<24x1xf32>
    %cst_50 = arith.constant 3.125000e-02 : f32
    %77 = vector.broadcast %cst_50 : f32 to vector<24x1xf32>
    %78 = arith.mulf %76, %77 : vector<24x1xf32>
    %79 = arith.mulf %73, %73 : vector<24x1xf32>
    %80 = arith.subf %78, %79 : vector<24x1xf32>
    %81 = vector.broadcast %73 : vector<24x1xf32> to vector<24x128xf32>
    %82 = arith.subf %65, %81 : vector<24x128xf32>
    %cst_51 = arith.constant 9.99999974E-6 : f32
    %83 = vector.broadcast %cst_51 : f32 to vector<24x1xf32>
    %84 = arith.addf %80, %83 : vector<24x1xf32>
    %85 = math.rsqrt %84 : vector<24x1xf32>
    %86 = vector.broadcast %85 : vector<24x1xf32> to vector<24x128xf32>
    %87 = arith.mulf %82, %86 : vector<24x128xf32>
    %88 = arith.mulf %87, %67 : vector<24x128xf32>
    %89 = arith.addf %88, %69 : vector<24x128xf32>
    %c0_52 = arith.constant 0 : index
    %c0_53 = arith.constant 0 : index
    %c0_54 = arith.constant 0 : index
    %90 = vector.load %arg9[%c0_52, %c0_53, %c0_54] : memref<2x128x512xf32, #tpu.memory_space<vmem>>, vector<1x128x512xf32>
    %91 = vector.shape_cast %90 : vector<1x128x512xf32> to vector<128x512xf32>
    %cst_55 = arith.constant dense<0.000000e+00> : vector<24x512xf32>
    %92 = tpu.matmul %89, %91, %cst_55 {dimension_numbers = #tpu.dot_dimension_numbers<[1], [0], [0], [1], [0, 0, 1, 1], [], []>} : vector<24x128xf32>, vector<128x512xf32>, vector<24x512xf32> -> vector<24x512xf32>
    %c0_56 = arith.constant 0 : index
    %c0_57 = arith.constant 0 : index
    %c0_58 = arith.constant 0 : index
    %93 = vector.load %arg10[%c0_56, %c0_57, %c0_58] : memref<2x24x512xf32, #tpu.memory_space<vmem>>, vector<1x24x512xf32>
    %94 = vector.shape_cast %93 : vector<1x24x512xf32> to vector<24x512xf32>
    %95 = arith.addf %92, %94 : vector<24x512xf32>
    %cst_59 = arith.constant 5.000000e-01 : f32
    %96 = vector.broadcast %cst_59 : f32 to vector<24x512xf32>
    %97 = arith.mulf %96, %95 : vector<24x512xf32>
    %cst_60 = arith.constant 4.471500e-02 : f32
    %98 = vector.broadcast %cst_60 : f32 to vector<24x512xf32>
    %99 = arith.mulf %98, %95 : vector<24x512xf32>
    %100 = arith.mulf %99, %95 : vector<24x512xf32>
    %101 = arith.mulf %100, %95 : vector<24x512xf32>
    %102 = arith.addf %95, %101 : vector<24x512xf32>
    %cst_61 = arith.constant 0.797884583 : f32
    %103 = vector.broadcast %cst_61 : f32 to vector<24x512xf32>
    %104 = arith.mulf %103, %102 : vector<24x512xf32>
    %105 = math.tanh %104 : vector<24x512xf32>
    %cst_62 = arith.constant 1.000000e+00 : f32
    %106 = vector.broadcast %cst_62 : f32 to vector<24x512xf32>
    %107 = arith.addf %106, %105 : vector<24x512xf32>
    %108 = arith.mulf %97, %107 : vector<24x512xf32>
    %c0_63 = arith.constant 0 : index
    %c0_64 = arith.constant 0 : index
    %c0_65 = arith.constant 0 : index
    %109 = vector.load %arg11[%c0_63, %c0_64, %c0_65] : memref<2x512x128xf32, #tpu.memory_space<vmem>>, vector<1x512x128xf32>
    %110 = vector.shape_cast %109 : vector<1x512x128xf32> to vector<512x128xf32>
    %cst_66 = arith.constant dense<0.000000e+00> : vector<24x128xf32>
    %111 = tpu.matmul %108, %110, %cst_66 {dimension_numbers = #tpu.dot_dimension_numbers<[1], [0], [0], [1], [0, 0, 1, 1], [], []>} : vector<24x512xf32>, vector<512x128xf32>, vector<24x128xf32> -> vector<24x128xf32>
    %112 = arith.addf %65, %111 : vector<24x128xf32>
    %c0_67 = arith.constant 0 : index
    %c0_68 = arith.constant 0 : index
    %c0_69 = arith.constant 0 : index
    %113 = vector.load %arg12[%c0_67, %c0_68, %c0_69] : memref<2x24x128xf32, #tpu.memory_space<vmem>>, vector<1x24x128xf32>
    %114 = vector.shape_cast %113 : vector<1x24x128xf32> to vector<24x128xf32>
    %115 = arith.addf %112, %114 : vector<24x128xf32>
    %c1_70 = arith.constant 1 : index
    %c0_71 = arith.constant 0 : index
    %c0_72 = arith.constant 0 : index
    %c0_73 = arith.constant 0 : index
    %116 = vector.load %arg3[%c1_70, %c0_71, %c0_72, %c0_73] : memref<2x2x24x128xf32, #tpu.memory_space<vmem>>, vector<1x1x24x128xf32>
    %117 = vector.shape_cast %116 : vector<1x1x24x128xf32> to vector<24x128xf32>
    %c1_74 = arith.constant 1 : index
    %c0_75 = arith.constant 0 : index
    %c0_76 = arith.constant 0 : index
    %c0_77 = arith.constant 0 : index
    %118 = vector.load %arg4[%c1_74, %c0_75, %c0_76, %c0_77] : memref<2x2x24x128xf32, #tpu.memory_space<vmem>>, vector<1x1x24x128xf32>
    %119 = vector.shape_cast %118 : vector<1x1x24x128xf32> to vector<24x128xf32>
    %cst_78 = arith.constant dense<0.000000e+00> : vector<24xf32>
    %120 = vector.multi_reduction <add>, %115, %cst_78 [1] : vector<24x128xf32> to vector<24xf32>
    %121 = vector.shape_cast %120 : vector<24xf32> to vector<24x1xf32>
    %cst_79 = arith.constant 3.125000e-02 : f32
    %122 = vector.broadcast %cst_79 : f32 to vector<24x1xf32>
    %123 = arith.mulf %121, %122 : vector<24x1xf32>
    %124 = arith.mulf %115, %115 : vector<24x128xf32>
    %cst_80 = arith.constant dense<0.000000e+00> : vector<24xf32>
    %125 = vector.multi_reduction <add>, %124, %cst_80 [1] : vector<24x128xf32> to vector<24xf32>
    %126 = vector.shape_cast %125 : vector<24xf32> to vector<24x1xf32>
    %cst_81 = arith.constant 3.125000e-02 : f32
    %127 = vector.broadcast %cst_81 : f32 to vector<24x1xf32>
    %128 = arith.mulf %126, %127 : vector<24x1xf32>
    %129 = arith.mulf %123, %123 : vector<24x1xf32>
    %130 = arith.subf %128, %129 : vector<24x1xf32>
    %131 = vector.broadcast %123 : vector<24x1xf32> to vector<24x128xf32>
    %132 = arith.subf %115, %131 : vector<24x128xf32>
    %cst_82 = arith.constant 9.99999974E-6 : f32
    %133 = vector.broadcast %cst_82 : f32 to vector<24x1xf32>
    %134 = arith.addf %130, %133 : vector<24x1xf32>
    %135 = math.rsqrt %134 : vector<24x1xf32>
    %136 = vector.broadcast %135 : vector<24x1xf32> to vector<24x128xf32>
    %137 = arith.mulf %132, %136 : vector<24x128xf32>
    %138 = arith.mulf %137, %117 : vector<24x128xf32>
    %139 = arith.addf %138, %119 : vector<24x128xf32>
    %c1_83 = arith.constant 1 : index
    %c0_84 = arith.constant 0 : index
    %c0_85 = arith.constant 0 : index
    %140 = vector.load %arg5[%c1_83, %c0_84, %c0_85] : memref<2x128x384xf32, #tpu.memory_space<vmem>>, vector<1x128x384xf32>
    %141 = vector.shape_cast %140 : vector<1x128x384xf32> to vector<128x384xf32>
    %cst_86 = arith.constant dense<0.000000e+00> : vector<24x384xf32>
    %142 = tpu.matmul %139, %141, %cst_86 {dimension_numbers = #tpu.dot_dimension_numbers<[1], [0], [0], [1], [0, 0, 1, 1], [], []>} : vector<24x128xf32>, vector<128x384xf32>, vector<24x384xf32> -> vector<24x384xf32>
    %c1_87 = arith.constant 1 : index
    %c0_88 = arith.constant 0 : index
    %c0_89 = arith.constant 0 : index
    %143 = vector.load %arg6[%c1_87, %c0_88, %c0_89] : memref<2x24x384xf32, #tpu.memory_space<vmem>>, vector<1x24x384xf32>
    %144 = vector.shape_cast %143 : vector<1x24x384xf32> to vector<24x384xf32>
    %145 = arith.addf %142, %144 : vector<24x384xf32>
    %146 = vector.extract_strided_slice %145 {offsets = [0, 0], sizes = [24, 128], strides = [1, 1]} : vector<24x384xf32> to vector<24x128xf32>
    %147 = vector.extract_strided_slice %145 {offsets = [0, 128], sizes = [24, 128], strides = [1, 1]} : vector<24x384xf32> to vector<24x128xf32>
    %148 = vector.extract_strided_slice %145 {offsets = [0, 256], sizes = [24, 128], strides = [1, 1]} : vector<24x384xf32> to vector<24x128xf32>
    %149 = tpu.concatenate %146, %146 in 0 : vector<24x128xf32>, vector<24x128xf32> -> vector<48x128xf32>
    %150 = arith.mulf %149, %0 : vector<48x128xf32>
    %cst_90 = arith.constant dense<0.000000e+00> : vector<48x24xf32>
    %151 = tpu.matmul %150, %147, %cst_90 {dimension_numbers = #tpu.dot_dimension_numbers<[1], [1], [0], [0], [0, 0, 1, 0], [], []>} : vector<48x128xf32>, vector<24x128xf32>, vector<48x24xf32> -> vector<48x24xf32>
    %152 = arith.addf %151, %1 : vector<48x24xf32>
    %cst_91 = arith.constant dense<0xFF800000> : vector<48xf32>
    %153 = vector.multi_reduction <maximumf>, %152, %cst_91 [1] : vector<48x24xf32> to vector<48xf32>
    %154 = vector.shape_cast %153 : vector<48xf32> to vector<48x1xf32>
    %155 = vector.broadcast %154 : vector<48x1xf32> to vector<48x24xf32>
    %156 = arith.subf %152, %155 : vector<48x24xf32>
    %157 = math.exp %156 : vector<48x24xf32>
    %cst_92 = arith.constant dense<0.000000e+00> : vector<48xf32>
    %158 = vector.multi_reduction <add>, %157, %cst_92 [1] : vector<48x24xf32> to vector<48xf32>
    %159 = vector.shape_cast %158 : vector<48xf32> to vector<48x1xf32>
    %160 = tpu.reciprocal %159 {approx = true} : vector<48x1xf32> -> vector<48x1xf32>
    %161 = vector.broadcast %160 : vector<48x1xf32> to vector<48x24xf32>
    %162 = arith.mulf %157, %161 : vector<48x24xf32>
    %cst_93 = arith.constant dense<0.000000e+00> : vector<48x128xf32>
    %163 = tpu.matmul %162, %148, %cst_93 {dimension_numbers = #tpu.dot_dimension_numbers<[1], [0], [0], [1], [0, 0, 1, 1], [], []>} : vector<48x24xf32>, vector<24x128xf32>, vector<48x128xf32> -> vector<48x128xf32>
    %164 = arith.mulf %163, %0 : vector<48x128xf32>
    %165 = vector.extract_strided_slice %164 {offsets = [0, 0], sizes = [24, 128], strides = [1, 1]} : vector<48x128xf32> to vector<24x128xf32>
    %166 = vector.extract_strided_slice %164 {offsets = [24, 0], sizes = [24, 128], strides = [1, 1]} : vector<48x128xf32> to vector<24x128xf32>
    %167 = arith.addf %165, %166 : vector<24x128xf32>
    %c1_94 = arith.constant 1 : index
    %c0_95 = arith.constant 0 : index
    %c0_96 = arith.constant 0 : index
    %168 = vector.load %arg7[%c1_94, %c0_95, %c0_96] : memref<2x128x128xf32, #tpu.memory_space<vmem>>, vector<1x128x128xf32>
    %169 = vector.shape_cast %168 : vector<1x128x128xf32> to vector<128x128xf32>
    %cst_97 = arith.constant dense<0.000000e+00> : vector<24x128xf32>
    %170 = tpu.matmul %167, %169, %cst_97 {dimension_numbers = #tpu.dot_dimension_numbers<[1], [0], [0], [1], [0, 0, 1, 1], [], []>} : vector<24x128xf32>, vector<128x128xf32>, vector<24x128xf32> -> vector<24x128xf32>
    %171 = arith.addf %115, %170 : vector<24x128xf32>
    %c1_98 = arith.constant 1 : index
    %c0_99 = arith.constant 0 : index
    %c0_100 = arith.constant 0 : index
    %172 = vector.load %arg8[%c1_98, %c0_99, %c0_100] : memref<2x24x128xf32, #tpu.memory_space<vmem>>, vector<1x24x128xf32>
    %173 = vector.shape_cast %172 : vector<1x24x128xf32> to vector<24x128xf32>
    %174 = arith.addf %171, %173 : vector<24x128xf32>
    %c1_101 = arith.constant 1 : index
    %c1_102 = arith.constant 1 : index
    %c0_103 = arith.constant 0 : index
    %c0_104 = arith.constant 0 : index
    %175 = vector.load %arg3[%c1_101, %c1_102, %c0_103, %c0_104] : memref<2x2x24x128xf32, #tpu.memory_space<vmem>>, vector<1x1x24x128xf32>
    %176 = vector.shape_cast %175 : vector<1x1x24x128xf32> to vector<24x128xf32>
    %c1_105 = arith.constant 1 : index
    %c1_106 = arith.constant 1 : index
    %c0_107 = arith.constant 0 : index
    %c0_108 = arith.constant 0 : index
    %177 = vector.load %arg4[%c1_105, %c1_106, %c0_107, %c0_108] : memref<2x2x24x128xf32, #tpu.memory_space<vmem>>, vector<1x1x24x128xf32>
    %178 = vector.shape_cast %177 : vector<1x1x24x128xf32> to vector<24x128xf32>
    %cst_109 = arith.constant dense<0.000000e+00> : vector<24xf32>
    %179 = vector.multi_reduction <add>, %174, %cst_109 [1] : vector<24x128xf32> to vector<24xf32>
    %180 = vector.shape_cast %179 : vector<24xf32> to vector<24x1xf32>
    %cst_110 = arith.constant 3.125000e-02 : f32
    %181 = vector.broadcast %cst_110 : f32 to vector<24x1xf32>
    %182 = arith.mulf %180, %181 : vector<24x1xf32>
    %183 = arith.mulf %174, %174 : vector<24x128xf32>
    %cst_111 = arith.constant dense<0.000000e+00> : vector<24xf32>
    %184 = vector.multi_reduction <add>, %183, %cst_111 [1] : vector<24x128xf32> to vector<24xf32>
    %185 = vector.shape_cast %184 : vector<24xf32> to vector<24x1xf32>
    %cst_112 = arith.constant 3.125000e-02 : f32
    %186 = vector.broadcast %cst_112 : f32 to vector<24x1xf32>
    %187 = arith.mulf %185, %186 : vector<24x1xf32>
    %188 = arith.mulf %182, %182 : vector<24x1xf32>
    %189 = arith.subf %187, %188 : vector<24x1xf32>
    %190 = vector.broadcast %182 : vector<24x1xf32> to vector<24x128xf32>
    %191 = arith.subf %174, %190 : vector<24x128xf32>
    %cst_113 = arith.constant 9.99999974E-6 : f32
    %192 = vector.broadcast %cst_113 : f32 to vector<24x1xf32>
    %193 = arith.addf %189, %192 : vector<24x1xf32>
    %194 = math.rsqrt %193 : vector<24x1xf32>
    %195 = vector.broadcast %194 : vector<24x1xf32> to vector<24x128xf32>
    %196 = arith.mulf %191, %195 : vector<24x128xf32>
    %197 = arith.mulf %196, %176 : vector<24x128xf32>
    %198 = arith.addf %197, %178 : vector<24x128xf32>
    %c1_114 = arith.constant 1 : index
    %c0_115 = arith.constant 0 : index
    %c0_116 = arith.constant 0 : index
    %199 = vector.load %arg9[%c1_114, %c0_115, %c0_116] : memref<2x128x512xf32, #tpu.memory_space<vmem>>, vector<1x128x512xf32>
    %200 = vector.shape_cast %199 : vector<1x128x512xf32> to vector<128x512xf32>
    %cst_117 = arith.constant dense<0.000000e+00> : vector<24x512xf32>
    %201 = tpu.matmul %198, %200, %cst_117 {dimension_numbers = #tpu.dot_dimension_numbers<[1], [0], [0], [1], [0, 0, 1, 1], [], []>} : vector<24x128xf32>, vector<128x512xf32>, vector<24x512xf32> -> vector<24x512xf32>
    %c1_118 = arith.constant 1 : index
    %c0_119 = arith.constant 0 : index
    %c0_120 = arith.constant 0 : index
    %202 = vector.load %arg10[%c1_118, %c0_119, %c0_120] : memref<2x24x512xf32, #tpu.memory_space<vmem>>, vector<1x24x512xf32>
    %203 = vector.shape_cast %202 : vector<1x24x512xf32> to vector<24x512xf32>
    %204 = arith.addf %201, %203 : vector<24x512xf32>
    %cst_121 = arith.constant 5.000000e-01 : f32
    %205 = vector.broadcast %cst_121 : f32 to vector<24x512xf32>
    %206 = arith.mulf %205, %204 : vector<24x512xf32>
    %cst_122 = arith.constant 4.471500e-02 : f32
    %207 = vector.broadcast %cst_122 : f32 to vector<24x512xf32>
    %208 = arith.mulf %207, %204 : vector<24x512xf32>
    %209 = arith.mulf %208, %204 : vector<24x512xf32>
    %210 = arith.mulf %209, %204 : vector<24x512xf32>
    %211 = arith.addf %204, %210 : vector<24x512xf32>
    %cst_123 = arith.constant 0.797884583 : f32
    %212 = vector.broadcast %cst_123 : f32 to vector<24x512xf32>
    %213 = arith.mulf %212, %211 : vector<24x512xf32>
    %214 = math.tanh %213 : vector<24x512xf32>
    %cst_124 = arith.constant 1.000000e+00 : f32
    %215 = vector.broadcast %cst_124 : f32 to vector<24x512xf32>
    %216 = arith.addf %215, %214 : vector<24x512xf32>
    %217 = arith.mulf %206, %216 : vector<24x512xf32>
    %c1_125 = arith.constant 1 : index
    %c0_126 = arith.constant 0 : index
    %c0_127 = arith.constant 0 : index
    %218 = vector.load %arg11[%c1_125, %c0_126, %c0_127] : memref<2x512x128xf32, #tpu.memory_space<vmem>>, vector<1x512x128xf32>
    %219 = vector.shape_cast %218 : vector<1x512x128xf32> to vector<512x128xf32>
    %cst_128 = arith.constant dense<0.000000e+00> : vector<24x128xf32>
    %220 = tpu.matmul %217, %219, %cst_128 {dimension_numbers = #tpu.dot_dimension_numbers<[1], [0], [0], [1], [0, 0, 1, 1], [], []>} : vector<24x512xf32>, vector<512x128xf32>, vector<24x128xf32> -> vector<24x128xf32>
    %221 = arith.addf %174, %220 : vector<24x128xf32>
    %c1_129 = arith.constant 1 : index
    %c0_130 = arith.constant 0 : index
    %c0_131 = arith.constant 0 : index
    %222 = vector.load %arg12[%c1_129, %c0_130, %c0_131] : memref<2x24x128xf32, #tpu.memory_space<vmem>>, vector<1x24x128xf32>
    %223 = vector.shape_cast %222 : vector<1x24x128xf32> to vector<24x128xf32>
    %224 = arith.addf %221, %223 : vector<24x128xf32>
    %c0_132 = arith.constant 0 : index
    %c0_133 = arith.constant 0 : index
    %225 = vector.load %arg13[%c0_132, %c0_133] : memref<24x128xf32, #tpu.memory_space<vmem>>, vector<24x128xf32>
    %226 = arith.mulf %224, %225 : vector<24x128xf32>
    %cst_134 = arith.constant dense<0.000000e+00> : vector<24xf32>
    %227 = vector.multi_reduction <add>, %226, %cst_134 [1] : vector<24x128xf32> to vector<24xf32>
    %228 = vector.shape_cast %227 : vector<24xf32> to vector<24x1xf32>
    %c0_135 = arith.constant 0 : index
    %c0_136 = arith.constant 0 : index
    %229 = vector.load %arg15[%c0_135, %c0_136] : memref<6x24xf32, #tpu.memory_space<vmem>>, vector<6x24xf32>
    %cst_137 = arith.constant dense<0.000000e+00> : vector<6x1xf32>
    %230 = tpu.matmul %229, %228, %cst_137 {dimension_numbers = #tpu.dot_dimension_numbers<[1], [0], [0], [1], [0, 0, 1, 1], [], []>} : vector<6x24xf32>, vector<24x1xf32>, vector<6x1xf32> -> vector<6x1xf32>
    %c0_138 = arith.constant 0 : index
    %c0_139 = arith.constant 0 : index
    %231 = vector.load %arg14[%c0_138, %c0_139] : memref<6x1xf32, #tpu.memory_space<vmem>>, vector<6x1xf32>
    %232 = arith.addf %230, %231 : vector<6x1xf32>
    %cst_140 = arith.constant 0.000000e+00 : f32
    %233 = vector.broadcast %cst_140 : f32 to vector<6x1xf32>
    %234 = arith.minimumf %232, %233 : vector<6x1xf32>
    %235 = vector.extract_strided_slice %234 {offsets = [0, 0], sizes = [2, 1], strides = [1, 1]} : vector<6x1xf32> to vector<2x1xf32>
    %236 = vector.extract_strided_slice %234 {offsets = [2, 0], sizes = [2, 1], strides = [1, 1]} : vector<6x1xf32> to vector<2x1xf32>
    %237 = arith.addf %235, %236 : vector<2x1xf32>
    %238 = vector.extract_strided_slice %234 {offsets = [4, 0], sizes = [2, 1], strides = [1, 1]} : vector<6x1xf32> to vector<2x1xf32>
    %239 = arith.addf %237, %238 : vector<2x1xf32>
    %cst_141 = arith.constant 0.333333343 : f32
    %240 = vector.broadcast %cst_141 : f32 to vector<2x1xf32>
    %241 = arith.mulf %239, %240 : vector<2x1xf32>
    %c0_142 = arith.constant 0 : index
    %c0_143 = arith.constant 0 : index
    %242 = vector.load %arg18[%c0_142, %c0_143] : memref<2x1xf32, #tpu.memory_space<vmem>>, vector<2x1xf32>
    tpu.vector_store %arg18[%c0_142, %c0_143], %241 {strides = array<i32>} : memref<2x1xf32, #tpu.memory_space<vmem>>, vector<2x1xf32>,
    return
  }
}

</mosaic_0001>

<bundles_post_ra>
// kernel: tpu_custom_call.1
= control target key start
LH: loop header
LB: loop body
LE: loop exit
PB: predicated region body
PF: predicated region fallthrough
CT: control target
= control target key end

     0   :  { %s5448_s0 = inlined_call_operand.hbm [shape: f32[24,32], index: 0, kind: input, shape index: {}]   ;;  %s5449_s1 = inlined_call_operand.hbm [shape: f32[32,128], index: 1, kind: input, shape index: {}]   ;;  %s5450_s2 = inlined_call_operand.hbm [shape: f32[24,128], index: 2, kind: input, shape index: {}]   ;;  %s5451_s3 = inlined_call_operand.hbm [shape: f32[2,2,24,128], index: 3, kind: input, shape index: {}]   ;;  %s5452_s4 = inlined_call_operand.vmem [shape: f32[2,2,24,128], index: 4, kind: input, shape index: {}]   ;;  %s5453_s5 = inlined_call_operand.hbm [shape: f32[2,128,384], index: 5, kind: input, shape index: {}]   ;;  %s5454_s6 = inlined_call_operand.hbm [shape: f32[2,24,384], index: 6, kind: input, shape index: {}]   ;;  %s5455_s7 = inlined_call_operand.hbm [shape: f32[2,128,128], index: 7, kind: input, shape index: {}]   ;;  %s5456_s8 = inlined_call_operand.hbm [shape: f32[2,24,128], index: 8, kind: input, shape index: {}]   ;;  %s5457_s9 = inlined_call_operand.hbm [shape: f32[2,128,512], index: 9, kind: input, shape index: {}]   ;;  %s5458_s10 = inlined_call_operand.hbm [shape: f32[2,24,512], index: 10, kind: input, shape index: {}]   ;;  %s5459_s11 = inlined_call_operand.hbm [shape: f32[2,512,128], index: 11, kind: input, shape index: {}]   ;;  %s5460_s12 = inlined_call_operand.hbm [shape: f32[2,24,128], index: 12, kind: input, shape index: {}]   ;;  %s5461_s13 = inlined_call_operand.vmem [shape: f32[24,128], index: 13, kind: input, shape index: {}]   ;;  %s5462_s14 = inlined_call_operand.vmem [shape: f32[6,1], index: 14, kind: input, shape index: {}]   ;;  %s5463_s15 = inlined_call_operand.hbm [shape: f32[6,24], index: 15, kind: input, shape index: {}]   ;;  %s5464_s16 = inlined_call_operand.hbm [shape: f32[48,128], index: 16, kind: input, shape index: {}]   ;;  %s5465_s17 = inlined_call_operand.vmem [shape: f32[48,24], index: 17, kind: input, shape index: {}]   ;;  %s5466_s18 = inlined_call_operand.vmem [shape: f32[2,1], index: 18, kind: output, shape index: {}]  }
   0x1   :  { %5471 = sst [smem:[#allocation32_spill]] %s5448_s0 }
   0x2   :  { %5472 = sst [smem:[#allocation33_spill]] %s5449_s1 }
   0x3   :  { %5473 = sst [smem:[#allocation34_spill]] %s5450_s2 }
   0x4   :  { %5474 = sst [smem:[#allocation35_spill]] %s5466_s18 }
   0x5   :  { %23 = vsyncpa [#allocation3], 0 }
   0x6   :  { %24 = vsyncpa [#allocation5], 0 }
   0x7   :  { %25 = vsyncpa [#allocation8], 0 }
   0x8   :  { %26 = vsyncpa [#allocation11], 0 }
   0x9   :  { %27 = vsyncpa [#allocation14], 0 }
   0xa   :  { %28 = vsyncpa [#allocation17], 0 }
   0xb   :  { %29 = vsyncpa [#allocation20], 0 }
   0xc   :  { %30 = vsyncpa [#allocation23], 0  ;;  %s4564_s27 = smov [#allocation4]   ;;  %s4565_s29 = smov [#allocation7]  }
   0xd   :  { %s48_s28 = sshll.u32 %s4564_s27, 4  ;;  %s72_s30 = sshll.u32 %s4565_s29, 4  ;;  %s49_s28 = int_to_ptr.vmem [resolvable:$true] %s48_s28  ;;  %s4682_s30 = int_to_ptr.vmem [resolvable:$true] %s72_s30 }
   0xe   :  { %s5475_s1 = sld [smem:[#allocation33_spill]] }
  0x14   :  { %s4240_s20 = scalar_lea.hbm %s5475_s1, 512 }
  0x15   :  { %p4241_p0 = scmp.ne.s32.totalorder %s5475_s1, %s4240_s20  ;;  %p4244_p1 = scmp.lt.u32.totalorder %s4240_s20, %s5475_s1 }
  0x17   :  { %p4246_p2 = pnand %p4244_p1, %p4241_p0 }
  0x19   :  { %4249 = shalt.err (!%p4246_p2)
}
  0x1a   :  { %s4250_s24 = scalar_lea.vmem %s49_s28, 512  ;;  %p4255_p4 = scmp.lt.s32.totalorder %s49_s28, %s49_s28 }
  0x1b   :  { %p4251_p3 = scmp.ne.s32.totalorder %s49_s28, %s4250_s24  ;;  %p4256_p5 = scmp.lt.s32.totalorder %s4250_s24, %s4250_s24 }
  0x1d   :  { %p4257_p6 = por %p4256_p5, %p4255_p4 }
  0x1f   :  { %p4258_p7 = pnand %p4257_p6, %p4251_p3 }
  0x21   :  { %4261 = shalt.err (!%p4258_p7)
}
  0x22   :  { %s4566_s25 = smov 128   ;;  %s4567_s26 = smov 8  }
  0x23   :  { %54 = dma.hbm_to_vmem [thread:$0]  %s5475_s1, 512, %s49_s28, [#allocation5], %s4566_s25, %s4566_s25, %s4567_s26  }
  0x24   :  { %s4262_s20 = scalar_lea.hbm %s5451_s3, 1536 }
  0x25   :  { %p4263_p8 = scmp.ne.s32.totalorder %s5451_s3, %s4262_s20  ;;  %p4266_p9 = scmp.lt.u32.totalorder %s4262_s20, %s5451_s3 }
  0x27   :  { %p4268_p10 = pnand %p4266_p9, %p4263_p8 }
  0x29   :  { %4271 = shalt.err (!%p4268_p10)
}
  0x2a   :  { %s4272_s24 = scalar_lea.vmem %s4682_s30, 1536  ;;  %p4277_p12 = scmp.lt.s32.totalorder %s4682_s30, %s4682_s30 }
  0x2b   :  { %p4273_p11 = scmp.ne.s32.totalorder %s4682_s30, %s4272_s24  ;;  %p4278_p13 = scmp.lt.s32.totalorder %s4272_s24, %s4272_s24 }
  0x2d   :  { %p4279_p0 = por %p4278_p13, %p4277_p12 }
  0x2f   :  { %p4280_p1 = pnand %p4279_p0, %p4273_p11 }
  0x31   :  { %4283 = shalt.err (!%p4280_p1)
}
  0x32   :  { %78 = dma.hbm_to_vmem [thread:$0]  %s5451_s3, 1536, %s4682_s30, [#allocation8], %s4566_s25, %s4566_s25, %s4567_s26  }
  0x33   :  { %s4568_s27 = smov [#allocation10]   ;;  %s4569_s0 = smov [#allocation13]  }
  0x34   :  { %s98_s29 = sshll.u32 %s4568_s27, 4  ;;  %s122_s19 = sshll.u32 %s4569_s0, 4  ;;  %s99_s29 = int_to_ptr.vmem [resolvable:$true] %s98_s29  ;;  %s4719_s19 = int_to_ptr.vmem [resolvable:$true] %s122_s19 }
  0x35   :  { %s4284_s22 = scalar_lea.hbm %s5454_s6, 2304 }
  0x36   :  { %p4285_p2 = scmp.ne.s32.totalorder %s5454_s6, %s4284_s22  ;;  %p4288_p3 = scmp.lt.u32.totalorder %s4284_s22, %s5454_s6 }
  0x38   :  { %p4290_p4 = pnand %p4288_p3, %p4285_p2 }
  0x3a   :  { %4293 = shalt.err (!%p4290_p4)
}
  0x3b   :  { %s4294_s3 = scalar_lea.vmem %s99_s29, 2304  ;;  %p4299_p6 = scmp.lt.s32.totalorder %s99_s29, %s99_s29 }
  0x3c   :  { %p4295_p5 = scmp.ne.s32.totalorder %s99_s29, %s4294_s3  ;;  %p4300_p7 = scmp.lt.s32.totalorder %s4294_s3, %s4294_s3 }
  0x3e   :  { %p4301_p8 = por %p4300_p7, %p4299_p6 }
  0x40   :  { %p4302_p9 = pnand %p4301_p8, %p4295_p5 }
  0x42   :  { %4305 = shalt.err (!%p4302_p9)
}
  0x43   :  { %s4570_s30 = smov 384   ;;  %s4571_s28 = smov 24  }
  0x44   :  { %104 = dma.hbm_to_vmem [thread:$0]  %s5454_s6, 2304, %s99_s29, [#allocation11], %s4570_s30, %s4570_s30, %s4571_s28  }
  0x45   :  { %s4306_s20 = scalar_lea.hbm %s5456_s8, 768 }
  0x46   :  { %p4307_p10 = scmp.ne.s32.totalorder %s5456_s8, %s4306_s20  ;;  %p4310_p11 = scmp.lt.u32.totalorder %s4306_s20, %s5456_s8 }
  0x48   :  { %p4312_p12 = pnand %p4310_p11, %p4307_p10 }
  0x4a   :  { %4315 = shalt.err (!%p4312_p12)
}
  0x4b   :  { %s4316_s24 = scalar_lea.vmem %s4719_s19, 768  ;;  %p4321_p0 = scmp.lt.s32.totalorder %s4719_s19, %s4719_s19 }
  0x4c   :  { %p4317_p13 = scmp.ne.s32.totalorder %s4719_s19, %s4316_s24  ;;  %p4322_p1 = scmp.lt.s32.totalorder %s4316_s24, %s4316_s24 }
  0x4e   :  { %p4323_p2 = por %p4322_p1, %p4321_p0 }
  0x50   :  { %p4324_p3 = pnand %p4323_p2, %p4317_p13 }
  0x52   :  { %4327 = shalt.err (!%p4324_p3)
}
  0x53   :  { %128 = dma.hbm_to_vmem [thread:$0]  %s5456_s8, 768, %s4719_s19, [#allocation14], %s4566_s25, %s4566_s25, %s4567_s26  }
  0x54   :  { %s4572_s3 = smov [#allocation16]   ;;  %s4573_s27 = smov [#allocation19]  }
  0x55   :  { %s146_s1 = sshll.u32 %s4572_s3, 4  ;;  %s170_s18 = sshll.u32 %s4573_s27, 4  ;;  %s147_s1 = int_to_ptr.vmem [resolvable:$true] %s146_s1  ;;  %s4756_s18 = int_to_ptr.vmem [resolvable:$true] %s170_s18 }
  0x56   :  { %s4328_s21 = scalar_lea.hbm %s5458_s10, 3072 }
  0x57   :  { %p4329_p4 = scmp.ne.s32.totalorder %s5458_s10, %s4328_s21  ;;  %p4332_p5 = scmp.lt.u32.totalorder %s4328_s21, %s5458_s10 }
  0x59   :  { %p4334_p6 = pnand %p4332_p5, %p4329_p4 }
  0x5b   :  { %4337 = shalt.err (!%p4334_p6)
}
  0x5c   :  { %s4338_s8 = scalar_lea.vmem %s147_s1, 3072  ;;  %p4343_p8 = scmp.lt.s32.totalorder %s147_s1, %s147_s1 }
  0x5d   :  { %p4339_p7 = scmp.ne.s32.totalorder %s147_s1, %s4338_s8  ;;  %p4344_p9 = scmp.lt.s32.totalorder %s4338_s8, %s4338_s8 }
  0x5f   :  { %p4345_p10 = por %p4344_p9, %p4343_p8 }
  0x61   :  { %p4346_p11 = pnand %p4345_p10, %p4339_p7 }
  0x63   :  { %4349 = shalt.err (!%p4346_p11)
}
  0x64   :  { %s5470_s19 = smov 512   ;;  %s4575_s6 = smov 32  }
  0x65   :  { %152 = dma.hbm_to_vmem [thread:$0]  %s5458_s10, 3072, %s147_s1, [#allocation17], %s5470_s19, %s5470_s19, %s4575_s6  }
  0x66   :  { %s4350_s20 = scalar_lea.hbm %s5460_s12, 768 }
  0x67   :  { %p4351_p12 = scmp.ne.s32.totalorder %s5460_s12, %s4350_s20  ;;  %p4354_p13 = scmp.lt.u32.totalorder %s4350_s20, %s5460_s12 }
  0x69   :  { %p4356_p0 = pnand %p4354_p13, %p4351_p12 }
  0x6b   :  { %4359 = shalt.err (!%p4356_p0)
}
  0x6c   :  { %s4360_s24 = scalar_lea.vmem %s4756_s18, 768  ;;  %p4365_p2 = scmp.lt.s32.totalorder %s4756_s18, %s4756_s18 }
  0x6d   :  { %p4361_p1 = scmp.ne.s32.totalorder %s4756_s18, %s4360_s24  ;;  %p4366_p3 = scmp.lt.s32.totalorder %s4360_s24, %s4360_s24 }
  0x6f   :  { %p4367_p4 = por %p4366_p3, %p4365_p2 }
  0x71   :  { %p4368_p5 = pnand %p4367_p4, %p4361_p1 }
  0x73   :  { %4371 = shalt.err (!%p4368_p5)
}
  0x74   :  { %176 = dma.hbm_to_vmem [thread:$0]  %s5460_s12, 768, %s4756_s18, [#allocation20], %s4566_s25, %s4566_s25, %s4567_s26  }
  0x75   :  { %s4576_s8 = smov [#allocation2]   ;;  %s4577_s3 = smov [#allocation6]  }
  0x76   :  { %s36_s29 = sshll.u32 %s4576_s8, 4  ;;  %s60_s27 = sshll.u32 %s4577_s3, 4  ;;  %s37_s29 = int_to_ptr.vmem [resolvable:$true] %s36_s29  ;;  %s4793_s27 = int_to_ptr.vmem [resolvable:$true] %s60_s27 }
  0x77   :  { %s5476_s21 = sld [smem:[#allocation32_spill]] }
  0x7d   :  { %s4372_s22 = scalar_lea.hbm %s5476_s21, 384 }
  0x7e   :  { %p4373_p6 = scmp.ne.s32.totalorder %s5476_s21, %s4372_s22  ;;  %p4376_p7 = scmp.lt.u32.totalorder %s4372_s22, %s5476_s21 }
  0x80   :  { %p4378_p8 = pnand %p4376_p7, %p4373_p6 }
  0x82   :  { %4381 = shalt.err (!%p4378_p8)
}
  0x83   :  { %s4382_s12 = scalar_lea.vmem %s37_s29, 384  ;;  %p4387_p10 = scmp.lt.s32.totalorder %s37_s29, %s37_s29 }
  0x84   :  { %p4383_p9 = scmp.ne.s32.totalorder %s37_s29, %s4382_s12  ;;  %p4388_p11 = scmp.lt.s32.totalorder %s4382_s12, %s4382_s12 }
  0x86   :  { %p4389_p12 = por %p4388_p11, %p4387_p10 }
  0x88   :  { %p4390_p13 = pnand %p4389_p12, %p4383_p9 }
  0x8a   :  { %4393 = shalt.err (!%p4390_p13)
}
  0x8b   :  { %42 = dma.hbm_to_vmem [thread:$0]  %s5476_s21, 384, %s37_s29, [#allocation3], %s4566_s25, %s4566_s25, %s4567_s26  }
  0x8c   :  { %s5477_s19 = sld [smem:[#allocation34_spill]] }
  0x92   :  { %s4394_s3 = scalar_lea.hbm %s5477_s19, 384 }
  0x93   :  { %p4395_p0 = scmp.ne.s32.totalorder %s5477_s19, %s4394_s3  ;;  %p4398_p1 = scmp.lt.u32.totalorder %s4394_s3, %s5477_s19 }
  0x95   :  { %p4400_p2 = pnand %p4398_p1, %p4395_p0 }
  0x97   :  { %4403 = shalt.err (!%p4400_p2)
}
  0x98   :  { %s4404_s23 = scalar_lea.vmem %s4793_s27, 384  ;;  %p4409_p4 = scmp.lt.s32.totalorder %s4793_s27, %s4793_s27 }
  0x99   :  { %p4405_p3 = scmp.ne.s32.totalorder %s4793_s27, %s4404_s23  ;;  %p4410_p5 = scmp.lt.s32.totalorder %s4404_s23, %s4404_s23 }
  0x9b   :  { %p4411_p6 = por %p4410_p5, %p4409_p4 }
  0x9d   :  { %p4412_p7 = pnand %p4411_p6, %p4405_p3 }
  0x9f   :  { %4415 = shalt.err (!%p4412_p7)
}
  0xa0   :  { %66 = dma.hbm_to_vmem [thread:$0]  %s5477_s19, 384, %s4793_s27, [#allocation5], %s4566_s25, %s4566_s25, %s4567_s26  }
  0xa1   :  { %s4578_s24 = smov [#allocation9]   ;;  %s4579_s18 = smov [#allocation12]  }
  0xa2   :  { %s86_s12 = sshll.u32 %s4578_s24, 4  ;;  %s110_s10 = sshll.u32 %s4579_s18, 4  ;;  %s87_s12 = int_to_ptr.vmem [resolvable:$true] %s86_s12  ;;  %s4830_s10 = int_to_ptr.vmem [resolvable:$true] %s110_s10 }
  0xa3   :  { %s4416_s3 = scalar_lea.hbm %s5453_s5, 12288 }
  0xa4   :  { %p4417_p8 = scmp.ne.s32.totalorder %s5453_s5, %s4416_s3  ;;  %p4420_p9 = scmp.lt.u32.totalorder %s4416_s3, %s5453_s5 }
  0xa6   :  { %p4422_p10 = pnand %p4420_p9, %p4417_p8 }
  0xa8   :  { %4425 = shalt.err (!%p4422_p10)
}
  0xa9   :  { %s4426_s27 = scalar_lea.vmem %s87_s12, 12288  ;;  %p4431_p12 = scmp.lt.s32.totalorder %s87_s12, %s87_s12 }
  0xaa   :  { %p4427_p11 = scmp.ne.s32.totalorder %s87_s12, %s4426_s27  ;;  %p4432_p13 = scmp.lt.s32.totalorder %s4426_s27, %s4426_s27 }
  0xac   :  { %p4433_p0 = por %p4432_p13, %p4431_p12 }
  0xae   :  { %p4434_p1 = pnand %p4433_p0, %p4427_p11 }
  0xb0   :  { %4437 = shalt.err (!%p4434_p1)
}
  0xb1   :  { %92 = dma.hbm_to_vmem [thread:$0]  %s5453_s5, 12288, %s87_s12, [#allocation8], %s4570_s30, %s4570_s30, %s4571_s28  }
  0xb2   :  { %s4438_s24 = scalar_lea.hbm %s5455_s7, 4096 }
  0xb3   :  { %p4439_p2 = scmp.ne.s32.totalorder %s5455_s7, %s4438_s24  ;;  %p4442_p3 = scmp.lt.u32.totalorder %s4438_s24, %s5455_s7 }
  0xb5   :  { %p4444_p4 = pnand %p4442_p3, %p4439_p2 }
  0xb7   :  { %4447 = shalt.err (!%p4444_p4)
}
  0xb8   :  { %s4448_s0 = scalar_lea.vmem %s4830_s10, 4096  ;;  %p4453_p6 = scmp.lt.s32.totalorder %s4830_s10, %s4830_s10 }
  0xb9   :  { %p4449_p5 = scmp.ne.s32.totalorder %s4830_s10, %s4448_s0  ;;  %p4454_p7 = scmp.lt.s32.totalorder %s4448_s0, %s4448_s0 }
  0xbb   :  { %p4455_p8 = por %p4454_p7, %p4453_p6 }
  0xbd   :  { %p4456_p9 = pnand %p4455_p8, %p4449_p5 }
  0xbf   :  { %4459 = shalt.err (!%p4456_p9)
}
  0xc0   :  { %116 = dma.hbm_to_vmem [thread:$0]  %s5455_s7, 4096, %s4830_s10, [#allocation11], %s4566_s25, %s4566_s25, %s4567_s26  }
  0xc1   :  { %s4580_s28 = smov [#allocation15]   ;;  %s4581_s20 = smov [#allocation18]  }
  0xc2   :  { %s134_s12 = sshll.u32 %s4580_s28, 4  ;;  %s158_s22 = sshll.u32 %s4581_s20, 4  ;;  %s135_s12 = int_to_ptr.vmem [resolvable:$true] %s134_s12  ;;  %s4867_s22 = int_to_ptr.vmem [resolvable:$true] %s158_s22 }
  0xc3   :  { %s4460_s19 = scalar_lea.hbm %s5457_s9, 16384 }
  0xc4   :  { %p4461_p10 = scmp.ne.s32.totalorder %s5457_s9, %s4460_s19  ;;  %p4464_p11 = scmp.lt.u32.totalorder %s4460_s19, %s5457_s9 }
  0xc6   :  { %p4466_p12 = pnand %p4464_p11, %p4461_p10 }
  0xc8   :  { %4469 = shalt.err (!%p4466_p12)
}
  0xc9   :  { %s4470_s7 = scalar_lea.vmem %s135_s12, 16384  ;;  %p4475_p0 = scmp.lt.s32.totalorder %s135_s12, %s135_s12 }
  0xca   :  { %p4471_p13 = scmp.ne.s32.totalorder %s135_s12, %s4470_s7  ;;  %p4476_p1 = scmp.lt.s32.totalorder %s4470_s7, %s4470_s7 }
  0xcc   :  { %p4477_p2 = por %p4476_p1, %p4475_p0 }
  0xce   :  { %p4478_p3 = pnand %p4477_p2, %p4471_p13 }
  0xd0   :  { %4481 = shalt.err (!%p4478_p3)
}
  0xd1   :  { %s5478_s10 = smov 512   ;;  %s4482_s0 = scalar_lea.hbm %s5459_s11, 16384 }
  0xd2   :  { %140 = dma.hbm_to_vmem [thread:$0]  %s5457_s9, 16384, %s135_s12, [#allocation14], %s5478_s10, %s5478_s10, %s4575_s6  }
  0xd3   :  { %p4483_p4 = scmp.ne.s32.totalorder %s5459_s11, %s4482_s0  ;;  %p4486_p5 = scmp.lt.u32.totalorder %s4482_s0, %s5459_s11 }
  0xd5   :  { %p4488_p6 = pnand %p4486_p5, %p4483_p4 }
  0xd7   :  { %4491 = shalt.err (!%p4488_p6)
}
  0xd8   :  { %s4492_s2 = scalar_lea.vmem %s4867_s22, 16384  ;;  %p4497_p8 = scmp.lt.s32.totalorder %s4867_s22, %s4867_s22 }
  0xd9   :  { %p4493_p7 = scmp.ne.s32.totalorder %s4867_s22, %s4492_s2  ;;  %p4498_p9 = scmp.lt.s32.totalorder %s4492_s2, %s4492_s2 }
  0xdb   :  { %p4499_p10 = por %p4498_p9, %p4497_p8 }
  0xdd   :  { %p4500_p11 = pnand %p4499_p10, %p4493_p7 }
  0xdf   :  { %4503 = shalt.err (!%p4500_p11)
}
  0xe0   :  { %164 = dma.hbm_to_vmem [thread:$0]  %s5459_s11, 16384, %s4867_s22, [#allocation17], %s4566_s25, %s4566_s25, %s4567_s26  }
  0xe1   :  { %s4582_s12 = smov [#allocation21]   ;;  %s4583_s19 = smov [#allocation22]  }
  0xe2   :  { %s187_s27 = sshll.u32 %s4582_s12, 4  ;;  %s196_s23 = sshll.u32 %s4583_s19, 4  ;;  %s188_s27 = int_to_ptr.vmem [resolvable:$true] %s187_s27  ;;  %s4904_s23 = int_to_ptr.vmem [resolvable:$true] %s196_s23 }
  0xe3   :  { %s4504_s24 = scalar_lea.hbm %s5463_s15, 128 }
  0xe4   :  { %p4505_p12 = scmp.ne.s32.totalorder %s5463_s15, %s4504_s24  ;;  %p4508_p13 = scmp.lt.u32.totalorder %s4504_s24, %s5463_s15 }
  0xe6   :  { %p4510_p0 = pnand %p4508_p13, %p4505_p12 }
  0xe8   :  { %4513 = shalt.err (!%p4510_p0)
}
  0xe9   :  { %s4514_s11 = scalar_lea.vmem %s188_s27, 128  ;;  %p4519_p2 = scmp.lt.s32.totalorder %s188_s27, %s188_s27 }
  0xea   :  { %p4515_p1 = scmp.ne.s32.totalorder %s188_s27, %s4514_s11  ;;  %p4520_p3 = scmp.lt.s32.totalorder %s4514_s11, %s4514_s11 }
  0xec   :  { %p4521_p4 = por %p4520_p3, %p4519_p2 }
  0xee   :  { %p4522_p5 = pnand %p4521_p4, %p4515_p1 }
  0xf0   :  { %4525 = shalt.err (!%p4522_p5)
}
  0xf1   :  { %190 = dma.hbm_to_vmem [thread:$0]  %s5463_s15, 128, %s188_s27, [#allocation20]  }
  0xf2   :  { %s4526_s5 = scalar_lea.hbm %s5464_s16, 768 }
  0xf3   :  { %p4527_p6 = scmp.ne.s32.totalorder %s5464_s16, %s4526_s5  ;;  %p4530_p7 = scmp.lt.u32.totalorder %s4526_s5, %s5464_s16 }
  0xf5   :  { %p4532_p8 = pnand %p4530_p7, %p4527_p6 }
  0xf7   :  { %4535 = shalt.err (!%p4532_p8)
}
  0xf8   :  { %s4536_s9 = scalar_lea.vmem %s4904_s23, 768  ;;  %p4541_p10 = scmp.lt.s32.totalorder %s4904_s23, %s4904_s23 }
  0xf9   :  { %p4537_p9 = scmp.ne.s32.totalorder %s4904_s23, %s4536_s9  ;;  %p4542_p11 = scmp.lt.s32.totalorder %s4536_s9, %s4536_s9 }
  0xfb   :  { %p4543_p12 = por %p4542_p11, %p4541_p10 }
  0xfd   :  { %p4544_p13 = pnand %p4543_p12, %p4537_p9 }
  0xff   :  { %4547 = shalt.err (!%p4544_p13)
}
 0x100   :  { %202 = dma.hbm_to_vmem [thread:$0]  %s5464_s16, 768, %s4904_s23, [#allocation23], %s4566_s25, %s4566_s25, %s4567_s26  }
 0x101   :  { %4548 = dma.done.wait [#allocation3], 384  }
 0x102   :  { %4549 = vsyncadd [#allocation3], 4294966912 }
 0x103   :  { %4550 = dma.done.wait [#allocation5], 896  }
 0x104   :  { %4551 = vsyncadd [#allocation5], 4294966400 }
 0x105   :  { %4552 = dma.done.wait [#allocation8], 13824  }
 0x106   :  { %4553 = vsyncadd [#allocation8], 4294953472 }
 0x107   :  { %4554 = dma.done.wait [#allocation11], 6400  }
 0x108   :  { %4555 = vsyncadd [#allocation11], 4294960896 }
 0x109   :  { %4556 = dma.done.wait [#allocation14], 17152  }
 0x10a   :  { %4557 = vsyncadd [#allocation14], 4294950144 }
 0x10b   :  { %4558 = dma.done.wait [#allocation17], 19456  }
 0x10c   :  { %4559 = vsyncadd [#allocation17], 4294947840 }
 0x10d   :  { %4560 = dma.done.wait [#allocation20], 896  }
 0x10e   :  { %4561 = vsyncadd [#allocation20], 4294966400 }
 0x10f   :  { %4562 = dma.done.wait [#allocation23], 768  }
 0x110   :  { %4563 = vsyncadd [#allocation23], 4294966528  ;;  %v4584_v0 = vmov 0.0|0.0   ;;  %vm4585_vm0 = vmmov 0   ;;  %v4586_v1 = vmov 0.0   ;;  %v262_v2 = vld [vmem:[#allocation4] sm:$0xff] }
 0x111   :  { %3644 = vmatprep.subr.bf16.mxu0 %v4584_v0  ;;  %3402 = vmatprep.mubr.msk.f32.mxu0 %vm4585_vm0, %v4586_v1  ;;  %v263_v3 = vld [vmem:[#allocation4 + $0x8] sm:$0xff]  ;;  %v264_v4 = vld [vmem:[#allocation4 + $0x10] sm:$0xff]  ;;  %v265_v6 = vld [vmem:[#allocation4 + $0x18] sm:$0xff]  ;;  %vm269_vm1 = vcmask 261120   ;;  %vm731_vm2 = vcmask 195584   ;;  %vm3068_vm3 = vcmask 1024  }
 0x112   :  { %531 = vmatprep.mubr.f32.mxu1 %v4586_v1  ;;  %v3645_v5 = vpack.c.bf16 %v263_v3, %v262_v2  ;;  %v3648_v7 = vpack.c.bf16 %v265_v6, %v264_v4  ;;  %v259_v8 = vld [vmem:[#allocation2] sm:$0xff]  ;;  %v260_v9 = vld [vmem:[#allocation2 + $0x8] sm:$0xff]  ;;  %v261_v10 = vld [vmem:[#allocation2 + $0x10] sm:$0xff]  ;;  %s5479_s25 = sld [smem:[#allocation35_spill]] }
 0x113   :  { %v411_v11 = vld [vmem:[#allocation9 + $0x8] sm:$0xff]  ;;  %v414_v12 = vld [vmem:[#allocation9 + $0x20] sm:$0xff]  ;;  %v413_v15 = vld [vmem:[#allocation9 + $0x18] sm:$0xff] }
 0x114   :  { %3646 = vmatpush3.bf16.msra.mxu0 %v3645_v5  ;;  %v410_v13 = vld [vmem:[#allocation9] sm:$0xff]  ;;  %v3650_v14 = vpack.c.bf16 %v414_v12, %v411_v11  ;;  %v412_v16 = vld [vmem:[#allocation9 + $0x10] sm:$0xff]  ;;  %v415_v17 = vld [vmem:[#allocation9 + $0x28] sm:$0xff] }
 0x115   :  { %3647 = vmatprep.subr.bf16.mxu0 %v4584_v0  ;;  %v3652_v18 = vpack.c.bf16 %v413_v15, %v410_v13  ;;  %v3683_v19 = vpack.c.bf16 %v415_v17, %v412_v16  ;;  %v417_v20 = vld [vmem:[#allocation9 + $0x38] sm:$0xff]  ;;  %v420_v21 = vld [vmem:[#allocation9 + $0x50] sm:$0xff]  ;;  %v266_v23 = vld [vmem:[#allocation6] sm:$0xff] }
 0x116   :  { %3651 = vmatprep.subr.bf16.mxu1 %v3650_v14  ;;  %v3654_v22 = vpack.c.bf16 %v420_v21, %v417_v20  ;;  %v267_v27 = vld [vmem:[#allocation6 + $0x8] sm:$0xff]  ;;  %v268_v32 = vld [vmem:[#allocation6 + $0x10] sm:$0xff]  ;;  %v419_v39 = vld [vmem:[#allocation9 + $0x48] sm:$0xff] }
 0x117   :  { %3653 = vmatpush1.bf16.msra.mxu1 %v3652_v18  ;;  %v416_v38 = vld [vmem:[#allocation9 + $0x30] sm:$0xff]  ;;  %v418_v40 = vld [vmem:[#allocation9 + $0x40] sm:$0xff]  ;;  %v421_v42 = vld [vmem:[#allocation9 + $0x58] sm:$0xff] }
 0x118   :  { %3649 = vmatpush3.bf16.msra.mxu0 %v3648_v7  ;;  %3655 = vmatprep.subr.bf16.mxu1 %v3654_v22  ;;  %v3656_v41 = vpack.c.bf16 %v419_v39, %v416_v38  ;;  %v3686_v43 = vpack.c.bf16 %v421_v42, %v418_v40  ;;  %v423_v44 = vld [vmem:[#allocation9 + $0x68] sm:$0xff]  ;;  %v426_v45 = vld [vmem:[#allocation9 + $0x80] sm:$0xff]  ;;  %v425_v48 = vld [vmem:[#allocation9 + $0x78] sm:$0xff] }
 0x119   :  { %3682 = vmatprep.subr.bf16.mxu0 %v4584_v0  ;;  %v3658_v46 = vpack.c.bf16 %v426_v45, %v423_v44  ;;  %v422_v47 = vld [vmem:[#allocation9 + $0x60] sm:$0xff]  ;;  %v424_v49 = vld [vmem:[#allocation9 + $0x70] sm:$0xff]  ;;  %v427_v51 = vld [vmem:[#allocation9 + $0x88] sm:$0xff] }
 0x11a   :  { %v3660_v50 = vpack.c.bf16 %v425_v48, %v422_v47  ;;  %v3689_v52 = vpack.c.bf16 %v427_v51, %v424_v49  ;;  %v429_v53 = vld [vmem:[#allocation9 + $0x98] sm:$0xff]  ;;  %v432_v54 = vld [vmem:[#allocation9 + $0xb0] sm:$0xff]  ;;  %v431_v57 = vld [vmem:[#allocation9 + $0xa8] sm:$0xff] }
 0x11b   :  { %3403 = vmatmul.mubr.msk.f32.vlgmr.msra.gmra.mrb[0].mxu0 %vm269_vm1, %v259_v8  ;;  %3657 = vmatpush1.bf16.msra.mxu1 %v3656_v41  ;;  %v3662_v55 = vpack.c.bf16 %v432_v54, %v429_v53  ;;  %v428_v56 = vld [vmem:[#allocation9 + $0x90] sm:$0xff]  ;;  %v430_v58 = vld [vmem:[#allocation9 + $0xa0] sm:$0xff]  ;;  %v433_v60 = vld [vmem:[#allocation9 + $0xb8] sm:$0xff] }
 0x11c   :  { %3405 = vmatprep.mubr.msk.f32.mxu0 %vm4585_vm0, %v4586_v1  ;;  %3684 = vmatpush3.bf16.msra.mxu0 %v3683_v19  ;;  %v3664_v59 = vpack.c.bf16 %v431_v57, %v428_v56  ;;  %v3692_v61 = vpack.c.bf16 %v433_v60, %v430_v58  ;;  %v435_v62 = vld [vmem:[#allocation9 + $0xc8] sm:$0xff]  ;;  %v438_v63 = vld [vmem:[#allocation9 + $0xe0] sm:$0xff]  ;;  %v437_v4 = vld [vmem:[#allocation9 + $0xd8] sm:$0xff] }
 0x11d   :  { %3685 = vmatprep.subr.bf16.mxu0 %v4584_v0  ;;  %3659 = vmatprep.subr.bf16.mxu1 %v3658_v46  ;;  %v3666_v2 = vpack.c.bf16 %v438_v63, %v435_v62  ;;  %v434_v3 = vld [vmem:[#allocation9 + $0xc0] sm:$0xff]  ;;  %v436_v5 = vld [vmem:[#allocation9 + $0xd0] sm:$0xff]  ;;  %v439_v7 = vld [vmem:[#allocation9 + $0xe8] sm:$0xff] }
 0x11e   :  { %v3668_v6 = vpack.c.bf16 %v437_v4, %v434_v3  ;;  %v3695_v8 = vpack.c.bf16 %v439_v7, %v436_v5  ;;  %v440_v12 = vld [vmem:[#allocation9 + $0xf0] sm:$0xff]  ;;  %v443_v13 = vld [vmem:[#allocation9 + $0x108] sm:$0xff]  ;;  %v442_v14 = vld [vmem:[#allocation9 + $0x100] sm:$0xff] }
 0x11f   :  { %3406 = vmatmul.mubr.msk.f32.gmra.mrb[2].mxu0 %vm269_vm1, %v260_v9  ;;  %3661 = vmatpush1.bf16.msra.mxu1 %v3660_v50  ;;  %v441_v9 = vld [vmem:[#allocation9 + $0xf8] sm:$0xff]  ;;  %v3672_v15 = vpack.c.bf16 %v443_v13, %v440_v12  ;;  %v447_v18 = vld [vmem:[#allocation9 + $0x128] sm:$0xff]  ;;  %v450_v19 = vld [vmem:[#allocation9 + $0x140] sm:$0xff] }
 0x120   :  { %3408 = vmatprep.mubr.msk.f32.mxu0 %vm4585_vm0, %v4586_v1  ;;  %3687 = vmatpush3.bf16.msra.mxu0 %v3686_v43  ;;  %v445_v16 = vld [vmem:[#allocation9 + $0x118] sm:$0xff]  ;;  %v3674_v20 = vpack.c.bf16 %v450_v19, %v447_v18  ;;  %v446_v21 = vld [vmem:[#allocation9 + $0x120] sm:$0xff]  ;;  %v361_v13 = vld [vmem:[#allocation7 + $0x10] sm:$0xff] }
 0x121   :  { %3688 = vmatprep.subr.bf16.mxu0 %v4584_v0  ;;  %3663 = vmatprep.subr.bf16.mxu1 %v3662_v55  ;;  %v3698_v17 = vpack.c.bf16 %v445_v16, %v442_v14  ;;  %v449_v22 = vld [vmem:[#allocation9 + $0x138] sm:$0xff]  ;;  %v359_v62 = vld [vmem:[#allocation7] sm:$0xff] }
 0x122   :  { %v364_v16 = vld [vmem:[%s5452_s4 + $0x10] sm:$0xff] }
 0x123   :  { %3409 = vmatmul.mubr.msk.f32.gmra.mrb[4].mxu0 %vm269_vm1, %v261_v10  ;;  %3665 = vmatpush1.bf16.msra.mxu1 %v3664_v59  ;;  %v444_v10 = vld [vmem:[#allocation9 + $0x110] sm:$0xff]  ;;  %v458_v19 = vld [vmem:[#allocation10] sm:$0xff] }
 0x124   :  { %3443 = vmatprep.mubr.msk.f32.mxu0 %vm4585_vm0, %v4586_v1  ;;  %3690 = vmatpush3.bf16.msra.mxu0 %v3689_v52  ;;  %v3670_v11 = vpack.c.bf16 %v444_v10, %v441_v9  ;;  %v363_v9 = vld [vmem:[%s5452_s4 + $0x8] sm:$0xff] }
 0x125   :  { %3691 = vmatprep.subr.bf16.mxu0 %v4584_v0  ;;  %3667 = vmatprep.subr.bf16.mxu1 %v3666_v2  ;;  %v362_v2 = vld [vmem:[%s5452_s4] sm:$0xff] }
 0x127   :  { %3669 = vmatpush1.bf16.msra.mxu1 %v3668_v6  ;;  %v360_v6 = vld [vmem:[#allocation7 + $0x8] sm:$0xff] }
 0x128   :  { %3693 = vmatpush3.bf16.msra.mxu0 %v3692_v61  ;;  %3671 = vmatprep.subr.bf16.mxu1 %v3670_v11 }
 0x129   :  { %3694 = vmatprep.subr.bf16.mxu0 %v4584_v0 }
 0x12b   :  { %3673 = vmatpush1.bf16.msra.mxu1 %v3672_v15 }
 0x12c   :  { %3696 = vmatpush3.bf16.msra.mxu0 %v3695_v8  ;;  %3675 = vmatprep.subr.bf16.mxu1 %v3674_v20  ;;  %v4991_v20 = vld [vmem:[#allocation22] sm:$0xff] }
 0x12d   :  { %3697 = vmatprep.subr.bf16.mxu0 %v4584_v0 }
 0x130   :  { %3699 = vmatpush3.bf16.msra.mxu0 %v3698_v17 }
 0x131   :  { %3700 = vmatprep.subr.bf16.mxu0 %v4584_v0 }
 0x1ee   :  { %v345_v24 = vpop.f32.mrb[0].mxu0 }
 0x1ef   :  { %v4951_v25 = vadd.f32 %v345_v24, %v266_v23  ;;  %v3404_v26 = vpop.f32.mrb[1].mxu0  ;;  %v448_v23 = vld [vmem:[#allocation9 + $0x130] sm:$0xff]  ;;  %v3676_v24 = vpack.c.bf16 %v449_v22, %v446_v21 }
 0x1f0   :  { %v451_v26 = vld [vmem:[#allocation9 + $0x148] sm:$0xff] }
 0x1f1   :  { %365 = vadd.xlane.f32.xlu0 %v4951_v25  ;;  %v374_v31 = vmul.f32 %v4951_v25, %v4951_v25  ;;  %3677 = vmatpush1.bf16.msra.mxu1 %v3676_v24 }
 0x1f2   :  { %v350_v28 = vpop.f32.mrb[2].mxu0 }
 0x1f3   :  { %v4954_v29 = vadd.f32 %v350_v28, %v267_v27  ;;  %v3407_v30 = vpop.f32.mrb[3].mxu0  ;;  %v453_v27 = vld [vmem:[#allocation9 + $0x158] sm:$0xff]  ;;  %v456_v28 = vld [vmem:[#allocation9 + $0x170] sm:$0xff] }
 0x1f4   :  { %v3701_v30 = vpack.c.bf16 %v451_v26, %v448_v23 }
 0x1f5   :  { %377 = vadd.xlane.f32.xlu0 %v374_v31  ;;  %367 = vadd.xlane.f32.xlu1 %v4954_v29  ;;  %v375_v35 = vmul.f32 %v4954_v29, %v4954_v29  ;;  %v3678_v31 = vpack.c.bf16 %v456_v28, %v453_v27  ;;  %v460_v27 = vld [vmem:[#allocation10 + $0x10] sm:$0xff]  ;;  %v463_v28 = vld [vmem:[#allocation10 + $0x28] sm:$0xff] }
 0x1f6   :  { %v355_v33 = vpop.f32.mrb[4].mxu0  ;;  %3702 = vmatpush3.bf16.msra.mxu0 %v3701_v30 }
 0x1f7   :  { %v4959_v34 = vadd.f32 %v355_v33, %v268_v32  ;;  %v3410_v36 = vpop.f32.mrb[5].mxu0  ;;  %v452_v32 = vld [vmem:[#allocation9 + $0x150] sm:$0xff]  ;;  %v455_v33 = vld [vmem:[#allocation9 + $0x168] sm:$0xff]  ;;  %3679 = vmatprep.subr.bf16.mxu1 %v3678_v31  ;;  %3703 = vmatprep.subr.bf16.mxu0 %v4584_v0 }
 0x1f8   :  { %v3680_v36 = vpack.c.bf16 %v455_v33, %v452_v32  ;;  %v459_v31 = vld [vmem:[#allocation10 + $0x8] sm:$0xff]  ;;  %v462_v32 = vld [vmem:[#allocation10 + $0x20] sm:$0xff] }
 0x1f9   :  { %379 = vadd.xlane.f32.xlu1 %v375_v35  ;;  %369 = vadd.xlane.f32.xlu0 %v4959_v34  ;;  %v376_v37 = vmul.f32 %v4959_v34, %v4959_v34  ;;  %v454_v35 = vld [vmem:[#allocation9 + $0x160] sm:$0xff] }
 0x1fa   :  { %3681 = vmatpush1.bf16.msra.mxu1 %v3680_v36 }
 0x1fd   :  { %381 = vadd.xlane.f32.xlu1 %v376_v37  ;;  %v457_v37 = vld [vmem:[#allocation9 + $0x178] sm:$0xff] }
 0x1fe   :  { %v3704_v38 = vpack.c.bf16 %v457_v37, %v454_v35 }
 0x200   :  { %3705 = vmatpush3.bf16.msra.mxu0 %v3704_v38 }
 0x27e   :  { %v366_v39 = vpop.xlane.xlu0 %365 }
 0x27f   :  { %v371_v40 = vmul.f32 0.03125, %v366_v39 }
 0x281   :  { %v386_v43 = vmul.f32 %v371_v40, %v371_v40  ;;  %v392_v60 = vsub.f32 %v4951_v25, %v371_v40 }
 0x282   :  { %v378_v41 = vpop.xlane.xlu0 %377  ;;  %v368_v42 = vpop.xlane.xlu1 %367 }
 0x283   :  { %v383_v44 = vmul.f32 0.03125, %v378_v41  ;;  %v372_v45 = vmul.f32 0.03125, %v368_v42 }
 0x285   :  { %v389_v46 = vsub.f32 %v383_v44, %v386_v43  ;;  %v387_v50 = vmul.f32 %v372_v45, %v372_v45  ;;  %v393_v3 = vsub.f32 %v4954_v29, %v372_v45  ;;  %v465_v43 = vld [vmem:[#allocation10 + $0x38] sm:$0xff] }
 0x286   :  { %v380_v47 = vpop.xlane.xlu1 %379  ;;  %v370_v48 = vpop.xlane.xlu0 %369 }
 0x287   :  { %v395_v49 = vadd.f32 1e-05, %v389_v46  ;;  %v384_v51 = vmul.f32 0.03125, %v380_v47  ;;  %v373_v52 = vmul.f32 0.03125, %v370_v48 }
 0x289   :  { %4108 = vrsqrt.f32 %v395_v49  ;;  %v390_v53 = vsub.f32 %v384_v51, %v387_v50  ;;  %v388_v54 = vmul.f32 %v373_v52, %v373_v52  ;;  %v394_v10 = vsub.f32 %v4959_v34, %v373_v52  ;;  %v461_v50 = vld [vmem:[#allocation10 + $0x18] sm:$0xff]  ;;  %v464_v51 = vld [vmem:[#allocation10 + $0x30] sm:$0xff] }
 0x28a   :  { %v382_v55 = vpop.xlane.xlu1 %381 }
 0x28b   :  { %v396_v56 = vadd.f32 1e-05, %v390_v53  ;;  %v385_v57 = vmul.f32 0.03125, %v382_v55  ;;  %v4994_v53 = vld [vmem:[#allocation22 + $0x8] sm:$0xff]  ;;  %v4996_v55 = vld [vmem:[#allocation22 + $0x10] sm:$0xff] }
 0x28d   :  { %4110 = vrsqrt.f32 %v396_v56  ;;  %v391_v58 = vsub.f32 %v385_v57, %v388_v54  ;;  %v466_v56 = vld [vmem:[#allocation10 + $0x40] sm:$0xff] }
 0x28f   :  { %v397_v59 = vadd.f32 1e-05, %v391_v58  ;;  %v4999_v58 = vld [vmem:[#allocation22 + $0x18] sm:$0xff] }
 0x291   :  { %4112 = vrsqrt.f32 %v397_v59 }
 0x293   :  { %v4109_v61 = vpop.eup %4108 }
 0x294   :  { %v401_v63 = vmul.f32 %v4109_v61, %v392_v60  ;;  %v5002_v60 = vld [vmem:[#allocation22 + $0x20] sm:$0xff] }
 0x296   :  { %v404_v4 = vmul.f32 %v401_v63, %v359_v62 }
 0x297   :  { %v4111_v5 = vpop.eup %4110 }
 0x298   :  { %v407_v7 = vadd.f32 %v404_v4, %v362_v2  ;;  %v402_v8 = vmul.f32 %v4111_v5, %v393_v3  ;;  %v5006_v2 = vld [vmem:[#allocation22 + $0x28] sm:$0xff]  ;;  %v254_v4 = vld [vmem:[%s5465_s17 + $0x8] sm:$0xff]  ;;  %v253_v5 = vld [vmem:[%s5465_s17] sm:$0xff] }
 0x29a   :  { %532 = vmatmul.mubr.f32.vlgmr.msra.gmra.mrb[0].mxu1 %v407_v7  ;;  %3444 = vmatmul.mubr.f32.vlgmr.msra.gmra.mrb[6].mxu0 %v407_v7  ;;  %v405_v11 = vmul.f32 %v402_v8, %v360_v6 }
 0x29b   :  { %v4113_v12 = vpop.eup %4112  ;;  %537 = vmatprep.mubr.f32.mxu1 %v4586_v1  ;;  %3446 = vmatprep.mubr.msk.f32.mxu0 %vm4585_vm0, %v4586_v1 }
 0x29c   :  { %v408_v14 = vadd.f32 %v405_v11, %v363_v9  ;;  %v403_v15 = vmul.f32 %v4113_v12, %v394_v10  ;;  %v256_v10 = vld [vmem:[%s5465_s17 + $0x18] sm:$0xff]  ;;  %v255_v12 = vld [vmem:[%s5465_s17 + $0x10] sm:$0xff] }
 0x29e   :  { %538 = vmatmul.mubr.f32.gmra.mrb[2].mxu1 %v408_v14  ;;  %3447 = vmatmul.mubr.f32.gmra.mrb[8].mxu0 %v408_v14  ;;  %v406_v17 = vmul.f32 %v403_v15, %v361_v13 }
 0x29f   :  { %543 = vmatprep.mubr.f32.mxu1 %v4586_v1  ;;  %3449 = vmatprep.mubr.msk.f32.mxu0 %vm4585_vm0, %v4586_v1 }
 0x2a0   :  { %v409_v18 = vadd.f32 %v406_v17, %v364_v16 }
 0x2a2   :  { %544 = vmatmul.mubr.f32.gmra.mrb[4].mxu1 %v409_v18  ;;  %3450 = vmatmul.mubr.f32.gmra.mrb[10].mxu0 %v409_v18  ;;  %v258_v18 = vld [vmem:[%s5465_s17 + $0x28] sm:$0xff] }
 0x2a3   :  { %1218 = vmatprep.mubr.f32.mxu0 %v4586_v1 }
 0x36d   :  { %v533_v21 = vpop.f32.mrb[0].mxu1  ;;  %v616_v22 = vpop.f32.mrb[6].mxu0 }
 0x36e   :  { %v534_v23 = vadd.f32 %v533_v21, %v458_v19  ;;  %v535_v24 = vpop.f32.mrb[1].mxu1  ;;  %v3445_v26 = vpop.f32.mrb[7].mxu0  ;;  %v617_v36 = vadd.f32 %v616_v22, %v460_v27  ;;  %v257_v21 = vld [vmem:[%s5465_s17 + $0x20] sm:$0xff] }
 0x36f   :  { %v536_v40 = vadd.f32 %v535_v24, %v459_v31 }
 0x370   :  { %v630_v30 = vmul.f32 %v534_v23, %v4991_v20  ;;  %v633_v62 = vmul.f32 %v534_v23, %v4999_v58 }
 0x371   :  { %v539_v33 = vpop.f32.mrb[2].mxu1  ;;  %v621_v35 = vpop.f32.mrb[8].mxu0 }
 0x372   :  { %v622_v37 = vadd.f32 %v621_v35, %v463_v28  ;;  %v541_v38 = vpop.f32.mrb[3].mxu1  ;;  %v3448_v39 = vpop.f32.mrb[9].mxu0  ;;  %3458 = vmatprep.mubr.f32.mxu1 %v630_v30  ;;  %v540_v52 = vadd.f32 %v539_v33, %v461_v50 }
 0x373   :  { %v542_v41 = vadd.f32 %v541_v38, %v462_v32 }
 0x374   :  { %v3710_v42 = vpack.c.bf16 %v622_v37, %v617_v36  ;;  %v631_v57 = vmul.f32 %v540_v52, %v4994_v53  ;;  %v634_v63 = vmul.f32 %v540_v52, %v5002_v60 }
 0x375   :  { %v3706_v44 = vpack.c.bf16 %v542_v41, %v536_v40  ;;  %v545_v45 = vpop.f32.mrb[4].mxu1  ;;  %v626_v46 = vpop.f32.mrb[10].mxu0 }
 0x376   :  { %v547_v47 = vpop.f32.mrb[5].mxu1  ;;  %v3451_v48 = vpop.f32.mrb[11].mxu0  ;;  %v546_v54 = vadd.f32 %v545_v45, %v464_v51  ;;  %v627_v61 = vadd.f32 %v626_v46, %v466_v56 }
 0x377   :  { %v548_v49 = vadd.f32 %v547_v47, %v465_v43  ;;  %3707 = vmatprep.subr.bf16.mxu1 %v3706_v44 }
 0x378   :  { %3709 = vmatpush3.bf16.xpose.msra.mxu1 %v3706_v44  ;;  %v632_v59 = vmul.f32 %v546_v54, %v4996_v55  ;;  %v635_v3 = vmul.f32 %v546_v54, %v5006_v2 }
 0x379   :  { %3456 = vmatprep.subr.mxu1 %v548_v49 }
 0x380   :  { %3457 = vmatpush3.xpose.msra.mxu1 %v548_v49 }
 0x381   :  { %3711 = vmatprep.subr.bf16.mxu1 %v3710_v42 }
 0x383   :  { %3459 = vmatmul.mubr.f32.vlgmr.msra.gmra.mrb[6].mxu1 %v631_v57 }
 0x384   :  { %3461 = vmatprep.mubr.f32.mxu1 %v632_v59  ;;  %3713 = vmatpush3.bf16.msra.mxu1 %v3710_v42 }
 0x385   :  { %3471 = vmatprep.subr.mxu1 %v627_v61 }
 0x387   :  { %3462 = vmatmul.mubr.f32.gmra.mrb[8].mxu1 %v633_v62 }
 0x388   :  { %3464 = vmatprep.mubr.f32.mxu1 %v634_v63  ;;  %3472 = vmatpush3.msra.mxu1 %v627_v61 }
 0x389   :  { %3714 = vmatprep.subr.bf16.mxu1 %v4584_v0 }
 0x38b   :  { %3465 = vmatmul.mubr.f32.gmra.mrb[10].mxu1 %v635_v3 }
 0x456   :  { %v3460_v6 = vpop.f32.mrb[6].mxu1 }
 0x457   :  { %v708_v7 = vadd.f32 %v3460_v6, %v254_v4  ;;  %v702_v8 = vpop.f32.mrb[7].mxu1 }
 0x458   :  { %v703_v9 = vadd.f32 %v702_v8, %v253_v5 }
 0x459   :  { %v735_v11 = vsel %vm731_vm2, %v708_v7, -inf }
 0x45a   :  { %736 = vmax.xlane.f32.xlu1 %v735_v11  ;;  %v3463_v13 = vpop.f32.mrb[8].mxu1  ;;  %v732_v14 = vsel %vm731_vm2, %v703_v9, -inf  ;;  %v920_v11 = vld [vmem:[#allocation12] sm:$0xff] }
 0x45b   :  { %v718_v15 = vadd.f32 %v3463_v13, %v256_v10  ;;  %v712_v16 = vpop.f32.mrb[9].mxu1  ;;  %733 = vmax.xlane.f32.xlu0 %v732_v14 }
 0x45c   :  { %v713_v17 = vadd.f32 %v712_v16, %v255_v12  ;;  %v921_v12 = vld [vmem:[#allocation12 + $0x8] sm:$0xff] }
 0x45d   :  { %v741_v19 = vsel %vm731_vm2, %v718_v15, -inf  ;;  %v3715_v16 = vpack.c.bf16 %v921_v12, %v920_v11  ;;  %v1080_v12 = vld [vmem:[#allocation15 + $0x10] sm:$0xff] }
 0x45e   :  { %742 = vmax.xlane.f32.xlu1 %v741_v19  ;;  %v3466_v22 = vpop.f32.mrb[10].mxu1  ;;  %v738_v23 = vsel %vm731_vm2, %v713_v17, -inf  ;;  %v923_v19 = vld [vmem:[#allocation12 + $0x18] sm:$0xff] }
 0x45f   :  { %v728_v24 = vadd.f32 %v3466_v22, %v258_v18  ;;  %v722_v26 = vpop.f32.mrb[11].mxu1  ;;  %739 = vmax.xlane.f32.xlu0 %v738_v23  ;;  %v922_v18 = vld [vmem:[#allocation12 + $0x10] sm:$0xff] }
 0x460   :  { %v723_v27 = vadd.f32 %v722_v26, %v257_v21 }
 0x461   :  { %v747_v28 = vsel %vm731_vm2, %v728_v24, -inf }
 0x462   :  { %748 = vmax.xlane.f32.xlu1 %v747_v28  ;;  %v744_v30 = vsel %vm731_vm2, %v723_v27, -inf  ;;  %v925_v28 = vld [vmem:[#allocation12 + $0x28] sm:$0xff] }
 0x463   :  { %745 = vmax.xlane.f32.xlu0 %v744_v30 }
 0x4e7   :  { %v737_v31 = vpop.xlane.xlu1 %736 }
 0x4e8   :  { %v751_v32 = vsub.f32 %v708_v7, %v737_v31  ;;  %v734_v33 = vpop.xlane.xlu0 %733 }
 0x4e9   :  { %v750_v35 = vsub.f32 %v703_v9, %v734_v33 }
 0x4ea   :  { %v758_v36 = vmul.f32 1.442695, %v751_v32 }
 0x4eb   :  { %v756_v37 = vmul.f32 1.442695, %v750_v35  ;;  %v743_v38 = vpop.xlane.xlu1 %742 }
 0x4ec   :  { %4114 = vpow2.f32 %v758_v36  ;;  %v753_v39 = vsub.f32 %v718_v15, %v743_v38  ;;  %v740_v40 = vpop.xlane.xlu0 %739  ;;  %v926_v36 = vld [vmem:[#allocation12 + $0x30] sm:$0xff] }
 0x4ed   :  { %4116 = vpow2.f32 %v756_v37  ;;  %v752_v41 = vsub.f32 %v713_v17, %v740_v40  ;;  %v927_v37 = vld [vmem:[#allocation12 + $0x38] sm:$0xff]  ;;  %v929_v40 = vld [vmem:[#allocation12 + $0x48] sm:$0xff] }
 0x4ee   :  { %v762_v42 = vmul.f32 1.442695, %v753_v39  ;;  %v3724_v38 = vpack.c.bf16 %v927_v37, %v926_v36  ;;  %v928_v39 = vld [vmem:[#allocation12 + $0x40] sm:$0xff]  ;;  %v1020_v37 = vld [vmem:[#allocation13 + $0x8] sm:$0xff] }
 0x4ef   :  { %v760_v43 = vmul.f32 1.442695, %v752_v41  ;;  %v749_v44 = vpop.xlane.xlu1 %748  ;;  %v3727_v41 = vpack.c.bf16 %v929_v40, %v928_v39 }
 0x4f0   :  { %4118 = vpow2.f32 %v762_v42  ;;  %v755_v45 = vsub.f32 %v728_v24, %v749_v44  ;;  %v746_v46 = vpop.xlane.xlu0 %745  ;;  %v3718_v24 = vpack.c.bf16 %v923_v19, %v922_v18  ;;  %v930_v42 = vld [vmem:[#allocation12 + $0x50] sm:$0xff]  ;;  %v1093_v18 = vld [vmem:[#allocation15 + $0x78] sm:$0xff] }
 0x4f1   :  { %4120 = vpow2.f32 %v760_v43  ;;  %v754_v47 = vsub.f32 %v723_v27, %v746_v46  ;;  %v924_v27 = vld [vmem:[#allocation12 + $0x20] sm:$0xff]  ;;  %v931_v43 = vld [vmem:[#allocation12 + $0x58] sm:$0xff]  ;;  %v933_v46 = vld [vmem:[#allocation12 + $0x68] sm:$0xff] }
 0x4f2   :  { %v766_v48 = vmul.f32 1.442695, %v755_v45  ;;  %v3721_v33 = vpack.c.bf16 %v925_v28, %v924_v27  ;;  %v3730_v44 = vpack.c.bf16 %v931_v43, %v930_v42  ;;  %v932_v45 = vld [vmem:[#allocation12 + $0x60] sm:$0xff]  ;;  %v1021_v43 = vld [vmem:[#allocation13 + $0x10] sm:$0xff] }
 0x4f3   :  { %v764_v49 = vmul.f32 1.442695, %v754_v47  ;;  %v3733_v47 = vpack.c.bf16 %v933_v46, %v932_v45  ;;  %v1092_v27 = vld [vmem:[#allocation15 + $0x70] sm:$0xff] }
 0x4f4   :  { %4122 = vpow2.f32 %v766_v48  ;;  %v934_v48 = vld [vmem:[#allocation12 + $0x70] sm:$0xff] }
 0x4f5   :  { %4124 = vpow2.f32 %v764_v49  ;;  %v935_v49 = vld [vmem:[#allocation12 + $0x78] sm:$0xff] }
 0x4f6   :  { %v4115_v50 = vpop.eup %4114 }
 0x4f7   :  { %v4117_v51 = vpop.eup %4116  ;;  %v771_v52 = vsel %vm731_vm2, %v4115_v50, 0.0 }
 0x4f8   :  { %772 = vadd.xlane.f32.xlu1 %v771_v52  ;;  %v768_v54 = vsel %vm731_vm2, %v4117_v51, 0.0 }
 0x4f9   :  { %769 = vadd.xlane.f32.xlu0 %v768_v54 }
 0x4fa   :  { %v4119_v56 = vpop.eup %4118 }
 0x4fb   :  { %v4121_v57 = vpop.eup %4120  ;;  %v777_v59 = vsel %vm731_vm2, %v4119_v56, 0.0 }
 0x4fc   :  { %778 = vadd.xlane.f32.xlu1 %v777_v59  ;;  %v774_v61 = vsel %vm731_vm2, %v4121_v57, 0.0 }
 0x4fd   :  { %775 = vadd.xlane.f32.xlu0 %v774_v61 }
 0x4fe   :  { %v4123_v62 = vpop.eup %4122 }
 0x4ff   :  { %v4125_v63 = vpop.eup %4124  ;;  %v783_v3 = vsel %vm731_vm2, %v4123_v62, 0.0 }
 0x500   :  { %784 = vadd.xlane.f32.xlu1 %v783_v3  ;;  %v780_v4 = vsel %vm731_vm2, %v4125_v63, 0.0 }
 0x501   :  { %781 = vadd.xlane.f32.xlu0 %v780_v4 }
 0x585   :  { %v773_v5 = vpop.xlane.xlu1 %772 }
 0x586   :  { %4126 = vrcp.f32 %v773_v5  ;;  %v770_v6 = vpop.xlane.xlu0 %769 }
 0x587   :  { %4128 = vrcp.f32 %v770_v6 }
 0x589   :  { %v779_v7 = vpop.xlane.xlu1 %778 }
 0x58a   :  { %4130 = vrcp.f32 %v779_v7  ;;  %v776_v8 = vpop.xlane.xlu0 %775 }
 0x58b   :  { %4132 = vrcp.f32 %v776_v8 }
 0x58d   :  { %v785_v9 = vpop.xlane.xlu1 %784 }
 0x58e   :  { %4134 = vrcp.f32 %v785_v9  ;;  %v782_v10 = vpop.xlane.xlu0 %781  ;;  %v1085_v9 = vld [vmem:[#allocation15 + $0x38] sm:$0xff] }
 0x58f   :  { %4136 = vrcp.f32 %v782_v10  ;;  %v1082_v10 = vld [vmem:[#allocation15 + $0x20] sm:$0xff] }
 0x590   :  { %v4127_v13 = vpop.eup %4126 }
 0x591   :  { %v4129_v14 = vpop.eup %4128  ;;  %v793_v17 = vmul.f32 %v4127_v13, %v4115_v50  ;;  %v3736_v50 = vpack.c.bf16 %v935_v49, %v934_v48  ;;  %v1084_v13 = vld [vmem:[#allocation15 + $0x30] sm:$0xff]  ;;  %v1099_v48 = vld [vmem:[#allocation15 + $0xa8] sm:$0xff]  ;;  %v1097_v49 = vld [vmem:[#allocation15 + $0x98] sm:$0xff] }
 0x592   :  { %v792_v15 = vmul.f32 %v4129_v14, %v4117_v51  ;;  %v1087_v14 = vld [vmem:[#allocation15 + $0x48] sm:$0xff] }
 0x594   :  { %v4131_v21 = vpop.eup %4130  ;;  %3473 = vmatprep.mubr.msk.f32.mxu1 %vm731_vm2, %v792_v15  ;;  %v3772_v15 = vpack.c.bf16 %v1084_v13, %v1080_v12  ;;  %v1110_v12 = vld [vmem:[#allocation15 + $0x100] sm:$0xff] }
 0x595   :  { %v4133_v22 = vpop.eup %4132  ;;  %3474 = vmatmul.mubr.msk.f32.vlgmr.msra.gmra.mrb[12].mxu1 %vm731_vm2, %v793_v17  ;;  %v795_v26 = vmul.f32 %v4131_v21, %v4119_v56  ;;  %v1089_v17 = vld [vmem:[#allocation15 + $0x58] sm:$0xff]  ;;  %v1114_v13 = vld [vmem:[#allocation15 + $0x120] sm:$0xff] }
 0x596   :  { %v794_v23 = vmul.f32 %v4133_v22, %v4121_v57  ;;  %3716 = vmatpush3.bf16.msra.mxu1 %v3715_v16  ;;  %v1091_v16 = vld [vmem:[#allocation15 + $0x68] sm:$0xff]  ;;  %v3774_v21 = vpack.c.bf16 %v1093_v18, %v1089_v17  ;;  %v1086_v22 = vld [vmem:[#allocation15 + $0x40] sm:$0xff]  ;;  %v1116_v17 = vld [vmem:[#allocation15 + $0x130] sm:$0xff] }
 0x597   :  { %3717 = vmatprep.subr.bf16.mxu1 %v4584_v0  ;;  %v3742_v19 = vpack.c.bf16 %v1091_v16, %v1087_v14  ;;  %v1112_v16 = vld [vmem:[#allocation15 + $0x110] sm:$0xff] }
 0x598   :  { %v4135_v30 = vpop.eup %4134  ;;  %3476 = vmatprep.mubr.msk.f32.mxu1 %vm731_vm2, %v794_v23  ;;  %v1090_v23 = vld [vmem:[#allocation15 + $0x60] sm:$0xff]  ;;  %v3788_v18 = vpack.c.bf16 %v1116_v17, %v1112_v16 }
 0x599   :  { %v4137_v31 = vpop.eup %4136  ;;  %3477 = vmatmul.mubr.msk.f32.gmra.mrb[14].mxu1 %vm731_vm2, %v795_v26  ;;  %v797_v35 = vmul.f32 %v4135_v30, %v4123_v62  ;;  %v3744_v26 = vpack.c.bf16 %v1090_v23, %v1086_v22  ;;  %v1121_v22 = vld [vmem:[#allocation15 + $0x158] sm:$0xff] }
 0x59a   :  { %v796_v32 = vmul.f32 %v4137_v31, %v4125_v63  ;;  %3719 = vmatpush3.bf16.msra.mxu1 %v3718_v24  ;;  %v1088_v24 = vld [vmem:[#allocation15 + $0x50] sm:$0xff] }
 0x59b   :  { %3720 = vmatprep.subr.bf16.mxu1 %v4584_v0  ;;  %v3776_v28 = vpack.c.bf16 %v1092_v27, %v1088_v24  ;;  %v1019_v31 = vld [vmem:[#allocation13] sm:$0xff]  ;;  %v1125_v24 = vld [vmem:[#allocation15 + $0x178] sm:$0xff]  ;;  %v1122_v27 = vld [vmem:[#allocation15 + $0x160] sm:$0xff] }
 0x59c   :  { %3479 = vmatprep.mubr.msk.f32.mxu1 %vm731_vm2, %v796_v32 }
 0x59d   :  { %3480 = vmatmul.mubr.msk.f32.gmra.mrb[16].mxu1 %vm731_vm2, %v797_v35 }
 0x59e   :  { %3722 = vmatpush3.bf16.msra.mxu1 %v3721_v33  ;;  %3514 = vmatprep.mubr.msk.f32.mxu1 %vm4585_vm0, %v4586_v1 }
 0x59f   :  { %3723 = vmatprep.subr.bf16.mxu1 %v4584_v0 }
 0x5a2   :  { %3725 = vmatpush3.bf16.msra.mxu1 %v3724_v38 }
 0x5a3   :  { %3726 = vmatprep.subr.bf16.mxu1 %v4584_v0 }
 0x5a6   :  { %3728 = vmatpush3.bf16.msra.mxu1 %v3727_v41 }
 0x5a7   :  { %3729 = vmatprep.subr.bf16.mxu1 %v4584_v0 }
 0x5aa   :  { %3731 = vmatpush3.bf16.msra.mxu1 %v3730_v44 }
 0x5ab   :  { %3732 = vmatprep.subr.bf16.mxu1 %v4584_v0 }
 0x5ae   :  { %3734 = vmatpush3.bf16.msra.mxu1 %v3733_v47  ;;  %v1095_v47 = vld [vmem:[#allocation15 + $0x88] sm:$0xff] }
 0x5af   :  { %3735 = vmatprep.subr.bf16.mxu1 %v4584_v0 }
 0x5b2   :  { %3737 = vmatpush3.bf16.msra.mxu1 %v3736_v50  ;;  %v3746_v50 = vpack.c.bf16 %v1099_v48, %v1095_v47  ;;  %v1135_v48 = vld [vmem:[#allocation15 + $0x1c8] sm:$0xff] }
 0x668   :  { %v3475_v51 = vpop.f32.mrb[12].mxu1 }
 0x669   :  { %v882_v52 = vpop.f32.mrb[13].mxu1  ;;  %v912_v5 = vmul.f32 %v3475_v51, %v4994_v53  ;;  %v1078_v53 = vld [vmem:[#allocation15] sm:$0xff] }
 0x66a   :  { %v911_v56 = vmul.f32 %v882_v52, %v4991_v20  ;;  %v3740_v11 = vpack.c.bf16 %v1082_v10, %v1078_v53  ;;  %v1094_v51 = vld [vmem:[#allocation15 + $0x80] sm:$0xff]  ;;  %v1115_v53 = vld [vmem:[#allocation15 + $0x128] sm:$0xff]  ;;  %v1113_v10 = vld [vmem:[#allocation15 + $0x118] sm:$0xff] }
 0x66b   :  { %v1098_v52 = vld [vmem:[#allocation15 + $0xa0] sm:$0xff] }
 0x66c   :  { %v3478_v54 = vpop.f32.mrb[14].mxu1 }
 0x66d   :  { %v914_v57 = vmul.f32 %v3478_v54, %v4999_v58  ;;  %v892_v59 = vpop.f32.mrb[15].mxu1  ;;  %v1083_v58 = vld [vmem:[#allocation15 + $0x28] sm:$0xff] }
 0x66e   :  { %v913_v63 = vmul.f32 %v892_v59, %v4996_v55  ;;  %v1079_v55 = vld [vmem:[#allocation15 + $0x8] sm:$0xff]  ;;  %v1100_v59 = vld [vmem:[#allocation15 + $0xb0] sm:$0xff] }
 0x66f   :  { %v917_v61 = vadd.f32 %v914_v57, %v911_v56  ;;  %v3738_v8 = vpack.c.bf16 %v1083_v58, %v1079_v55  ;;  %v3748_v56 = vpack.c.bf16 %v1098_v52, %v1094_v51  ;;  %v1096_v57 = vld [vmem:[#allocation15 + $0x90] sm:$0xff]  ;;  %v1141_v51 = vld [vmem:[#allocation15 + $0x1f8] sm:$0xff]  ;;  %v1134_v52 = vld [vmem:[#allocation15 + $0x1c0] sm:$0xff] }
 0x670   :  { %v3481_v62 = vpop.f32.mrb[16].mxu1  ;;  %v1104_v58 = vld [vmem:[#allocation15 + $0xd0] sm:$0xff] }
 0x671   :  { %v916_v3 = vmul.f32 %v3481_v62, %v5006_v2  ;;  %v902_v4 = vpop.f32.mrb[17].mxu1  ;;  %3515 = vmatmul.mubr.f32.vlgmr.msra.gmra.mrb[18].mxu1 %v917_v61  ;;  %v1081_v2 = vld [vmem:[#allocation15 + $0x18] sm:$0xff]  ;;  %3739 = vmatprep.subr.bf16.mxu0 %v3738_v8  ;;  %v3780_v61 = vpack.c.bf16 %v1100_v59, %v1096_v57  ;;  %v1103_v62 = vld [vmem:[#allocation15 + $0xc8] sm:$0xff]  ;;  %v1136_v59 = vld [vmem:[#allocation15 + $0x1d0] sm:$0xff] }
 0x672   :  { %v915_v6 = vmul.f32 %v902_v4, %v5002_v60  ;;  %3517 = vmatprep.mubr.msk.f32.mxu1 %vm4585_vm0, %v4586_v1  ;;  %v3770_v60 = vpack.c.bf16 %v1085_v9, %v1081_v2  ;;  %3741 = vmatpush1.bf16.msra.mxu0 %v3740_v11  ;;  %v1108_v2 = vld [vmem:[#allocation15 + $0xf0] sm:$0xff]  ;;  %v1111_v9 = vld [vmem:[#allocation15 + $0x108] sm:$0xff]  ;;  %v1117_v11 = vld [vmem:[#allocation15 + $0x138] sm:$0xff] }
 0x673   :  { %v919_v7 = vadd.f32 %v916_v3, %v913_v63  ;;  %3743 = vmatprep.subr.bf16.mxu0 %v3742_v19  ;;  %v1107_v63 = vld [vmem:[#allocation15 + $0xe8] sm:$0xff]  ;;  %v1105_v3 = vld [vmem:[#allocation15 + $0xd8] sm:$0xff]  ;;  %v3784_v8 = vpack.c.bf16 %v1108_v2, %v1104_v58  ;;  %v3786_v14 = vpack.c.bf16 %v1117_v11, %v1113_v10 }
 0x674   :  { %v918_v20 = vadd.f32 %v915_v6, %v912_v5  ;;  %3771 = vmatprep.subr.bf16.mxu1 %v3770_v60  ;;  %v3750_v4 = vpack.c.bf16 %v1107_v63, %v1103_v62  ;;  %v1109_v5 = vld [vmem:[#allocation15 + $0xf8] sm:$0xff]  ;;  %v1102_v6 = vld [vmem:[#allocation15 + $0xc0] sm:$0xff]  ;;  %v3754_v60 = vpack.c.bf16 %v1115_v53, %v1111_v9  ;;  %v1119_v19 = vld [vmem:[#allocation15 + $0x148] sm:$0xff] }
 0x675   :  { %3773 = vmatpush1.bf16.msra.mxu1 %v3772_v15  ;;  %v3756_v15 = vpack.c.bf16 %v1114_v13, %v1110_v12  ;;  %v1444_v63 = vld [vmem:[#allocation18 + $0x80] sm:$0xff] }
 0x676   :  { %3518 = vmatmul.mubr.f32.gmra.mrb[20].mxu1 %v918_v20  ;;  %3775 = vmatprep.subr.bf16.mxu1 %v3774_v21  ;;  %v3782_v20 = vpack.c.bf16 %v1109_v5, %v1105_v3  ;;  %v1123_v21 = vld [vmem:[#allocation15 + $0x168] sm:$0xff] }
 0x677   :  { %3520 = vmatprep.mubr.msk.f32.mxu1 %vm4585_vm0, %v4586_v1  ;;  %3745 = vmatpush1.bf16.msra.mxu0 %v3744_v26  ;;  %v3758_v23 = vpack.c.bf16 %v1123_v21, %v1119_v19  ;;  %v1118_v26 = vld [vmem:[#allocation15 + $0x140] sm:$0xff]  ;;  %v1445_v3 = vld [vmem:[#allocation18 + $0x88] sm:$0xff] }
 0x678   :  { %3747 = vmatprep.subr.bf16.mxu0 %v3746_v50  ;;  %v1137_v50 = vld [vmem:[#allocation15 + $0x1d8] sm:$0xff]  ;;  %v3802_v5 = vpack.c.bf16 %v1445_v3, %v1444_v63  ;;  %v1430_v63 = vld [vmem:[#allocation18 + $0x10] sm:$0xff] }
 0x679   :  { %3777 = vmatpush1.bf16.msra.mxu1 %v3776_v28  ;;  %v3790_v28 = vpack.c.bf16 %v1125_v24, %v1121_v22 }
 0x67a   :  { %3521 = vmatmul.mubr.f32.gmra.mrb[22].mxu1 %v919_v7  ;;  %v1106_v7 = vld [vmem:[#allocation15 + $0xe0] sm:$0xff] }
 0x67b   :  { %1301 = vmatprep.mubr.f32.mxu1 %v4586_v1  ;;  %3749 = vmatpush1.bf16.msra.mxu0 %v3748_v56  ;;  %v3752_v55 = vpack.c.bf16 %v1106_v7, %v1102_v6  ;;  %v3798_v56 = vpack.c.bf16 %v1141_v51, %v1137_v50  ;;  %v1477_v6 = vld [vmem:[#allocation18 + $0x188] sm:$0xff]  ;;  %v3093_v51 = vld [vmem:[%s5452_s4 + $0x28] sm:$0xff] }
 0x67c   :  { %3751 = vmatprep.subr.bf16.mxu0 %v3750_v4  ;;  %v1476_v4 = vld [vmem:[#allocation18 + $0x180] sm:$0xff] }
 0x67d   :  { %v3834_v7 = vpack.c.bf16 %v1477_v6, %v1476_v4  ;;  %v1431_v4 = vld [vmem:[#allocation18 + $0x18] sm:$0xff]  ;;  %v1462_v6 = vld [vmem:[#allocation18 + $0x110] sm:$0xff] }
 0x67f   :  { %3753 = vmatpush1.bf16.msra.mxu0 %v3752_v55 }
 0x680   :  { %3755 = vmatprep.subr.bf16.mxu0 %v3754_v60 }
 0x683   :  { %3757 = vmatpush1.bf16.msra.mxu0 %v3756_v15 }
 0x684   :  { %3759 = vmatprep.subr.bf16.mxu0 %v3758_v23 }
 0x744   :  { %v1002_v30 = vpop.f32.mrb[18].mxu1 }
 0x745   :  { %v1016_v32 = vadd.f32 %v1002_v30, %v4951_v25  ;;  %v3516_v33 = vpop.f32.mrb[19].mxu1  ;;  %v3760_v30 = vpack.c.bf16 %v1122_v27, %v1118_v26  ;;  %v1026_v27 = vld [vmem:[#allocation7 + $0x18] sm:$0xff] }
 0x747   :  { %v5067_v35 = vadd.f32 %v1019_v31, %v1016_v32  ;;  %v1120_v31 = vld [vmem:[#allocation15 + $0x150] sm:$0xff]  ;;  %3761 = vmatpush1.bf16.msra.mxu0 %v3760_v30  ;;  %v3091_v30 = vld [vmem:[%s5452_s4 + $0x18] sm:$0xff] }
 0x748   :  { %v1124_v32 = vld [vmem:[#allocation15 + $0x170] sm:$0xff] }
 0x749   :  { %1033 = vadd.xlane.f32.xlu0 %v5067_v35  ;;  %v1007_v36 = vpop.f32.mrb[20].mxu1  ;;  %v1042_v38 = vmul.f32 %v5067_v35, %v5067_v35  ;;  %v3792_v33 = vpack.c.bf16 %v1124_v32, %v1120_v31  ;;  %v1428_v31 = vld [vmem:[#allocation18] sm:$0xff]  ;;  %v1429_v32 = vld [vmem:[#allocation18 + $0x8] sm:$0xff] }
 0x74a   :  { %v1017_v39 = vadd.f32 %v1007_v36, %v4954_v29  ;;  %v3519_v40 = vpop.f32.mrb[21].mxu1  ;;  %v1127_v36 = vld [vmem:[#allocation15 + $0x188] sm:$0xff] }
 0x74b   :  { %1045 = vadd.xlane.f32.xlu1 %v1042_v38  ;;  %v1129_v38 = vld [vmem:[#allocation15 + $0x198] sm:$0xff] }
 0x74c   :  { %v5073_v41 = vadd.f32 %v1020_v37, %v1017_v39  ;;  %v1131_v37 = vld [vmem:[#allocation15 + $0x1a8] sm:$0xff]  ;;  %v1133_v40 = vld [vmem:[#allocation15 + $0x1b8] sm:$0xff] }
 0x74d   :  { %v1012_v42 = vpop.f32.mrb[22].mxu1  ;;  %v3762_v39 = vpack.c.bf16 %v1131_v37, %v1127_v36  ;;  %v1461_v36 = vld [vmem:[#allocation18 + $0x108] sm:$0xff] }
 0x74e   :  { %v1018_v25 = vadd.f32 %v1012_v42, %v4959_v34  ;;  %1035 = vadd.xlane.f32.xlu0 %v5073_v41  ;;  %v3522_v44 = vpop.f32.mrb[23].mxu1  ;;  %v1043_v45 = vmul.f32 %v5073_v41, %v5073_v41  ;;  %v1101_v34 = vld [vmem:[#allocation15 + $0xb8] sm:$0xff]  ;;  %v1126_v42 = vld [vmem:[#allocation15 + $0x180] sm:$0xff] }
 0x74f   :  { %v3778_v54 = vpack.c.bf16 %v1101_v34, %v1097_v49  ;;  %3763 = vmatprep.subr.bf16.mxu0 %v3762_v39  ;;  %v1139_v49 = vld [vmem:[#allocation15 + $0x1e8] sm:$0xff] }
 0x750   :  { %v5079_v46 = vadd.f32 %v1021_v43, %v1018_v25  ;;  %1047 = vadd.xlane.f32.xlu1 %v1043_v45  ;;  %v1130_v43 = vld [vmem:[#allocation15 + $0x1a0] sm:$0xff]  ;;  %v3794_v25 = vpack.c.bf16 %v1133_v40, %v1129_v38  ;;  %v1128_v45 = vld [vmem:[#allocation15 + $0x190] sm:$0xff]  ;;  %v3766_v34 = vpack.c.bf16 %v1139_v49, %v1135_v48  ;;  %v1028_v49 = vld [vmem:[#allocation7 + $0x28] sm:$0xff] }
 0x751   :  { %3779 = vmatprep.subr.bf16.mxu1 %v3778_v54  ;;  %v3764_v44 = vpack.c.bf16 %v1130_v43, %v1126_v42  ;;  %v1138_v54 = vld [vmem:[#allocation15 + $0x1e0] sm:$0xff]  ;;  %v3804_v43 = vpack.c.bf16 %v1429_v32, %v1428_v31  ;;  %v1453_v31 = vld [vmem:[#allocation18 + $0xc8] sm:$0xff] }
 0x752   :  { %1037 = vadd.xlane.f32.xlu0 %v5079_v46  ;;  %v1044_v29 = vmul.f32 %v5079_v46, %v5079_v46  ;;  %3781 = vmatpush1.bf16.msra.mxu1 %v3780_v61  ;;  %v3768_v57 = vpack.c.bf16 %v1138_v54, %v1134_v52  ;;  %v1140_v61 = vld [vmem:[#allocation15 + $0x1f0] sm:$0xff]  ;;  %v1027_v42 = vld [vmem:[#allocation7 + $0x20] sm:$0xff] }
 0x753   :  { %3783 = vmatprep.subr.bf16.mxu1 %v3782_v20  ;;  %3765 = vmatpush1.bf16.msra.mxu0 %v3764_v44  ;;  %v3800_v62 = vpack.c.bf16 %v1140_v61, %v1136_v59  ;;  %v1478_v61 = vld [vmem:[#allocation18 + $0x190] sm:$0xff]  ;;  %v1484_v32 = vld [vmem:[#allocation18 + $0x1c0] sm:$0xff] }
 0x754   :  { %1049 = vadd.xlane.f32.xlu1 %v1044_v29  ;;  %v1132_v29 = vld [vmem:[#allocation15 + $0x1b0] sm:$0xff]  ;;  %3767 = vmatprep.subr.bf16.mxu0 %v3766_v34 }
 0x755   :  { %v3796_v47 = vpack.c.bf16 %v1132_v29, %v1128_v45  ;;  %v3092_v45 = vld [vmem:[%s5452_s4 + $0x20] sm:$0xff] }
 0x756   :  { %3785 = vmatpush1.bf16.msra.mxu1 %v3784_v8 }
 0x757   :  { %3787 = vmatprep.subr.bf16.mxu1 %v3786_v14  ;;  %3769 = vmatpush1.bf16.msra.mxu0 %v3768_v57  ;;  %v1447_v57 = vld [vmem:[#allocation18 + $0x98] sm:$0xff] }
 0x758   :  { %3803 = vmatprep.subr.bf16.mxu0 %v3802_v5  ;;  %v3808_v5 = vpack.c.bf16 %v1431_v4, %v1430_v63  ;;  %v1440_v4 = vld [vmem:[#allocation18 + $0x60] sm:$0xff] }
 0x75a   :  { %3789 = vmatpush1.bf16.msra.mxu1 %v3788_v18 }
 0x75b   :  { %3791 = vmatprep.subr.bf16.mxu1 %v3790_v28 }
 0x75e   :  { %3793 = vmatpush1.bf16.msra.mxu1 %v3792_v33  ;;  %v1460_v33 = vld [vmem:[#allocation18 + $0x100] sm:$0xff] }
 0x75f   :  { %3795 = vmatprep.subr.bf16.mxu1 %v3794_v25  ;;  %v3836_v25 = vpack.c.bf16 %v1461_v36, %v1460_v33  ;;  %v1485_v36 = vld [vmem:[#allocation18 + $0x1c8] sm:$0xff] }
 0x762   :  { %3797 = vmatpush1.bf16.msra.mxu1 %v3796_v47 }
 0x763   :  { %3799 = vmatprep.subr.bf16.mxu1 %v3798_v56  ;;  %v1446_v56 = vld [vmem:[#allocation18 + $0x90] sm:$0xff] }
 0x764   :  { %v3806_v59 = vpack.c.bf16 %v1447_v57, %v1446_v56  ;;  %v1456_v56 = vld [vmem:[#allocation18 + $0xe0] sm:$0xff] }
 0x766   :  { %3801 = vmatpush1.bf16.msra.mxu1 %v3800_v62  ;;  %v1479_v62 = vld [vmem:[#allocation18 + $0x198] sm:$0xff] }
 0x767   :  { %3835 = vmatprep.subr.bf16.mxu1 %v3834_v7  ;;  %v3838_v3 = vpack.c.bf16 %v1479_v62, %v1478_v61  ;;  %v1463_v7 = vld [vmem:[#allocation18 + $0x118] sm:$0xff]  ;;  %v1488_v61 = vld [vmem:[#allocation18 + $0x1e0] sm:$0xff]  ;;  %v1489_v62 = vld [vmem:[#allocation18 + $0x1e8] sm:$0xff] }
 0x7d6   :  { %v1034_v20 = vpop.xlane.xlu0 %1033 }
 0x7d7   :  { %v1039_v55 = vmul.f32 0.03125, %v1034_v20  ;;  %v3840_v20 = vpack.c.bf16 %v1463_v7, %v1462_v6  ;;  %v1472_v6 = vld [vmem:[#allocation18 + $0x160] sm:$0xff]  ;;  %v1473_v7 = vld [vmem:[#allocation18 + $0x168] sm:$0xff] }
 0x7d8   :  { %v1046_v58 = vpop.xlane.xlu1 %1045 }
 0x7d9   :  { %v1054_v2 = vmul.f32 %v1039_v55, %v1039_v55  ;;  %v1051_v8 = vmul.f32 0.03125, %v1046_v58  ;;  %v1060_v24 = vsub.f32 %v5067_v35, %v1039_v55  ;;  %v1448_v55 = vld [vmem:[#allocation18 + $0xa0] sm:$0xff]  ;;  %v1449_v58 = vld [vmem:[#allocation18 + $0xa8] sm:$0xff] }
 0x7db   :  { %v1057_v9 = vsub.f32 %v1051_v8, %v1054_v2  ;;  %v1036_v53 = vpop.xlane.xlu0 %1035  ;;  %v1480_v2 = vld [vmem:[#allocation18 + $0x1a0] sm:$0xff]  ;;  %v3810_v8 = vpack.c.bf16 %v1449_v58, %v1448_v55  ;;  %v1459_v55 = vld [vmem:[#allocation18 + $0xf8] sm:$0xff] }
 0x7dc   :  { %v1040_v10 = vmul.f32 0.03125, %v1036_v53  ;;  %v1432_v53 = vld [vmem:[#allocation18 + $0x20] sm:$0xff] }
 0x7dd   :  { %v1063_v60 = vadd.f32 1e-05, %v1057_v9  ;;  %v1048_v11 = vpop.xlane.xlu1 %1047  ;;  %v1481_v9 = vld [vmem:[#allocation18 + $0x1a8] sm:$0xff] }
 0x7de   :  { %v1055_v12 = vmul.f32 %v1040_v10, %v1040_v10  ;;  %v1052_v13 = vmul.f32 0.03125, %v1048_v11  ;;  %v1061_v38 = vsub.f32 %v5073_v41, %v1040_v10  ;;  %v1433_v10 = vld [vmem:[#allocation18 + $0x28] sm:$0xff] }
 0x7df   :  { %4138 = vrsqrt.f32 %v1063_v60  ;;  %v1038_v14 = vpop.xlane.xlu0 %1037  ;;  %v3842_v60 = vpack.c.bf16 %v1481_v9, %v1480_v2  ;;  %v3812_v11 = vpack.c.bf16 %v1433_v10, %v1432_v53  ;;  %v3860_v2 = vpack.c.bf16 %v1473_v7, %v1472_v6  ;;  %v1491_v9 = vld [vmem:[#allocation18 + $0x1f8] sm:$0xff]  ;;  %v1442_v53 = vld [vmem:[#allocation18 + $0x70] sm:$0xff] }
 0x7e0   :  { %v1058_v15 = vsub.f32 %v1052_v13, %v1055_v12  ;;  %v1041_v16 = vmul.f32 0.03125, %v1038_v14  ;;  %v1464_v12 = vld [vmem:[#allocation18 + $0x120] sm:$0xff]  ;;  %v1465_v13 = vld [vmem:[#allocation18 + $0x128] sm:$0xff] }
 0x7e1   :  { %v1050_v17 = vpop.xlane.xlu1 %1049  ;;  %v3844_v14 = vpack.c.bf16 %v1465_v13, %v1464_v12  ;;  %v1474_v12 = vld [vmem:[#allocation18 + $0x170] sm:$0xff]  ;;  %v1475_v13 = vld [vmem:[#allocation18 + $0x178] sm:$0xff] }
 0x7e2   :  { %v1064_v18 = vadd.f32 1e-05, %v1058_v15  ;;  %v1056_v19 = vmul.f32 %v1041_v16, %v1041_v16  ;;  %v1053_v21 = vmul.f32 0.03125, %v1050_v17  ;;  %v1062_v29 = vsub.f32 %v5079_v46, %v1041_v16  ;;  %v1450_v15 = vld [vmem:[#allocation18 + $0xb0] sm:$0xff]  ;;  %v1451_v16 = vld [vmem:[#allocation18 + $0xb8] sm:$0xff] }
 0x7e3   :  { %v1482_v17 = vld [vmem:[#allocation18 + $0x1b0] sm:$0xff] }
 0x7e4   :  { %4140 = vrsqrt.f32 %v1064_v18  ;;  %v1059_v22 = vsub.f32 %v1053_v21, %v1056_v19  ;;  %v3814_v18 = vpack.c.bf16 %v1451_v16, %v1450_v15  ;;  %v1483_v19 = vld [vmem:[#allocation18 + $0x1b8] sm:$0xff]  ;;  %v3864_v15 = vpack.c.bf16 %v1475_v13, %v1474_v12  ;;  %v1142_v16 = vld [vmem:[#allocation16] sm:$0xff] }
 0x7e5   :  { %v3846_v21 = vpack.c.bf16 %v1483_v19, %v1482_v17  ;;  %v1144_v17 = vld [vmem:[#allocation16 + $0x10] sm:$0xff]  ;;  %v1145_v19 = vld [vmem:[#allocation16 + $0x18] sm:$0xff] }
 0x7e6   :  { %v1065_v23 = vadd.f32 1e-05, %v1059_v22  ;;  %v1434_v22 = vld [vmem:[#allocation18 + $0x30] sm:$0xff] }
 0x7e8   :  { %4142 = vrsqrt.f32 %v1065_v23  ;;  %v1435_v23 = vld [vmem:[#allocation18 + $0x38] sm:$0xff] }
 0x7e9   :  { %v4139_v26 = vpop.eup %4138 }
 0x7ea   :  { %v1069_v28 = vmul.f32 %v4139_v26, %v1060_v24  ;;  %v1466_v24 = vld [vmem:[#allocation18 + $0x130] sm:$0xff]  ;;  %v1467_v26 = vld [vmem:[#allocation18 + $0x138] sm:$0xff] }
 0x7ec   :  { %v1072_v37 = vmul.f32 %v1069_v28, %v1026_v27  ;;  %v3816_v27 = vpack.c.bf16 %v1435_v23, %v1434_v22  ;;  %v3848_v28 = vpack.c.bf16 %v1467_v26, %v1466_v24 }
 0x7ee   :  { %v4141_v39 = vpop.eup %4140  ;;  %v1075_v40 = vadd.f32 %v3091_v30, %v1072_v37  ;;  %v1452_v30 = vld [vmem:[#allocation18 + $0xc0] sm:$0xff] }
 0x7ef   :  { %v1070_v44 = vmul.f32 %v4141_v39, %v1061_v38  ;;  %v3818_v33 = vpack.c.bf16 %v1453_v31, %v1452_v30  ;;  %v1436_v37 = vld [vmem:[#allocation18 + $0x40] sm:$0xff]  ;;  %v1437_v38 = vld [vmem:[#allocation18 + $0x48] sm:$0xff]  ;;  %v3850_v39 = vpack.c.bf16 %v1485_v36, %v1484_v32  ;;  %v1148_v36 = vld [vmem:[#allocation16 + $0x30] sm:$0xff] }
 0x7f0   :  { %1219 = vmatmul.mubr.f32.vlgmr.msra.gmra.mrb[12].mxu0 %v1075_v40  ;;  %1302 = vmatmul.mubr.f32.vlgmr.msra.gmra.mrb[24].mxu1 %v1075_v40  ;;  %v3820_v40 = vpack.c.bf16 %v1437_v38, %v1436_v37 }
 0x7f1   :  { %1224 = vmatprep.mubr.f32.mxu0 %v4586_v1  ;;  %1307 = vmatprep.mubr.f32.mxu1 %v4586_v1  ;;  %v1073_v47 = vmul.f32 %v1070_v44, %v1027_v42  ;;  %v1468_v42 = vld [vmem:[#allocation18 + $0x140] sm:$0xff]  ;;  %v1454_v44 = vld [vmem:[#allocation18 + $0xd0] sm:$0xff] }
 0x7f2   :  { %v4143_v48 = vpop.eup %4142  ;;  %3805 = vmatpush3.bf16.msra.mxu0 %v3804_v43  ;;  %3837 = vmatpush3.bf16.msra.mxu1 %v3836_v25  ;;  %v1469_v43 = vld [vmem:[#allocation18 + $0x148] sm:$0xff] }
 0x7f3   :  { %v1076_v50 = vadd.f32 %v3092_v45, %v1073_v47  ;;  %v1071_v34 = vmul.f32 %v4143_v48, %v1062_v29  ;;  %3807 = vmatprep.subr.bf16.mxu0 %v3806_v59  ;;  %3839 = vmatprep.subr.bf16.mxu1 %v3838_v3  ;;  %v3852_v25 = vpack.c.bf16 %v1469_v43, %v1468_v42  ;;  %v1455_v45 = vld [vmem:[#allocation18 + $0xd8] sm:$0xff]  ;;  %v1486_v29 = vld [vmem:[#allocation18 + $0x1d0] sm:$0xff]  ;;  %v1457_v59 = vld [vmem:[#allocation18 + $0xe8] sm:$0xff] }
 0x7f4   :  { %v3822_v47 = vpack.c.bf16 %v1455_v45, %v1454_v44  ;;  %v1487_v48 = vld [vmem:[#allocation18 + $0x1d8] sm:$0xff]  ;;  %v3826_v63 = vpack.c.bf16 %v1457_v59, %v1456_v56  ;;  %v3858_v3 = vpack.c.bf16 %v1489_v62, %v1488_v61  ;;  %v1150_v56 = vld [vmem:[#allocation16 + $0x40] sm:$0xff]  ;;  %v1151_v62 = vld [vmem:[#allocation16 + $0x48] sm:$0xff] }
 0x7f5   :  { %1225 = vmatmul.mubr.f32.gmra.mrb[14].mxu0 %v1076_v50  ;;  %1308 = vmatmul.mubr.f32.gmra.mrb[26].mxu1 %v1076_v50  ;;  %v1074_v52 = vmul.f32 %v1071_v34, %v1028_v49  ;;  %v1438_v49 = vld [vmem:[#allocation18 + $0x50] sm:$0xff]  ;;  %v1439_v50 = vld [vmem:[#allocation18 + $0x58] sm:$0xff]  ;;  %v3854_v34 = vpack.c.bf16 %v1487_v48, %v1486_v29 }
 0x7f6   :  { %1230 = vmatprep.mubr.f32.mxu0 %v4586_v1  ;;  %1313 = vmatprep.mubr.f32.mxu1 %v4586_v1 }
 0x7f7   :  { %v1077_v54 = vadd.f32 %v3093_v51, %v1074_v52  ;;  %3809 = vmatpush3.bf16.msra.mxu0 %v3808_v5  ;;  %3841 = vmatpush3.bf16.msra.mxu1 %v3840_v20  ;;  %v3824_v51 = vpack.c.bf16 %v1439_v50, %v1438_v49  ;;  %v1470_v52 = vld [vmem:[#allocation18 + $0x150] sm:$0xff]  ;;  %v1441_v5 = vld [vmem:[#allocation18 + $0x68] sm:$0xff] }
 0x7f8   :  { %3811 = vmatprep.subr.bf16.mxu0 %v3810_v8  ;;  %3843 = vmatprep.subr.bf16.mxu1 %v3842_v60  ;;  %v1458_v20 = vld [vmem:[#allocation18 + $0xf0] sm:$0xff]  ;;  %v3828_v58 = vpack.c.bf16 %v1441_v5, %v1440_v4 }
 0x7f9   :  { %1231 = vmatmul.mubr.f32.gmra.mrb[16].mxu0 %v1077_v54  ;;  %1314 = vmatmul.mubr.f32.gmra.mrb[28].mxu1 %v1077_v54  ;;  %v1471_v54 = vld [vmem:[#allocation18 + $0x158] sm:$0xff]  ;;  %v1490_v8 = vld [vmem:[#allocation18 + $0x1f0] sm:$0xff]  ;;  %v3830_v10 = vpack.c.bf16 %v1459_v55, %v1458_v20 }
 0x7fa   :  { %v3856_v57 = vpack.c.bf16 %v1471_v54, %v1470_v52  ;;  %v3862_v60 = vpack.c.bf16 %v1491_v9, %v1490_v8 }
 0x7fb   :  { %3813 = vmatpush3.bf16.msra.mxu0 %v3812_v11  ;;  %3845 = vmatpush3.bf16.msra.mxu1 %v3844_v14  ;;  %v1443_v11 = vld [vmem:[#allocation18 + $0x78] sm:$0xff] }
 0x7fc   :  { %3815 = vmatprep.subr.bf16.mxu0 %v3814_v18  ;;  %3847 = vmatprep.subr.bf16.mxu1 %v3846_v21  ;;  %v3832_v14 = vpack.c.bf16 %v1443_v11, %v1442_v53  ;;  %v1143_v18 = vld [vmem:[#allocation16 + $0x8] sm:$0xff] }
 0x7ff   :  { %3817 = vmatpush3.bf16.msra.mxu0 %v3816_v27  ;;  %3849 = vmatpush3.bf16.msra.mxu1 %v3848_v28 }
 0x800   :  { %3819 = vmatprep.subr.bf16.mxu0 %v3818_v33  ;;  %3851 = vmatprep.subr.bf16.mxu1 %v3850_v39  ;;  %v1146_v33 = vld [vmem:[#allocation16 + $0x20] sm:$0xff]  ;;  %v1147_v39 = vld [vmem:[#allocation16 + $0x28] sm:$0xff] }
 0x803   :  { %3821 = vmatpush3.bf16.msra.mxu0 %v3820_v40  ;;  %3853 = vmatpush3.bf16.msra.mxu1 %v3852_v25  ;;  %v1149_v40 = vld [vmem:[#allocation16 + $0x38] sm:$0xff] }
 0x804   :  { %3823 = vmatprep.subr.bf16.mxu0 %v3822_v47  ;;  %3855 = vmatprep.subr.bf16.mxu1 %v3854_v34 }
 0x807   :  { %3825 = vmatpush3.bf16.msra.mxu0 %v3824_v51  ;;  %3857 = vmatpush3.bf16.msra.mxu1 %v3856_v57  ;;  %v1152_v57 = vld [vmem:[#allocation16 + $0x50] sm:$0xff] }
 0x808   :  { %3827 = vmatprep.subr.bf16.mxu0 %v3826_v63  ;;  %3859 = vmatprep.subr.bf16.mxu1 %v3858_v3  ;;  %v1153_v63 = vld [vmem:[#allocation16 + $0x58] sm:$0xff] }
 0x80b   :  { %3829 = vmatpush3.bf16.msra.mxu0 %v3828_v58  ;;  %3861 = vmatpush3.bf16.msra.mxu1 %v3860_v2 }
 0x80c   :  { %3831 = vmatprep.subr.bf16.mxu0 %v3830_v10  ;;  %3863 = vmatprep.subr.bf16.mxu1 %v3862_v60 }
 0x80f   :  { %3833 = vmatpush3.bf16.msra.mxu0 %v3832_v14  ;;  %3865 = vmatpush3.bf16.msra.mxu1 %v3864_v15 }
 0x810   :  { %3898 = vmatprep.subr.bf16.mxu1 %v4584_v0 }
 0x8c3   :  { %v1220_v21 = vpop.f32.mrb[12].mxu0  ;;  %v1303_v22 = vpop.f32.mrb[24].mxu1 }
 0x8c4   :  { %v5101_v23 = vadd.f32 %v1220_v21, %v1142_v16  ;;  %v5103_v24 = vadd.f32 %v1303_v22, %v1144_v17  ;;  %v1222_v26 = vpop.f32.mrb[13].mxu0  ;;  %v1305_v27 = vpop.f32.mrb[25].mxu1 }
 0x8c5   :  { %v5105_v28 = vadd.f32 %v1222_v26, %v1143_v18  ;;  %v5107_v30 = vadd.f32 %v1305_v27, %v1145_v19 }
 0x8c6   :  { %v1332_v31 = vmul.f32 0.044715, %v5101_v23  ;;  %v1334_v32 = vmul.f32 0.044715, %v5103_v24 }
 0x8c7   :  { %v1333_v37 = vmul.f32 0.044715, %v5105_v28  ;;  %v1335_v38 = vmul.f32 0.044715, %v5107_v30 }
 0x8c8   :  { %v1344_v42 = vmul.f32 %v1332_v31, %v5101_v23  ;;  %v1346_v43 = vmul.f32 %v1334_v32, %v5103_v24  ;;  %v1226_v25 = vpop.f32.mrb[14].mxu0  ;;  %v1309_v44 = vpop.f32.mrb[26].mxu1 }
 0x8c9   :  { %v1345_v45 = vmul.f32 %v1333_v37, %v5105_v28  ;;  %v1347_v29 = vmul.f32 %v1335_v38, %v5107_v30  ;;  %v5117_v47 = vadd.f32 %v1226_v25, %v1146_v33  ;;  %v5119_v48 = vadd.f32 %v1309_v44, %v1148_v36  ;;  %v1228_v49 = vpop.f32.mrb[15].mxu0  ;;  %v1311_v50 = vpop.f32.mrb[27].mxu1 }
 0x8ca   :  { %v1356_v34 = vmul.f32 %v1344_v42, %v5101_v23  ;;  %v1358_v51 = vmul.f32 %v1346_v43, %v5103_v24  ;;  %v5123_v52 = vadd.f32 %v1228_v49, %v1147_v39  ;;  %v5125_v54 = vadd.f32 %v1311_v50, %v1149_v40 }
 0x8cb   :  { %v1336_v59 = vmul.f32 0.044715, %v5117_v47  ;;  %v1338_v61 = vmul.f32 0.044715, %v5119_v48  ;;  %v1357_v3 = vmul.f32 %v1345_v45, %v5105_v28  ;;  %v1359_v4 = vmul.f32 %v1347_v29, %v5107_v30 }
 0x8cc   :  { %v1368_v5 = vadd.f32 %v1356_v34, %v5101_v23  ;;  %v1370_v6 = vadd.f32 %v1358_v51, %v5103_v24  ;;  %v1337_v7 = vmul.f32 0.044715, %v5123_v52  ;;  %v1339_v20 = vmul.f32 0.044715, %v5125_v54  ;;  %v1232_v55 = vpop.f32.mrb[16].mxu0  ;;  %v1315_v58 = vpop.f32.mrb[28].mxu1 }
 0x8cd   :  { %v5135_v2 = vadd.f32 %v1232_v55, %v1150_v56  ;;  %v5137_v8 = vadd.f32 %v1315_v58, %v1152_v57  ;;  %v1234_v9 = vpop.f32.mrb[17].mxu0  ;;  %v1317_v53 = vpop.f32.mrb[29].mxu1  ;;  %v1348_v12 = vmul.f32 %v1336_v59, %v5117_v47  ;;  %v1350_v16 = vmul.f32 %v1338_v61, %v5119_v48 }
 0x8ce   :  { %v1380_v10 = vmul.f32 0.7978846, %v1368_v5  ;;  %v1382_v60 = vmul.f32 0.7978846, %v1370_v6  ;;  %v1349_v11 = vmul.f32 %v1337_v7, %v5123_v52  ;;  %v1351_v13 = vmul.f32 %v1339_v20, %v5125_v54 }
 0x8cf   :  { %v5142_v14 = vadd.f32 %v1234_v9, %v1151_v62  ;;  %v5144_v15 = vadd.f32 %v1317_v53, %v1153_v63  ;;  %v1369_v17 = vadd.f32 %v1357_v3, %v5105_v28  ;;  %v1371_v18 = vadd.f32 %v1359_v4, %v5107_v30 }
 0x8d0   :  { %4144 = vtanh.f32 %v1380_v10  ;;  %v1340_v19 = vmul.f32 0.044715, %v5135_v2  ;;  %v1342_v21 = vmul.f32 0.044715, %v5137_v8  ;;  %v1361_v32 = vmul.f32 %v1349_v11, %v5123_v52 }
 0x8d1   :  { %4146 = vtanh.f32 %v1382_v60  ;;  %v1341_v22 = vmul.f32 0.044715, %v5142_v14  ;;  %v1343_v26 = vmul.f32 0.044715, %v5144_v15  ;;  %v1381_v27 = vmul.f32 0.7978846, %v1369_v17 }
 0x8d2   :  { %v1383_v31 = vmul.f32 0.7978846, %v1371_v18  ;;  %v1363_v36 = vmul.f32 %v1351_v13, %v5125_v54  ;;  %v1373_v38 = vadd.f32 %v1361_v32, %v5123_v52  ;;  %v1360_v39 = vmul.f32 %v1348_v12, %v5117_v47 }
 0x8d3   :  { %v1353_v33 = vmul.f32 %v1341_v22, %v5142_v14  ;;  %v1355_v37 = vmul.f32 %v1343_v26, %v5144_v15  ;;  %4148 = vtanh.f32 %v1381_v27  ;;  %v1352_v40 = vmul.f32 %v1340_v19, %v5135_v2 }
 0x8d4   :  { %4150 = vtanh.f32 %v1383_v31  ;;  %v1375_v42 = vadd.f32 %v1363_v36, %v5125_v54  ;;  %v1362_v43 = vmul.f32 %v1350_v16, %v5119_v48  ;;  %v1354_v25 = vmul.f32 %v1342_v21, %v5137_v8 }
 0x8d5   :  { %v1385_v44 = vmul.f32 0.7978846, %v1373_v38  ;;  %v1372_v45 = vadd.f32 %v1360_v39, %v5117_v47  ;;  %v1365_v29 = vmul.f32 %v1353_v33, %v5142_v14  ;;  %v1367_v34 = vmul.f32 %v1355_v37, %v5144_v15 }
 0x8d6   :  { %v1387_v49 = vmul.f32 0.7978846, %v1375_v42  ;;  %v1374_v50 = vadd.f32 %v1362_v43, %v5119_v48  ;;  %v1364_v61 = vmul.f32 %v1352_v40, %v5135_v2  ;;  %v1366_v3 = vmul.f32 %v1354_v25, %v5137_v8 }
 0x8d7   :  { %4152 = vtanh.f32 %v1385_v44  ;;  %v1384_v51 = vmul.f32 0.7978846, %v1372_v45  ;;  %v1377_v56 = vadd.f32 %v1365_v29, %v5142_v14  ;;  %v1379_v59 = vadd.f32 %v1367_v34, %v5144_v15 }
 0x8d8   :  { %4154 = vtanh.f32 %v1387_v49  ;;  %v1386_v57 = vmul.f32 0.7978846, %v1374_v50  ;;  %v1376_v6 = vadd.f32 %v1364_v61, %v5135_v2  ;;  %v1378_v7 = vadd.f32 %v1366_v3, %v5137_v8  ;;  %v1719_v61 = vld [vmem:[#allocation9 + $0x1a0] sm:$0xff]  ;;  %v1717_v3 = vld [vmem:[#allocation9 + $0x190] sm:$0xff] }
 0x8d9   :  { %4156 = vtanh.f32 %v1384_v51  ;;  %v1389_v63 = vmul.f32 0.7978846, %v1377_v56  ;;  %v1391_v5 = vmul.f32 0.7978846, %v1379_v59  ;;  %v1321_v10 = vmul.f32 0.5, %v5105_v28 }
 0x8da   :  { %v4145_v62 = vpop.eup %4144  ;;  %4158 = vtanh.f32 %v1386_v57  ;;  %v1388_v20 = vmul.f32 0.7978846, %v1376_v6  ;;  %v1390_v9 = vmul.f32 0.7978846, %v1378_v7  ;;  %v1320_v12 = vmul.f32 0.5, %v5101_v23  ;;  %v1722_v6 = vld [vmem:[#allocation9 + $0x1b8] sm:$0xff] }
 0x8db   :  { %v4147_v4 = vpop.eup %4146  ;;  %4160 = vtanh.f32 %v1389_v63  ;;  %v1404_v58 = vadd.f32 1.0, %v4145_v62  ;;  %v1323_v13 = vmul.f32 0.5, %v5107_v30  ;;  %v1322_v17 = vmul.f32 0.5, %v5103_v24  ;;  %v1715_v62 = vld [vmem:[#allocation9 + $0x180] sm:$0xff]  ;;  %v1725_v7 = vld [vmem:[#allocation9 + $0x1d0] sm:$0xff] }
 0x8dc   :  { %4162 = vtanh.f32 %v1391_v5  ;;  %v1406_v11 = vadd.f32 1.0, %v4147_v4  ;;  %v1325_v28 = vmul.f32 0.5, %v5123_v52  ;;  %v1327_v23 = vmul.f32 0.5, %v5125_v54  ;;  %v1720_v4 = vld [vmem:[#allocation9 + $0x1a8] sm:$0xff] }
 0x8dd   :  { %v4149_v55 = vpop.eup %4148  ;;  %4164 = vtanh.f32 %v1388_v20  ;;  %v1416_v22 = vmul.f32 %v1404_v58, %v1320_v12  ;;  %v1324_v24 = vmul.f32 0.5, %v5117_v47  ;;  %v1326_v40 = vmul.f32 0.5, %v5119_v48  ;;  %v1721_v20 = vld [vmem:[#allocation9 + $0x1b0] sm:$0xff]  ;;  %v1724_v58 = vld [vmem:[#allocation9 + $0x1c8] sm:$0xff] }
 0x8de   :  { %v4151_v53 = vpop.eup %4150  ;;  %v1405_v60 = vadd.f32 1.0, %v4149_v55  ;;  %4166 = vtanh.f32 %v1390_v9  ;;  %v1418_v27 = vmul.f32 %v1406_v11, %v1322_v17  ;;  %v1329_v25 = vmul.f32 0.5, %v5142_v14  ;;  %v1723_v9 = vld [vmem:[#allocation9 + $0x1c0] sm:$0xff] }
 0x8df   :  { %v1407_v16 = vadd.f32 1.0, %v4151_v53  ;;  %v1331_v45 = vmul.f32 0.5, %v5144_v15  ;;  %v1328_v48 = vmul.f32 0.5, %v5135_v2  ;;  %v1330_v56 = vmul.f32 0.5, %v5137_v8  ;;  %v1716_v15 = vld [vmem:[#allocation9 + $0x188] sm:$0xff]  ;;  %v1718_v2 = vld [vmem:[#allocation9 + $0x198] sm:$0xff] }
 0x8e0   :  { %v1417_v18 = vmul.f32 %v1405_v60, %v1321_v10  ;;  %v3866_v63 = vpack.c.bf16 %v1719_v61, %v1716_v15  ;;  %v3868_v5 = vpack.c.bf16 %v1718_v2, %v1715_v62  ;;  %v3899_v8 = vpack.c.bf16 %v1720_v4, %v1717_v3  ;;  %v1726_v53 = vld [vmem:[#allocation9 + $0x1d8] sm:$0xff]  ;;  %v1733_v61 = vld [vmem:[#allocation9 + $0x210] sm:$0xff]  ;;  %v1736_v62 = vld [vmem:[#allocation9 + $0x228] sm:$0xff] }
 0x8e1   :  { %v4153_v19 = vpop.eup %4152  ;;  %v1419_v21 = vmul.f32 %v1407_v16, %v1323_v13  ;;  %v3870_v55 = vpack.c.bf16 %v1725_v7, %v1722_v6  ;;  %v3872_v10 = vpack.c.bf16 %v1724_v58, %v1721_v20  ;;  %v3902_v60 = vpack.c.bf16 %v1726_v53, %v1723_v9  ;;  %v1738_v3 = vld [vmem:[#allocation9 + $0x238] sm:$0xff]  ;;  %v1739_v7 = vld [vmem:[#allocation9 + $0x240] sm:$0xff]  ;;  %v1744_v9 = vld [vmem:[#allocation9 + $0x268] sm:$0xff] }
 0x8e2   :  { %v4155_v26 = vpop.eup %4154  ;;  %1556 = vmatprep.mubr.f32.mxu0 %v1417_v18  ;;  %v1409_v31 = vadd.f32 1.0, %v4153_v19  ;;  %3867 = vmatprep.subr.bf16.mxu0 %v3866_v63  ;;  %v1735_v63 = vld [vmem:[#allocation9 + $0x220] sm:$0xff]  ;;  %v3880_v2 = vpack.c.bf16 %v1736_v62, %v1733_v61  ;;  %v1742_v20 = vld [vmem:[#allocation9 + $0x258] sm:$0xff] }
 0x8e3   :  { %v4157_v32 = vpop.eup %4156  ;;  %1636 = vmatprep.mubr.f32.mxu1 %v1419_v21  ;;  %1557 = vmatmul.mubr.f32.vlgmr.msra.gmra.mrb[18].mxu0 %v1416_v22  ;;  %v1411_v30 = vadd.f32 1.0, %v4155_v26  ;;  %v1655_v22 = vld [vmem:[#allocation19] sm:$0xff]  ;;  %v3908_v4 = vpack.c.bf16 %v1738_v3, %v1735_v63  ;;  %v3884_v58 = vpack.c.bf16 %v1742_v20, %v1739_v7 }
 0x8e4   :  { %v4159_v33 = vpop.eup %4158  ;;  %1637 = vmatmul.mubr.f32.vlgmr.msra.gmra.mrb[30].mxu1 %v1418_v27  ;;  %v1421_v36 = vmul.f32 %v1409_v31, %v1325_v28  ;;  %v1408_v37 = vadd.f32 1.0, %v4157_v32  ;;  %3869 = vmatpush1.bf16.msra.mxu0 %v3868_v5  ;;  %v1740_v5 = vld [vmem:[#allocation9 + $0x248] sm:$0xff] }
 0x8e5   :  { %v4161_v38 = vpop.eup %4160  ;;  %v1423_v39 = vmul.f32 %v1411_v30, %v1327_v23  ;;  %v1410_v42 = vadd.f32 1.0, %v4159_v33  ;;  %3900 = vmatpush3.bf16.msra.mxu1 %v3899_v8  ;;  %3871 = vmatprep.subr.bf16.mxu0 %v3870_v55  ;;  %v1743_v8 = vld [vmem:[#allocation9 + $0x260] sm:$0xff]  ;;  %v1741_v55 = vld [vmem:[#allocation9 + $0x250] sm:$0xff] }
 0x8e6   :  { %v4163_v43 = vpop.eup %4162  ;;  %1561 = vmatprep.mubr.f32.mxu0 %v1421_v36  ;;  %v1420_v52 = vmul.f32 %v1408_v37, %v1324_v24  ;;  %v1413_v44 = vadd.f32 1.0, %v4161_v38  ;;  %3901 = vmatprep.subr.bf16.mxu1 %v4584_v0  ;;  %v1656_v24 = vld [vmem:[#allocation19 + $0x8] sm:$0xff]  ;;  %v3882_v6 = vpack.c.bf16 %v1743_v8, %v1740_v5  ;;  %v3911_v53 = vpack.c.bf16 %v1744_v9, %v1741_v55  ;;  %v1662_v5 = vld [vmem:[#allocation7 + $0x30] sm:$0xff]  ;;  %v1663_v9 = vld [vmem:[#allocation7 + $0x38] sm:$0xff] }
 0x8e7   :  { %1641 = vmatprep.mubr.f32.mxu1 %v1423_v39  ;;  %v1422_v54 = vmul.f32 %v1410_v42, %v1326_v40  ;;  %v1415_v29 = vadd.f32 1.0, %v4163_v43  ;;  %v4165_v49 = vpop.eup %4164 }
 0x8e8   :  { %1562 = vmatmul.mubr.f32.gmra.mrb[20].mxu0 %v1420_v52  ;;  %v1425_v47 = vmul.f32 %v1413_v44, %v1329_v25  ;;  %v4167_v50 = vpop.eup %4166  ;;  %v1412_v51 = vadd.f32 1.0, %v4165_v49  ;;  %v1657_v44 = vld [vmem:[#allocation19 + $0x10] sm:$0xff]  ;;  %v1728_v49 = vld [vmem:[#allocation9 + $0x1e8] sm:$0xff] }
 0x8e9   :  { %1642 = vmatmul.mubr.f32.gmra.mrb[32].mxu1 %v1422_v54  ;;  %v1427_v34 = vmul.f32 %v1415_v29, %v1331_v45  ;;  %v1414_v57 = vadd.f32 1.0, %v4167_v50  ;;  %3873 = vmatpush1.bf16.msra.mxu0 %v3872_v10  ;;  %v1746_v10 = vld [vmem:[#allocation9 + $0x278] sm:$0xff] }
 0x8ea   :  { %1566 = vmatprep.mubr.f32.mxu0 %v1425_v47  ;;  %v1424_v14 = vmul.f32 %v1412_v51, %v1328_v48  ;;  %3903 = vmatpush3.bf16.msra.mxu1 %v3902_v60  ;;  %v1731_v47 = vld [vmem:[#allocation9 + $0x200] sm:$0xff]  ;;  %v1730_v48 = vld [vmem:[#allocation9 + $0x1f8] sm:$0xff]  ;;  %v1729_v51 = vld [vmem:[#allocation9 + $0x1f0] sm:$0xff] }
 0x8eb   :  { %1646 = vmatprep.mubr.f32.mxu1 %v1427_v34  ;;  %v1426_v59 = vmul.f32 %v1414_v57, %v1330_v56  ;;  %3904 = vmatprep.subr.bf16.mxu1 %v4584_v0  ;;  %v3874_v50 = vpack.c.bf16 %v1731_v47, %v1728_v49  ;;  %v1727_v34 = vld [vmem:[#allocation9 + $0x1e0] sm:$0xff]  ;;  %v1732_v57 = vld [vmem:[#allocation9 + $0x208] sm:$0xff]  ;;  %v1749_v60 = vld [vmem:[#allocation9 + $0x290] sm:$0xff] }
 0x8ec   :  { %1567 = vmatmul.mubr.f32.gmra.mrb[22].mxu0 %v1424_v14  ;;  %v3876_v56 = vpack.c.bf16 %v1730_v48, %v1727_v34  ;;  %v3905_v14 = vpack.c.bf16 %v1732_v57, %v1729_v51 }
 0x8ed   :  { %1647 = vmatmul.mubr.f32.gmra.mrb[34].mxu1 %v1426_v59  ;;  %1837 = vmatprep.mubr.f32.mxu0 %v4586_v1  ;;  %v1737_v59 = vld [vmem:[#allocation9 + $0x230] sm:$0xff] }
 0x8ee   :  { %3555 = vmatprep.mubr.msk.f32.mxu1 %vm4585_vm0, %v4586_v1  ;;  %3875 = vmatprep.subr.bf16.mxu0 %v3874_v50 }
 0x8ef   :  { %3877 = vmatpush1.bf16.msra.mxu0 %v3876_v56  ;;  %3906 = vmatpush3.bf16.msra.mxu1 %v3905_v14 }
 0x8f0   :  { %3907 = vmatprep.subr.bf16.mxu1 %v4584_v0 }
 0x8f3   :  { %3909 = vmatpush3.bf16.msra.mxu1 %v3908_v4 }
 0x8f4   :  { %3910 = vmatprep.subr.bf16.mxu1 %v4584_v0 }
 0x8f7   :  { %3912 = vmatpush3.bf16.msra.mxu1 %v3911_v53 }
 0x8f8   :  { %3913 = vmatprep.subr.bf16.mxu1 %v4584_v0 }
 0x9b6   :  { %v3202_v11 = vpop.f32.mrb[18].mxu0 }
 0x9b7   :  { %v3243_v12 = vpop.f32.mrb[30].mxu1  ;;  %v3203_v13 = vpop.f32.mrb[19].mxu0 }
 0x9b8   :  { %v3204_v16 = vadd.f32 %v3203_v13, %v3202_v11  ;;  %v3244_v17 = vpop.f32.mrb[31].mxu1  ;;  %v3886_v11 = vpack.c.bf16 %v1749_v60, %v1746_v10  ;;  %v1748_v13 = vld [vmem:[#allocation9 + $0x288] sm:$0xff] }
 0x9b9   :  { %v3245_v18 = vadd.f32 %v3244_v17, %v3243_v12  ;;  %v1745_v12 = vld [vmem:[#allocation9 + $0x270] sm:$0xff]  ;;  %v3095_v10 = vld [vmem:[%s5452_s4 + $0x38] sm:$0xff] }
 0x9ba   :  { %v3888_v17 = vpack.c.bf16 %v1748_v13, %v1745_v12 }
 0x9bb   :  { %v1639_v19 = vadd.f32 %v3245_v18, %v3204_v16  ;;  %v3205_v21 = vpop.f32.mrb[20].mxu0  ;;  %v1747_v16 = vld [vmem:[#allocation9 + $0x280] sm:$0xff]  ;;  %v1750_v18 = vld [vmem:[#allocation9 + $0x298] sm:$0xff] }
 0x9bc   :  { %v3246_v26 = vpop.f32.mrb[32].mxu1  ;;  %v3206_v27 = vpop.f32.mrb[21].mxu0 }
 0x9bd   :  { %v1652_v28 = vadd.f32 %v1639_v19, %v5067_v35  ;;  %v3207_v31 = vadd.f32 %v3206_v27, %v3205_v21  ;;  %v3247_v32 = vpop.f32.mrb[33].mxu1  ;;  %v1752_v19 = vld [vmem:[#allocation9 + $0x2a8] sm:$0xff]  ;;  %v1755_v21 = vld [vmem:[#allocation9 + $0x2c0] sm:$0xff] }
 0x9be   :  { %v3248_v23 = vadd.f32 %v3247_v32, %v3246_v26  ;;  %v3890_v26 = vpack.c.bf16 %v1755_v21, %v1752_v19  ;;  %v1751_v27 = vld [vmem:[#allocation9 + $0x2a0] sm:$0xff] }
 0x9bf   :  { %v5191_v30 = vadd.f32 %v1655_v22, %v1652_v28  ;;  %v3208_v36 = vpop.f32.mrb[22].mxu0  ;;  %v3914_v22 = vpack.c.bf16 %v1750_v18, %v1747_v16  ;;  %v1754_v28 = vld [vmem:[#allocation9 + $0x2b8] sm:$0xff]  ;;  %v1664_v16 = vld [vmem:[#allocation7 + $0x40] sm:$0xff]  ;;  %v3096_v18 = vld [vmem:[%s5452_s4 + $0x40] sm:$0xff] }
 0x9c0   :  { %v1644_v33 = vadd.f32 %v3248_v23, %v3207_v31  ;;  %v3249_v37 = vpop.f32.mrb[34].mxu1  ;;  %v3209_v38 = vpop.f32.mrb[23].mxu0  ;;  %v1753_v31 = vld [vmem:[#allocation9 + $0x2b0] sm:$0xff]  ;;  %v3892_v32 = vpack.c.bf16 %v1754_v28, %v1751_v27  ;;  %v1756_v23 = vld [vmem:[#allocation9 + $0x2c8] sm:$0xff] }
 0x9c1   :  { %1669 = vadd.xlane.f32.xlu0 %v5191_v30  ;;  %v1678_v39 = vmul.f32 %v5191_v30, %v5191_v30  ;;  %v3210_v42 = vadd.f32 %v3209_v38, %v3208_v36  ;;  %v3250_v43 = vpop.f32.mrb[35].mxu1  ;;  %v1761_v36 = vld [vmem:[#allocation9 + $0x2f0] sm:$0xff]  ;;  %3915 = vmatpush3.bf16.msra.mxu1 %v3914_v22  ;;  %v1764_v22 = vld [vmem:[#allocation10 + $0x48] sm:$0xff] }
 0x9c2   :  { %v1653_v40 = vadd.f32 %v1644_v33, %v5073_v41  ;;  %v3251_v35 = vadd.f32 %v3250_v43, %v3249_v37  ;;  %v1758_v33 = vld [vmem:[#allocation9 + $0x2d8] sm:$0xff]  ;;  %v1757_v38 = vld [vmem:[#allocation9 + $0x2d0] sm:$0xff]  ;;  %3916 = vmatprep.subr.bf16.mxu1 %v4584_v0 }
 0x9c3   :  { %1681 = vadd.xlane.f32.xlu1 %v1678_v39  ;;  %v3894_v37 = vpack.c.bf16 %v1761_v36, %v1758_v33  ;;  %v1760_v39 = vld [vmem:[#allocation9 + $0x2e8] sm:$0xff]  ;;  %v1766_v36 = vld [vmem:[#allocation10 + $0x58] sm:$0xff] }
 0x9c4   :  { %v5197_v52 = vadd.f32 %v1656_v24, %v1653_v40  ;;  %v1649_v25 = vadd.f32 %v3251_v35, %v3210_v42  ;;  %v3917_v24 = vpack.c.bf16 %v1756_v23, %v1753_v31  ;;  %v1759_v40 = vld [vmem:[#allocation9 + $0x2e0] sm:$0xff]  ;;  %v1762_v42 = vld [vmem:[#allocation9 + $0x2f8] sm:$0xff]  ;;  %v3896_v43 = vpack.c.bf16 %v1760_v39, %v1757_v38  ;;  %v1768_v38 = vld [vmem:[#allocation10 + $0x68] sm:$0xff] }
 0x9c5   :  { %v3920_v35 = vpack.c.bf16 %v1762_v42, %v1759_v40  ;;  %v5232_v23 = vld [vmem:[#allocation22] sm:$0xff] }
 0x9c6   :  { %1671 = vadd.xlane.f32.xlu0 %v5197_v52  ;;  %v1679_v54 = vmul.f32 %v5197_v52, %v5197_v52  ;;  %v1654_v45 = vadd.f32 %v1649_v25, %v5079_v46  ;;  %v1734_v46 = vld [vmem:[#allocation9 + $0x218] sm:$0xff]  ;;  %3918 = vmatpush3.bf16.msra.mxu1 %v3917_v24  ;;  %v1769_v24 = vld [vmem:[#allocation10 + $0x70] sm:$0xff] }
 0x9c7   :  { %v3878_v15 = vpack.c.bf16 %v1737_v59, %v1734_v46  ;;  %3919 = vmatprep.subr.bf16.mxu1 %v4584_v0 }
 0x9c8   :  { %1683 = vadd.xlane.f32.xlu1 %v1679_v54  ;;  %v5203_v29 = vadd.f32 %v1657_v44, %v1654_v45 }
 0x9c9   :  { %3879 = vmatprep.subr.bf16.mxu0 %v3878_v15 }
 0x9ca   :  { %1673 = vadd.xlane.f32.xlu0 %v5203_v29  ;;  %v1680_v41 = vmul.f32 %v5203_v29, %v5203_v29  ;;  %3881 = vmatpush1.bf16.msra.mxu0 %v3880_v2 }
 0x9cb   :  { %3883 = vmatprep.subr.bf16.mxu0 %v3882_v6  ;;  %3921 = vmatpush3.bf16.msra.mxu1 %v3920_v35  ;;  %v3094_v6 = vld [vmem:[%s5452_s4 + $0x30] sm:$0xff] }
 0x9cc   :  { %1685 = vadd.xlane.f32.xlu1 %v1680_v41 }
 0x9ce   :  { %3885 = vmatpush1.bf16.msra.mxu0 %v3884_v58 }
 0x9cf   :  { %3887 = vmatprep.subr.bf16.mxu0 %v3886_v11 }
 0x9d2   :  { %3889 = vmatpush1.bf16.msra.mxu0 %v3888_v17 }
 0x9d3   :  { %3891 = vmatprep.subr.bf16.mxu0 %v3890_v26 }
 0x9d6   :  { %3893 = vmatpush1.bf16.msra.mxu0 %v3892_v32 }
 0x9d7   :  { %3895 = vmatprep.subr.bf16.mxu0 %v3894_v37  ;;  %v1765_v37 = vld [vmem:[#allocation10 + $0x50] sm:$0xff] }
 0x9da   :  { %3897 = vmatpush1.bf16.msra.mxu0 %v3896_v43 }
 0xa4e   :  { %v1670_v25 = vpop.xlane.xlu0 %1669 }
 0xa4f   :  { %v1675_v44 = vmul.f32 0.03125, %v1670_v25 }
 0xa50   :  { %v1682_v54 = vpop.xlane.xlu1 %1681 }
 0xa51   :  { %v1690_v45 = vmul.f32 %v1675_v44, %v1675_v44  ;;  %v1687_v41 = vmul.f32 0.03125, %v1682_v54  ;;  %v1696_v3 = vsub.f32 %v5191_v30, %v1675_v44 }
 0xa53   :  { %v1693_v49 = vsub.f32 %v1687_v41, %v1690_v45  ;;  %v1672_v47 = vpop.xlane.xlu0 %1671 }
 0xa54   :  { %v1676_v50 = vmul.f32 0.03125, %v1672_v47 }
 0xa55   :  { %v1699_v34 = vadd.f32 1e-05, %v1693_v49  ;;  %v1684_v48 = vpop.xlane.xlu1 %1683  ;;  %v1771_v49 = vld [vmem:[#allocation10 + $0x80] sm:$0xff] }
 0xa56   :  { %v1691_v51 = vmul.f32 %v1676_v50, %v1676_v50  ;;  %v1688_v56 = vmul.f32 0.03125, %v1684_v48  ;;  %v1697_v20 = vsub.f32 %v5197_v52, %v1676_v50 }
 0xa57   :  { %4168 = vrsqrt.f32 %v1699_v34  ;;  %v1674_v14 = vpop.xlane.xlu0 %1673 }
 0xa58   :  { %v1694_v57 = vsub.f32 %v1688_v56, %v1691_v51  ;;  %v1677_v46 = vmul.f32 0.03125, %v1674_v14  ;;  %v1767_v56 = vld [vmem:[#allocation10 + $0x60] sm:$0xff] }
 0xa59   :  { %v1686_v15 = vpop.xlane.xlu1 %1685 }
 0xa5a   :  { %v1700_v59 = vadd.f32 1e-05, %v1694_v57  ;;  %v1692_v61 = vmul.f32 %v1677_v46, %v1677_v46  ;;  %v1689_v62 = vmul.f32 0.03125, %v1686_v15  ;;  %v1698_v11 = vsub.f32 %v5203_v29, %v1677_v46  ;;  %v1770_v57 = vld [vmem:[#allocation10 + $0x78] sm:$0xff]  ;;  %v5235_v15 = vld [vmem:[#allocation22 + $0x8] sm:$0xff] }
 0xa5c   :  { %4170 = vrsqrt.f32 %v1700_v59  ;;  %v1695_v63 = vsub.f32 %v1689_v62, %v1692_v61  ;;  %v1772_v59 = vld [vmem:[#allocation10 + $0x88] sm:$0xff] }
 0xa5d   :  { %v5238_v62 = vld [vmem:[#allocation22 + $0x10] sm:$0xff] }
 0xa5e   :  { %v1701_v2 = vadd.f32 1e-05, %v1695_v63 }
 0xa60   :  { %4172 = vrsqrt.f32 %v1701_v2 }
 0xa61   :  { %v4169_v4 = vpop.eup %4168 }
 0xa62   :  { %v1705_v8 = vmul.f32 %v4169_v4, %v1696_v3  ;;  %v5241_v3 = vld [vmem:[#allocation22 + $0x18] sm:$0xff] }
 0xa64   :  { %v1708_v7 = vmul.f32 %v1705_v8, %v1662_v5  ;;  %v5244_v5 = vld [vmem:[#allocation22 + $0x20] sm:$0xff] }
 0xa66   :  { %v4171_v55 = vpop.eup %4170  ;;  %v1711_v58 = vadd.f32 %v3094_v6, %v1708_v7  ;;  %v5247_v6 = vld [vmem:[#allocation22 + $0x28] sm:$0xff] }
 0xa67   :  { %v1706_v53 = vmul.f32 %v4171_v55, %v1697_v20  ;;  %v4234_v55 = vld [vmem:[%s5465_s17 + $0x8] sm:$0xff] }
 0xa68   :  { %1838 = vmatmul.mubr.f32.vlgmr.msra.gmra.mrb[24].mxu0 %v1711_v58  ;;  %3556 = vmatmul.mubr.f32.vlgmr.msra.gmra.mrb[36].mxu1 %v1711_v58 }
 0xa69   :  { %1843 = vmatprep.mubr.f32.mxu0 %v4586_v1  ;;  %3558 = vmatprep.mubr.msk.f32.mxu1 %vm4585_vm0, %v4586_v1  ;;  %v1709_v60 = vmul.f32 %v1706_v53, %v1663_v9  ;;  %v4235_v53 = vld [vmem:[%s5465_s17] sm:$0xff] }
 0xa6a   :  { %v4173_v12 = vpop.eup %4172 }
 0xa6b   :  { %v1712_v13 = vadd.f32 %v3095_v10, %v1709_v60  ;;  %v1707_v17 = vmul.f32 %v4173_v12, %v1698_v11 }
 0xa6d   :  { %1844 = vmatmul.mubr.f32.gmra.mrb[26].mxu0 %v1712_v13  ;;  %3559 = vmatmul.mubr.f32.gmra.mrb[38].mxu1 %v1712_v13  ;;  %v1710_v19 = vmul.f32 %v1707_v17, %v1664_v16  ;;  %v4236_v13 = vld [vmem:[%s5465_s17 + $0x18] sm:$0xff] }
 0xa6e   :  { %1849 = vmatprep.mubr.f32.mxu0 %v4586_v1  ;;  %3561 = vmatprep.mubr.msk.f32.mxu1 %vm4585_vm0, %v4586_v1 }
 0xa6f   :  { %v1713_v21 = vadd.f32 %v3096_v18, %v1710_v19  ;;  %v4237_v18 = vld [vmem:[%s5465_s17 + $0x10] sm:$0xff] }
 0xa71   :  { %1850 = vmatmul.mubr.f32.gmra.mrb[28].mxu0 %v1713_v21  ;;  %3562 = vmatmul.mubr.f32.gmra.mrb[40].mxu1 %v1713_v21 }
 0xa72   :  { %2527 = vmatprep.mubr.f32.mxu1 %v4586_v1 }
 0xb3b   :  { %v1839_v26 = vpop.f32.mrb[24].mxu0  ;;  %v1922_v27 = vpop.f32.mrb[36].mxu1 }
 0xb3c   :  { %v1840_v28 = vadd.f32 %v1839_v26, %v1764_v22  ;;  %v1841_v31 = vpop.f32.mrb[25].mxu0  ;;  %v3557_v32 = vpop.f32.mrb[37].mxu1  ;;  %v1923_v42 = vadd.f32 %v1922_v27, %v1766_v36  ;;  %v4238_v27 = vld [vmem:[%s5465_s17 + $0x28] sm:$0xff] }
 0xb3d   :  { %v1842_v44 = vadd.f32 %v1841_v31, %v1765_v37  ;;  %v4239_v32 = vld [vmem:[%s5465_s17 + $0x20] sm:$0xff] }
 0xb3e   :  { %v1936_v33 = vmul.f32 %v5232_v23, %v1840_v28  ;;  %v1939_v4 = vmul.f32 %v5241_v3, %v1840_v28 }
 0xb40   :  { %v1845_v39 = vpop.f32.mrb[26].mxu0  ;;  %v1927_v40 = vpop.f32.mrb[38].mxu1  ;;  %3570 = vmatprep.mubr.f32.mxu0 %v1936_v33 }
 0xb41   :  { %v1928_v43 = vadd.f32 %v1927_v40, %v1769_v24  ;;  %v1847_v35 = vpop.f32.mrb[27].mxu0  ;;  %v3560_v25 = vpop.f32.mrb[39].mxu1  ;;  %v1846_v14 = vadd.f32 %v1845_v39, %v1767_v56 }
 0xb42   :  { %v1848_v54 = vadd.f32 %v1847_v35, %v1768_v38 }
 0xb43   :  { %v3926_v45 = vpack.c.bf16 %v1928_v43, %v1923_v42  ;;  %v1937_v61 = vmul.f32 %v5235_v15, %v1846_v14  ;;  %v1940_v8 = vmul.f32 %v5244_v5, %v1846_v14 }
 0xb44   :  { %v3922_v41 = vpack.c.bf16 %v1848_v54, %v1842_v44  ;;  %v1851_v47 = vpop.f32.mrb[28].mxu0  ;;  %v1932_v50 = vpop.f32.mrb[40].mxu1 }
 0xb45   :  { %v1853_v34 = vpop.f32.mrb[29].mxu0  ;;  %v3563_v48 = vpop.f32.mrb[41].mxu1  ;;  %v1852_v46 = vadd.f32 %v1851_v47, %v1770_v57  ;;  %v1933_v2 = vadd.f32 %v1932_v50, %v1772_v59 }
 0xb46   :  { %3923 = vmatprep.subr.bf16.mxu0 %v3922_v41  ;;  %v1854_v51 = vadd.f32 %v1853_v34, %v1771_v49 }
 0xb47   :  { %3925 = vmatpush3.bf16.xpose.msra.mxu0 %v3922_v41  ;;  %v1938_v63 = vmul.f32 %v5238_v62, %v1852_v46  ;;  %v1941_v7 = vmul.f32 %v5247_v6, %v1852_v46 }
 0xb48   :  { %3568 = vmatprep.subr.mxu0 %v1854_v51 }
 0xb4f   :  { %3569 = vmatpush3.xpose.msra.mxu0 %v1854_v51 }
 0xb50   :  { %3927 = vmatprep.subr.bf16.mxu0 %v3926_v45 }
 0xb52   :  { %3571 = vmatmul.mubr.f32.vlgmr.msra.gmra.mrb[30].mxu0 %v1937_v61 }
 0xb53   :  { %3573 = vmatprep.mubr.f32.mxu0 %v1938_v63  ;;  %3929 = vmatpush3.bf16.msra.mxu0 %v3926_v45 }
 0xb54   :  { %3583 = vmatprep.subr.mxu0 %v1933_v2 }
 0xb56   :  { %3574 = vmatmul.mubr.f32.gmra.mrb[32].mxu0 %v1939_v4 }
 0xb57   :  { %3576 = vmatprep.mubr.f32.mxu0 %v1940_v8  ;;  %3584 = vmatpush3.msra.mxu0 %v1933_v2 }
 0xb58   :  { %3930 = vmatprep.subr.bf16.mxu0 %v4584_v0 }
 0xb5a   :  { %3577 = vmatmul.mubr.f32.gmra.mrb[34].mxu0 %v1941_v7 }
 0xc25   :  { %v3572_v20 = vpop.f32.mrb[30].mxu0 }
 0xc26   :  { %v2014_v58 = vadd.f32 %v4234_v55, %v3572_v20  ;;  %v2008_v9 = vpop.f32.mrb[31].mxu0 }
 0xc27   :  { %v2009_v10 = vadd.f32 %v4235_v53, %v2008_v9 }
 0xc28   :  { %v2040_v60 = vsel %vm731_vm2, %v2014_v58, -inf }
 0xc29   :  { %2041 = vmax.xlane.f32.xlu1 %v2040_v60  ;;  %v3575_v11 = vpop.f32.mrb[32].mxu0  ;;  %v2037_v12 = vsel %vm731_vm2, %v2009_v10, -inf }
 0xc2a   :  { %v2024_v16 = vadd.f32 %v4236_v13, %v3575_v11  ;;  %2038 = vmax.xlane.f32.xlu0 %v2037_v12  ;;  %v2018_v17 = vpop.f32.mrb[33].mxu0  ;;  %v2226_v11 = vld [vmem:[#allocation12 + $0x80] sm:$0xff]  ;;  %v2227_v12 = vld [vmem:[#allocation12 + $0x88] sm:$0xff] }
 0xc2b   :  { %v2019_v19 = vadd.f32 %v4237_v18, %v2018_v17  ;;  %v3931_v18 = vpack.c.bf16 %v2227_v12, %v2226_v11  ;;  %v2388_v12 = vld [vmem:[#allocation15 + $0x210] sm:$0xff] }
 0xc2c   :  { %v2046_v21 = vsel %vm731_vm2, %v2024_v16, -inf }
 0xc2d   :  { %2047 = vmax.xlane.f32.xlu1 %v2046_v21  ;;  %v3578_v22 = vpop.f32.mrb[34].mxu0  ;;  %v2043_v26 = vsel %vm731_vm2, %v2019_v19, -inf  ;;  %v2228_v21 = vld [vmem:[#allocation12 + $0x90] sm:$0xff] }
 0xc2e   :  { %v2034_v28 = vadd.f32 %v4238_v27, %v3578_v22  ;;  %v2028_v31 = vpop.f32.mrb[35].mxu0  ;;  %2044 = vmax.xlane.f32.xlu0 %v2043_v26  ;;  %v2229_v22 = vld [vmem:[#allocation12 + $0x98] sm:$0xff] }
 0xc2f   :  { %v2029_v33 = vadd.f32 %v4239_v32, %v2028_v31  ;;  %v3934_v31 = vpack.c.bf16 %v2229_v22, %v2228_v21  ;;  %v2401_v21 = vld [vmem:[#allocation15 + $0x278] sm:$0xff] }
 0xc30   :  { %v2052_v36 = vsel %vm731_vm2, %v2034_v28, -inf }
 0xc31   :  { %2053 = vmax.xlane.f32.xlu1 %v2052_v36  ;;  %v2049_v24 = vsel %vm731_vm2, %v2029_v33, -inf  ;;  %v2231_v36 = vld [vmem:[#allocation12 + $0xa8] sm:$0xff] }
 0xc32   :  { %2050 = vmax.xlane.f32.xlu0 %v2049_v24 }
 0xcb6   :  { %v2042_v37 = vpop.xlane.xlu1 %2041 }
 0xcb7   :  { %v2056_v38 = vsub.f32 %v2014_v58, %v2042_v37  ;;  %v2039_v39 = vpop.xlane.xlu0 %2038 }
 0xcb8   :  { %v2055_v40 = vsub.f32 %v2009_v10, %v2039_v39 }
 0xcb9   :  { %v2063_v42 = vmul.f32 1.442695, %v2056_v38 }
 0xcba   :  { %v2061_v43 = vmul.f32 1.442695, %v2055_v40  ;;  %v2048_v35 = vpop.xlane.xlu1 %2047 }
 0xcbb   :  { %4174 = vpow2.f32 %v2063_v42  ;;  %v2058_v25 = vsub.f32 %v2024_v16, %v2048_v35  ;;  %v2045_v44 = vpop.xlane.xlu0 %2044  ;;  %v2232_v42 = vld [vmem:[#allocation12 + $0xb0] sm:$0xff] }
 0xcbc   :  { %4176 = vpow2.f32 %v2061_v43  ;;  %v2057_v54 = vsub.f32 %v2019_v19, %v2045_v44  ;;  %v2233_v43 = vld [vmem:[#allocation12 + $0xb8] sm:$0xff]  ;;  %v2235_v44 = vld [vmem:[#allocation12 + $0xc8] sm:$0xff] }
 0xcbd   :  { %v2067_v45 = vmul.f32 1.442695, %v2058_v25  ;;  %v3940_v35 = vpack.c.bf16 %v2233_v43, %v2232_v42  ;;  %v2234_v25 = vld [vmem:[#allocation12 + $0xc0] sm:$0xff] }
 0xcbe   :  { %v2065_v41 = vmul.f32 1.442695, %v2057_v54  ;;  %v2054_v49 = vpop.xlane.xlu1 %2053  ;;  %v3943_v54 = vpack.c.bf16 %v2235_v44, %v2234_v25  ;;  %v2327_v43 = vld [vmem:[#allocation13 + $0x20] sm:$0xff] }
 0xcbf   :  { %4178 = vpow2.f32 %v2067_v45  ;;  %v2060_v47 = vsub.f32 %v2034_v28, %v2054_v49  ;;  %v2051_v50 = vpop.xlane.xlu0 %2050  ;;  %v2236_v45 = vld [vmem:[#allocation12 + $0xd0] sm:$0xff] }
 0xcc0   :  { %4180 = vpow2.f32 %v2065_v41  ;;  %v2059_v34 = vsub.f32 %v2029_v33, %v2051_v50  ;;  %v2230_v33 = vld [vmem:[#allocation12 + $0xa0] sm:$0xff]  ;;  %v2237_v41 = vld [vmem:[#allocation12 + $0xd8] sm:$0xff]  ;;  %v2239_v50 = vld [vmem:[#allocation12 + $0xe8] sm:$0xff] }
 0xcc1   :  { %v2071_v48 = vmul.f32 1.442695, %v2060_v47  ;;  %v3937_v39 = vpack.c.bf16 %v2231_v36, %v2230_v33  ;;  %v3946_v49 = vpack.c.bf16 %v2237_v41, %v2236_v45  ;;  %v2238_v47 = vld [vmem:[#allocation12 + $0xe0] sm:$0xff]  ;;  %v2328_v41 = vld [vmem:[#allocation13 + $0x28] sm:$0xff] }
 0xcc2   :  { %v2069_v51 = vmul.f32 1.442695, %v2059_v34  ;;  %v3949_v34 = vpack.c.bf16 %v2239_v50, %v2238_v47  ;;  %v2400_v33 = vld [vmem:[#allocation15 + $0x270] sm:$0xff] }
 0xcc3   :  { %4182 = vpow2.f32 %v2071_v48  ;;  %v2240_v48 = vld [vmem:[#allocation12 + $0xf0] sm:$0xff] }
 0xcc4   :  { %4184 = vpow2.f32 %v2069_v51  ;;  %v2241_v51 = vld [vmem:[#allocation12 + $0xf8] sm:$0xff] }
 0xcc5   :  { %v4175_v56 = vpop.eup %4174 }
 0xcc6   :  { %v4177_v57 = vpop.eup %4176  ;;  %v2076_v14 = vsel %vm731_vm2, %v4175_v56, 0.0 }
 0xcc7   :  { %2077 = vadd.xlane.f32.xlu1 %v2076_v14  ;;  %v2073_v46 = vsel %vm731_vm2, %v4177_v57, 0.0 }
 0xcc8   :  { %2074 = vadd.xlane.f32.xlu0 %v2073_v46 }
 0xcc9   :  { %v4179_v59 = vpop.eup %4178 }
 0xcca   :  { %v4181_v61 = vpop.eup %4180  ;;  %v2082_v63 = vsel %vm731_vm2, %v4179_v59, 0.0 }
 0xccb   :  { %2083 = vadd.xlane.f32.xlu1 %v2082_v63  ;;  %v2079_v2 = vsel %vm731_vm2, %v4181_v61, 0.0 }
 0xccc   :  { %2080 = vadd.xlane.f32.xlu0 %v2079_v2 }
 0xccd   :  { %v4183_v4 = vpop.eup %4182 }
 0xcce   :  { %v4185_v8 = vpop.eup %4184  ;;  %v2088_v7 = vsel %vm731_vm2, %v4183_v4, 0.0 }
 0xccf   :  { %2089 = vadd.xlane.f32.xlu1 %v2088_v7  ;;  %v2085_v20 = vsel %vm731_vm2, %v4185_v8, 0.0 }
 0xcd0   :  { %2086 = vadd.xlane.f32.xlu0 %v2085_v20 }
 0xd54   :  { %v2078_v55 = vpop.xlane.xlu1 %2077 }
 0xd55   :  { %4186 = vrcp.f32 %v2078_v55  ;;  %v2075_v58 = vpop.xlane.xlu0 %2074 }
 0xd56   :  { %4188 = vrcp.f32 %v2075_v58 }
 0xd58   :  { %v2084_v9 = vpop.xlane.xlu1 %2083 }
 0xd59   :  { %4190 = vrcp.f32 %v2084_v9  ;;  %v2081_v53 = vpop.xlane.xlu0 %2080 }
 0xd5a   :  { %4192 = vrcp.f32 %v2081_v53 }
 0xd5c   :  { %v2090_v10 = vpop.xlane.xlu1 %2089 }
 0xd5d   :  { %4194 = vrcp.f32 %v2090_v10  ;;  %v2087_v60 = vpop.xlane.xlu0 %2086  ;;  %v2393_v10 = vld [vmem:[#allocation15 + $0x238] sm:$0xff] }
 0xd5e   :  { %4196 = vrcp.f32 %v2087_v60  ;;  %v2390_v60 = vld [vmem:[#allocation15 + $0x220] sm:$0xff] }
 0xd5f   :  { %v4187_v13 = vpop.eup %4186 }
 0xd60   :  { %v4189_v16 = vpop.eup %4188  ;;  %v2098_v19 = vmul.f32 %v4187_v13, %v4175_v56  ;;  %v3952_v56 = vpack.c.bf16 %v2241_v51, %v2240_v48  ;;  %v2392_v13 = vld [vmem:[#allocation15 + $0x230] sm:$0xff]  ;;  %v2407_v48 = vld [vmem:[#allocation15 + $0x2a8] sm:$0xff]  ;;  %v2405_v51 = vld [vmem:[#allocation15 + $0x298] sm:$0xff] }
 0xd61   :  { %v2097_v17 = vmul.f32 %v4189_v16, %v4177_v57  ;;  %v2395_v16 = vld [vmem:[#allocation15 + $0x248] sm:$0xff] }
 0xd63   :  { %v4191_v26 = vpop.eup %4190  ;;  %3585 = vmatprep.mubr.msk.f32.mxu0 %vm731_vm2, %v2097_v17  ;;  %v3988_v17 = vpack.c.bf16 %v2392_v13, %v2388_v12  ;;  %v2418_v12 = vld [vmem:[#allocation15 + $0x300] sm:$0xff] }
 0xd64   :  { %v4193_v27 = vpop.eup %4192  ;;  %3586 = vmatmul.mubr.msk.f32.vlgmr.msra.gmra.mrb[36].mxu0 %vm731_vm2, %v2098_v19  ;;  %v2100_v32 = vmul.f32 %v4191_v26, %v4179_v59  ;;  %v2397_v19 = vld [vmem:[#allocation15 + $0x258] sm:$0xff]  ;;  %v2422_v13 = vld [vmem:[#allocation15 + $0x320] sm:$0xff] }
 0xd65   :  { %v2099_v28 = vmul.f32 %v4193_v27, %v4181_v61  ;;  %3932 = vmatpush3.bf16.msra.mxu0 %v3931_v18  ;;  %v2399_v18 = vld [vmem:[#allocation15 + $0x268] sm:$0xff]  ;;  %v3990_v26 = vpack.c.bf16 %v2401_v21, %v2397_v19  ;;  %v2394_v27 = vld [vmem:[#allocation15 + $0x240] sm:$0xff]  ;;  %v2424_v19 = vld [vmem:[#allocation15 + $0x330] sm:$0xff] }
 0xd66   :  { %3933 = vmatprep.subr.bf16.mxu0 %v4584_v0  ;;  %v3958_v22 = vpack.c.bf16 %v2399_v18, %v2395_v16  ;;  %v2420_v18 = vld [vmem:[#allocation15 + $0x310] sm:$0xff] }
 0xd67   :  { %v4195_v24 = vpop.eup %4194  ;;  %3588 = vmatprep.mubr.msk.f32.mxu0 %vm731_vm2, %v2099_v28  ;;  %v2398_v28 = vld [vmem:[#allocation15 + $0x260] sm:$0xff]  ;;  %v4004_v21 = vpack.c.bf16 %v2424_v19, %v2420_v18 }
 0xd68   :  { %v4197_v37 = vpop.eup %4196  ;;  %3589 = vmatmul.mubr.msk.f32.gmra.mrb[38].mxu0 %vm731_vm2, %v2100_v32  ;;  %v2102_v40 = vmul.f32 %v4195_v24, %v4183_v4  ;;  %v3960_v32 = vpack.c.bf16 %v2398_v28, %v2394_v27  ;;  %v2429_v27 = vld [vmem:[#allocation15 + $0x358] sm:$0xff] }
 0xd69   :  { %v2101_v38 = vmul.f32 %v4197_v37, %v4185_v8  ;;  %3935 = vmatpush3.bf16.msra.mxu0 %v3934_v31  ;;  %v2396_v31 = vld [vmem:[#allocation15 + $0x250] sm:$0xff]  ;;  %v2326_v37 = vld [vmem:[#allocation13 + $0x18] sm:$0xff] }
 0xd6a   :  { %3936 = vmatprep.subr.bf16.mxu0 %v4584_v0  ;;  %v3992_v36 = vpack.c.bf16 %v2400_v33, %v2396_v31  ;;  %v2433_v31 = vld [vmem:[#allocation15 + $0x378] sm:$0xff]  ;;  %v2430_v33 = vld [vmem:[#allocation15 + $0x360] sm:$0xff] }
 0xd6b   :  { %3591 = vmatprep.mubr.msk.f32.mxu0 %vm731_vm2, %v2101_v38 }
 0xd6c   :  { %3592 = vmatmul.mubr.msk.f32.gmra.mrb[40].mxu0 %vm731_vm2, %v2102_v40 }
 0xd6d   :  { %3938 = vmatpush3.bf16.msra.mxu0 %v3937_v39  ;;  %3626 = vmatprep.mubr.msk.f32.mxu0 %vm4585_vm0, %v4586_v1 }
 0xd6e   :  { %3939 = vmatprep.subr.bf16.mxu0 %v4584_v0 }
 0xd71   :  { %3941 = vmatpush3.bf16.msra.mxu0 %v3940_v35 }
 0xd72   :  { %3942 = vmatprep.subr.bf16.mxu0 %v4584_v0 }
 0xd75   :  { %3944 = vmatpush3.bf16.msra.mxu0 %v3943_v54 }
 0xd76   :  { %3945 = vmatprep.subr.bf16.mxu0 %v4584_v0 }
 0xd79   :  { %3947 = vmatpush3.bf16.msra.mxu0 %v3946_v49 }
 0xd7a   :  { %3948 = vmatprep.subr.bf16.mxu0 %v4584_v0 }
 0xd7d   :  { %3950 = vmatpush3.bf16.msra.mxu0 %v3949_v34  ;;  %v2403_v34 = vld [vmem:[#allocation15 + $0x288] sm:$0xff] }
 0xd7e   :  { %3951 = vmatprep.subr.bf16.mxu0 %v4584_v0 }
 0xd81   :  { %3953 = vmatpush3.bf16.msra.mxu0 %v3952_v56  ;;  %v3962_v56 = vpack.c.bf16 %v2407_v48, %v2403_v34  ;;  %v2443_v34 = vld [vmem:[#allocation15 + $0x3c8] sm:$0xff] }
 0xd82   :  { %v2447_v48 = vld [vmem:[#allocation15 + $0x3e8] sm:$0xff] }
 0xe37   :  { %v3587_v57 = vpop.f32.mrb[36].mxu0 }
 0xe38   :  { %v2187_v14 = vpop.f32.mrb[37].mxu0  ;;  %v2217_v55 = vmul.f32 %v5235_v15, %v3587_v57  ;;  %v2386_v15 = vld [vmem:[#allocation15 + $0x200] sm:$0xff] }
 0xe39   :  { %v2216_v59 = vmul.f32 %v5232_v23, %v2187_v14  ;;  %v3956_v11 = vpack.c.bf16 %v2390_v60, %v2386_v15  ;;  %v2402_v14 = vld [vmem:[#allocation15 + $0x280] sm:$0xff]  ;;  %v2423_v15 = vld [vmem:[#allocation15 + $0x328] sm:$0xff]  ;;  %v2421_v60 = vld [vmem:[#allocation15 + $0x318] sm:$0xff] }
 0xe3b   :  { %v3590_v46 = vpop.f32.mrb[38].mxu0 }
 0xe3c   :  { %v2219_v61 = vmul.f32 %v5241_v3, %v3590_v46  ;;  %v2197_v63 = vpop.f32.mrb[39].mxu0  ;;  %v2391_v3 = vld [vmem:[#allocation15 + $0x228] sm:$0xff]  ;;  %v2406_v46 = vld [vmem:[#allocation15 + $0x2a0] sm:$0xff] }
 0xe3d   :  { %v2218_v8 = vmul.f32 %v5238_v62, %v2197_v63  ;;  %v2387_v62 = vld [vmem:[#allocation15 + $0x208] sm:$0xff]  ;;  %v2408_v63 = vld [vmem:[#allocation15 + $0x2b0] sm:$0xff] }
 0xe3e   :  { %v2222_v2 = vadd.f32 %v2219_v61, %v2216_v59  ;;  %v3954_v53 = vpack.c.bf16 %v2391_v3, %v2387_v62  ;;  %v2404_v59 = vld [vmem:[#allocation15 + $0x290] sm:$0xff]  ;;  %v3964_v61 = vpack.c.bf16 %v2406_v46, %v2402_v14  ;;  %v2442_v14 = vld [vmem:[#allocation15 + $0x3c0] sm:$0xff] }
 0xe3f   :  { %v3593_v4 = vpop.f32.mrb[40].mxu0  ;;  %v2412_v3 = vld [vmem:[#allocation15 + $0x2d0] sm:$0xff] }
 0xe40   :  { %v2221_v7 = vmul.f32 %v5247_v6, %v3593_v4  ;;  %v2207_v20 = vpop.f32.mrb[41].mxu0  ;;  %3627 = vmatmul.mubr.f32.vlgmr.msra.gmra.mrb[42].mxu0 %v2222_v2  ;;  %v2389_v6 = vld [vmem:[#allocation15 + $0x218] sm:$0xff]  ;;  %3955 = vmatprep.subr.bf16.mxu1 %v3954_v53  ;;  %v3996_v2 = vpack.c.bf16 %v2408_v63, %v2404_v59  ;;  %v2411_v4 = vld [vmem:[#allocation15 + $0x2c8] sm:$0xff]  ;;  %v2446_v59 = vld [vmem:[#allocation15 + $0x3e0] sm:$0xff] }
 0xe41   :  { %v2220_v58 = vmul.f32 %v5244_v5, %v2207_v20  ;;  %3629 = vmatprep.mubr.msk.f32.mxu0 %vm4585_vm0, %v4586_v1  ;;  %v3986_v5 = vpack.c.bf16 %v2393_v10, %v2389_v6  ;;  %3957 = vmatpush1.bf16.msra.mxu1 %v3956_v11  ;;  %v2416_v6 = vld [vmem:[#allocation15 + $0x2f0] sm:$0xff]  ;;  %v2419_v10 = vld [vmem:[#allocation15 + $0x308] sm:$0xff]  ;;  %v2425_v11 = vld [vmem:[#allocation15 + $0x338] sm:$0xff] }
 0xe42   :  { %v2224_v9 = vadd.f32 %v2221_v7, %v2218_v8  ;;  %3959 = vmatprep.subr.bf16.mxu1 %v3958_v22  ;;  %v2415_v8 = vld [vmem:[#allocation15 + $0x2e8] sm:$0xff]  ;;  %v2413_v7 = vld [vmem:[#allocation15 + $0x2d8] sm:$0xff]  ;;  %v4000_v53 = vpack.c.bf16 %v2416_v6, %v2412_v3  ;;  %v4002_v16 = vpack.c.bf16 %v2425_v11, %v2421_v60  ;;  %v2448_v63 = vld [vmem:[#allocation15 + $0x3f0] sm:$0xff] }
 0xe43   :  { %v2223_v23 = vadd.f32 %v2220_v58, %v2217_v55  ;;  %3987 = vmatprep.subr.bf16.mxu0 %v3986_v5  ;;  %v3966_v20 = vpack.c.bf16 %v2415_v8, %v2411_v4  ;;  %v2417_v55 = vld [vmem:[#allocation15 + $0x2f8] sm:$0xff]  ;;  %v2410_v58 = vld [vmem:[#allocation15 + $0x2c0] sm:$0xff]  ;;  %v3970_v5 = vpack.c.bf16 %v2423_v15, %v2419_v10  ;;  %v2427_v22 = vld [vmem:[#allocation15 + $0x348] sm:$0xff] }
 0xe44   :  { %3989 = vmatpush1.bf16.msra.mxu0 %v3988_v17  ;;  %v3972_v17 = vpack.c.bf16 %v2422_v13, %v2418_v12  ;;  %v2754_v8 = vld [vmem:[#allocation18 + $0x280] sm:$0xff] }
 0xe45   :  { %3630 = vmatmul.mubr.f32.gmra.mrb[44].mxu0 %v2223_v23  ;;  %3991 = vmatprep.subr.bf16.mxu0 %v3990_v26  ;;  %v3998_v23 = vpack.c.bf16 %v2417_v55, %v2413_v7  ;;  %v2431_v26 = vld [vmem:[#allocation15 + $0x368] sm:$0xff] }
 0xe46   :  { %3632 = vmatprep.mubr.msk.f32.mxu0 %vm4585_vm0, %v4586_v1  ;;  %3961 = vmatpush1.bf16.msra.mxu1 %v3960_v32  ;;  %v3974_v28 = vpack.c.bf16 %v2431_v26, %v2427_v22  ;;  %v2426_v32 = vld [vmem:[#allocation15 + $0x340] sm:$0xff]  ;;  %v2755_v7 = vld [vmem:[#allocation18 + $0x288] sm:$0xff] }
 0xe47   :  { %3963 = vmatprep.subr.bf16.mxu1 %v3962_v56  ;;  %v3982_v56 = vpack.c.bf16 %v2447_v48, %v2443_v34  ;;  %v4018_v55 = vpack.c.bf16 %v2755_v7, %v2754_v8  ;;  %v2740_v8 = vld [vmem:[#allocation18 + $0x210] sm:$0xff] }
 0xe48   :  { %3993 = vmatpush1.bf16.msra.mxu0 %v3992_v36  ;;  %v4006_v36 = vpack.c.bf16 %v2433_v31, %v2429_v27 }
 0xe49   :  { %3633 = vmatmul.mubr.f32.gmra.mrb[46].mxu0 %v2224_v9  ;;  %v2414_v9 = vld [vmem:[#allocation15 + $0x2e0] sm:$0xff] }
 0xe4a   :  { %2610 = vmatprep.mubr.f32.mxu0 %v4586_v1  ;;  %3965 = vmatpush1.bf16.msra.mxu1 %v3964_v61  ;;  %v3968_v62 = vpack.c.bf16 %v2414_v9, %v2410_v58  ;;  %v2444_v61 = vld [vmem:[#allocation15 + $0x3d0] sm:$0xff]  ;;  %v2787_v58 = vld [vmem:[#allocation18 + $0x388] sm:$0xff] }
 0xe4b   :  { %3967 = vmatprep.subr.bf16.mxu1 %v3966_v20  ;;  %v4016_v4 = vpack.c.bf16 %v2448_v63, %v2444_v61  ;;  %v2786_v20 = vld [vmem:[#allocation18 + $0x380] sm:$0xff]  ;;  %v2757_v61 = vld [vmem:[#allocation18 + $0x298] sm:$0xff]  ;;  %v2788_v63 = vld [vmem:[#allocation18 + $0x390] sm:$0xff] }
 0xe4c   :  { %v4050_v9 = vpack.c.bf16 %v2787_v58, %v2786_v20  ;;  %v2741_v20 = vld [vmem:[#allocation18 + $0x218] sm:$0xff]  ;;  %v2772_v58 = vld [vmem:[#allocation18 + $0x310] sm:$0xff] }
 0xe4e   :  { %3969 = vmatpush1.bf16.msra.mxu1 %v3968_v62 }
 0xe4f   :  { %3971 = vmatprep.subr.bf16.mxu1 %v3970_v5 }
 0xe52   :  { %3973 = vmatpush1.bf16.msra.mxu1 %v3972_v17 }
 0xe53   :  { %3975 = vmatprep.subr.bf16.mxu1 %v3974_v28 }
 0xf13   :  { %v2308_v24 = vpop.f32.mrb[42].mxu0 }
 0xf14   :  { %v2322_v38 = vadd.f32 %v2308_v24, %v5191_v30  ;;  %v3628_v39 = vpop.f32.mrb[43].mxu0  ;;  %v3976_v24 = vpack.c.bf16 %v2430_v33, %v2426_v32  ;;  %v2333_v33 = vld [vmem:[#allocation7 + $0x48] sm:$0xff] }
 0xf15   :  { %v2435_v39 = vld [vmem:[#allocation15 + $0x388] sm:$0xff] }
 0xf16   :  { %v5308_v40 = vadd.f32 %v2326_v37, %v2322_v38  ;;  %v2428_v37 = vld [vmem:[#allocation15 + $0x350] sm:$0xff]  ;;  %3977 = vmatpush1.bf16.msra.mxu1 %v3976_v24  ;;  %v3103_v24 = vld [vmem:[%s5452_s4 + $0x48] sm:$0xff] }
 0xf17   :  { %v2432_v38 = vld [vmem:[#allocation15 + $0x370] sm:$0xff] }
 0xf18   :  { %2340 = vadd.xlane.f32.xlu0 %v5308_v40  ;;  %v2313_v42 = vpop.f32.mrb[44].mxu0  ;;  %v2349_v35 = vmul.f32 %v5308_v40, %v5308_v40 }
 0xf19   :  { %v2323_v25 = vadd.f32 %v2313_v42, %v5197_v52  ;;  %v3631_v44 = vpop.f32.mrb[45].mxu0  ;;  %v4008_v42 = vpack.c.bf16 %v2432_v38, %v2428_v37  ;;  %v2738_v37 = vld [vmem:[#allocation18 + $0x200] sm:$0xff]  ;;  %v2739_v38 = vld [vmem:[#allocation18 + $0x208] sm:$0xff] }
 0xf1a   :  { %2352 = vadd.xlane.f32.xlu1 %v2349_v35  ;;  %v2437_v35 = vld [vmem:[#allocation15 + $0x398] sm:$0xff] }
 0xf1b   :  { %v5314_v54 = vadd.f32 %v2327_v43, %v2323_v25  ;;  %v2439_v43 = vld [vmem:[#allocation15 + $0x3a8] sm:$0xff]  ;;  %v2441_v25 = vld [vmem:[#allocation15 + $0x3b8] sm:$0xff] }
 0xf1c   :  { %v2318_v45 = vpop.f32.mrb[46].mxu0  ;;  %v3978_v44 = vpack.c.bf16 %v2439_v43, %v2435_v39  ;;  %v2770_v39 = vld [vmem:[#allocation18 + $0x300] sm:$0xff] }
 0xf1d   :  { %v2324_v30 = vadd.f32 %v2318_v45, %v5203_v29  ;;  %2342 = vadd.xlane.f32.xlu0 %v5314_v54  ;;  %v3634_v49 = vpop.f32.mrb[47].mxu0  ;;  %v2350_v47 = vmul.f32 %v5314_v54, %v5314_v54  ;;  %v2409_v29 = vld [vmem:[#allocation15 + $0x2b8] sm:$0xff]  ;;  %v4010_v45 = vpack.c.bf16 %v2441_v25, %v2437_v35 }
 0xf1e   :  { %v3994_v57 = vpack.c.bf16 %v2409_v29, %v2405_v51  ;;  %v2436_v49 = vld [vmem:[#allocation15 + $0x390] sm:$0xff]  ;;  %3979 = vmatprep.subr.bf16.mxu1 %v3978_v44  ;;  %v2445_v29 = vld [vmem:[#allocation15 + $0x3d8] sm:$0xff] }
 0xf1f   :  { %v5320_v50 = vadd.f32 %v2328_v41, %v2324_v30  ;;  %2354 = vadd.xlane.f32.xlu1 %v2350_v47  ;;  %v2434_v41 = vld [vmem:[#allocation15 + $0x380] sm:$0xff] }
 0xf20   :  { %3995 = vmatprep.subr.bf16.mxu0 %v3994_v57  ;;  %v2438_v30 = vld [vmem:[#allocation15 + $0x3a0] sm:$0xff]  ;;  %v2449_v57 = vld [vmem:[#allocation15 + $0x3f8] sm:$0xff] }
 0xf21   :  { %2344 = vadd.xlane.f32.xlu0 %v5320_v50  ;;  %v2351_v52 = vmul.f32 %v5320_v50, %v5320_v50  ;;  %3997 = vmatpush1.bf16.msra.mxu0 %v3996_v2  ;;  %v3980_v47 = vpack.c.bf16 %v2438_v30, %v2434_v41  ;;  %v4014_v46 = vpack.c.bf16 %v2449_v57, %v2445_v29  ;;  %v3105_v57 = vld [vmem:[%s5452_s4 + $0x58] sm:$0xff] }
 0xf22   :  { %3999 = vmatprep.subr.bf16.mxu0 %v3998_v23  ;;  %v3984_v2 = vpack.c.bf16 %v2446_v59, %v2442_v14  ;;  %v4020_v41 = vpack.c.bf16 %v2739_v38, %v2738_v37  ;;  %v2756_v59 = vld [vmem:[#allocation18 + $0x290] sm:$0xff]  ;;  %v2763_v37 = vld [vmem:[#allocation18 + $0x2c8] sm:$0xff]  ;;  %v2794_v38 = vld [vmem:[#allocation18 + $0x3c0] sm:$0xff] }
 0xf23   :  { %2356 = vadd.xlane.f32.xlu1 %v2351_v52  ;;  %v2440_v52 = vld [vmem:[#allocation15 + $0x3b0] sm:$0xff]  ;;  %3981 = vmatpush1.bf16.msra.mxu1 %v3980_v47  ;;  %v3104_v47 = vld [vmem:[%s5452_s4 + $0x50] sm:$0xff] }
 0xf24   :  { %v4012_v51 = vpack.c.bf16 %v2440_v52, %v2436_v49  ;;  %3983 = vmatprep.subr.bf16.mxu1 %v3982_v56 }
 0xf25   :  { %4001 = vmatpush1.bf16.msra.mxu0 %v4000_v53 }
 0xf26   :  { %4003 = vmatprep.subr.bf16.mxu0 %v4002_v16 }
 0xf27   :  { %3985 = vmatpush1.bf16.msra.mxu1 %v3984_v2  ;;  %v4022_v2 = vpack.c.bf16 %v2757_v61, %v2756_v59  ;;  %v2767_v59 = vld [vmem:[#allocation18 + $0x2e8] sm:$0xff] }
 0xf28   :  { %4019 = vmatprep.subr.bf16.mxu1 %v4018_v55  ;;  %v4024_v55 = vpack.c.bf16 %v2741_v20, %v2740_v8  ;;  %v2750_v8 = vld [vmem:[#allocation18 + $0x260] sm:$0xff] }
 0xf29   :  { %4005 = vmatpush1.bf16.msra.mxu0 %v4004_v21 }
 0xf2a   :  { %4007 = vmatprep.subr.bf16.mxu0 %v4006_v36 }
 0xf2d   :  { %4009 = vmatpush1.bf16.msra.mxu0 %v4008_v42  ;;  %v2771_v42 = vld [vmem:[#allocation18 + $0x308] sm:$0xff] }
 0xf2e   :  { %4011 = vmatprep.subr.bf16.mxu0 %v4010_v45  ;;  %v2334_v45 = vld [vmem:[#allocation7 + $0x50] sm:$0xff]  ;;  %v4052_v30 = vpack.c.bf16 %v2771_v42, %v2770_v39  ;;  %v2795_v42 = vld [vmem:[#allocation18 + $0x3c8] sm:$0xff] }
 0xf31   :  { %4013 = vmatpush1.bf16.msra.mxu0 %v4012_v51  ;;  %v2335_v51 = vld [vmem:[#allocation7 + $0x58] sm:$0xff] }
 0xf32   :  { %4015 = vmatprep.subr.bf16.mxu0 %v4014_v46 }
 0xf35   :  { %4017 = vmatpush1.bf16.msra.mxu0 %v4016_v4  ;;  %v2789_v4 = vld [vmem:[#allocation18 + $0x398] sm:$0xff] }
 0xf36   :  { %4051 = vmatprep.subr.bf16.mxu0 %v4050_v9  ;;  %v4054_v7 = vpack.c.bf16 %v2789_v4, %v2788_v63  ;;  %v2773_v9 = vld [vmem:[#allocation18 + $0x318] sm:$0xff]  ;;  %v2799_v4 = vld [vmem:[#allocation18 + $0x3e8] sm:$0xff] }
 0xfa5   :  { %v2341_v23 = vpop.xlane.xlu0 %2340 }
 0xfa6   :  { %v2346_v62 = vmul.f32 0.03125, %v2341_v23  ;;  %v4056_v23 = vpack.c.bf16 %v2773_v9, %v2772_v58  ;;  %v2782_v58 = vld [vmem:[#allocation18 + $0x360] sm:$0xff]  ;;  %v2783_v9 = vld [vmem:[#allocation18 + $0x368] sm:$0xff] }
 0xfa7   :  { %v2353_v3 = vpop.xlane.xlu1 %2352 }
 0xfa8   :  { %v2361_v6 = vmul.f32 %v2346_v62, %v2346_v62  ;;  %v2358_v53 = vmul.f32 0.03125, %v2353_v3  ;;  %v2367_v31 = vsub.f32 %v5308_v40, %v2346_v62  ;;  %v2758_v62 = vld [vmem:[#allocation18 + $0x2a0] sm:$0xff]  ;;  %v2759_v3 = vld [vmem:[#allocation18 + $0x2a8] sm:$0xff] }
 0xfaa   :  { %v2364_v10 = vsub.f32 %v2358_v53, %v2361_v6  ;;  %v2343_v15 = vpop.xlane.xlu0 %2342  ;;  %v2790_v6 = vld [vmem:[#allocation18 + $0x3a0] sm:$0xff]  ;;  %v4026_v53 = vpack.c.bf16 %v2759_v3, %v2758_v62  ;;  %v2769_v62 = vld [vmem:[#allocation18 + $0x2f8] sm:$0xff]  ;;  %v2800_v3 = vld [vmem:[#allocation18 + $0x3f0] sm:$0xff] }
 0xfab   :  { %v2347_v60 = vmul.f32 0.03125, %v2343_v15  ;;  %v2742_v15 = vld [vmem:[#allocation18 + $0x220] sm:$0xff] }
 0xfac   :  { %v2370_v5 = vadd.f32 1e-05, %v2364_v10  ;;  %v2355_v11 = vpop.xlane.xlu1 %2354  ;;  %v2791_v10 = vld [vmem:[#allocation18 + $0x3a8] sm:$0xff] }
 0xfad   :  { %v2362_v12 = vmul.f32 %v2347_v60, %v2347_v60  ;;  %v2359_v13 = vmul.f32 0.03125, %v2355_v11  ;;  %v2368_v35 = vsub.f32 %v5314_v54, %v2347_v60  ;;  %v2743_v60 = vld [vmem:[#allocation18 + $0x228] sm:$0xff] }
 0xfae   :  { %4198 = vrsqrt.f32 %v2370_v5  ;;  %v2345_v16 = vpop.xlane.xlu0 %2344  ;;  %v4058_v5 = vpack.c.bf16 %v2791_v10, %v2790_v6  ;;  %v4028_v11 = vpack.c.bf16 %v2743_v60, %v2742_v15  ;;  %v2801_v6 = vld [vmem:[#allocation18 + $0x3f8] sm:$0xff]  ;;  %v4076_v10 = vpack.c.bf16 %v2783_v9, %v2782_v58  ;;  %v2752_v15 = vld [vmem:[#allocation18 + $0x270] sm:$0xff] }
 0xfaf   :  { %v2365_v17 = vsub.f32 %v2359_v13, %v2362_v12  ;;  %v2348_v18 = vmul.f32 0.03125, %v2345_v16  ;;  %v2774_v12 = vld [vmem:[#allocation18 + $0x320] sm:$0xff]  ;;  %v2775_v13 = vld [vmem:[#allocation18 + $0x328] sm:$0xff] }
 0xfb0   :  { %v2357_v19 = vpop.xlane.xlu1 %2356  ;;  %v4060_v16 = vpack.c.bf16 %v2775_v13, %v2774_v12  ;;  %v2784_v12 = vld [vmem:[#allocation18 + $0x370] sm:$0xff]  ;;  %v2785_v13 = vld [vmem:[#allocation18 + $0x378] sm:$0xff] }
 0xfb1   :  { %v2371_v21 = vadd.f32 1e-05, %v2365_v17  ;;  %v2363_v22 = vmul.f32 %v2348_v18, %v2348_v18  ;;  %v2360_v26 = vmul.f32 0.03125, %v2357_v19  ;;  %v2369_v52 = vsub.f32 %v5320_v50, %v2348_v18  ;;  %v2760_v17 = vld [vmem:[#allocation18 + $0x2b0] sm:$0xff]  ;;  %v2761_v18 = vld [vmem:[#allocation18 + $0x2b8] sm:$0xff] }
 0xfb2   :  { %v2792_v19 = vld [vmem:[#allocation18 + $0x3b0] sm:$0xff] }
 0xfb3   :  { %4200 = vrsqrt.f32 %v2371_v21  ;;  %v2366_v27 = vsub.f32 %v2360_v26, %v2363_v22  ;;  %v4030_v21 = vpack.c.bf16 %v2761_v18, %v2760_v17  ;;  %v2793_v22 = vld [vmem:[#allocation18 + $0x3b8] sm:$0xff]  ;;  %v2744_v26 = vld [vmem:[#allocation18 + $0x230] sm:$0xff]  ;;  %v4080_v17 = vpack.c.bf16 %v2785_v13, %v2784_v12  ;;  %v2451_v18 = vld [vmem:[#allocation16 + $0x60] sm:$0xff] }
 0xfb5   :  { %v2372_v28 = vadd.f32 1e-05, %v2366_v27  ;;  %v4062_v27 = vpack.c.bf16 %v2793_v22, %v2792_v19  ;;  %v2453_v19 = vld [vmem:[#allocation16 + $0x70] sm:$0xff]  ;;  %v2454_v22 = vld [vmem:[#allocation16 + $0x78] sm:$0xff] }
 0xfb7   :  { %4202 = vrsqrt.f32 %v2372_v28  ;;  %v2745_v28 = vld [vmem:[#allocation18 + $0x238] sm:$0xff] }
 0xfb8   :  { %v4199_v32 = vpop.eup %4198 }
 0xfb9   :  { %v2376_v36 = vmul.f32 %v4199_v32, %v2367_v31  ;;  %v2776_v31 = vld [vmem:[#allocation18 + $0x330] sm:$0xff]  ;;  %v2777_v32 = vld [vmem:[#allocation18 + $0x338] sm:$0xff] }
 0xfbb   :  { %v2379_v43 = vmul.f32 %v2376_v36, %v2333_v33  ;;  %v4032_v33 = vpack.c.bf16 %v2745_v28, %v2744_v26  ;;  %v4064_v36 = vpack.c.bf16 %v2777_v32, %v2776_v31 }
 0xfbd   :  { %v4201_v25 = vpop.eup %4200  ;;  %v2382_v44 = vadd.f32 %v3103_v24, %v2379_v43  ;;  %v2762_v24 = vld [vmem:[#allocation18 + $0x2c0] sm:$0xff] }
 0xfbe   :  { %v2377_v49 = vmul.f32 %v4201_v25, %v2368_v35  ;;  %v4034_v39 = vpack.c.bf16 %v2763_v37, %v2762_v24  ;;  %v2746_v43 = vld [vmem:[#allocation18 + $0x240] sm:$0xff]  ;;  %v2747_v35 = vld [vmem:[#allocation18 + $0x248] sm:$0xff]  ;;  %v4066_v25 = vpack.c.bf16 %v2795_v42, %v2794_v38 }
 0xfbf   :  { %2528 = vmatmul.mubr.f32.vlgmr.msra.gmra.mrb[42].mxu1 %v2382_v44  ;;  %2611 = vmatmul.mubr.f32.vlgmr.msra.gmra.mrb[48].mxu0 %v2382_v44  ;;  %v4036_v44 = vpack.c.bf16 %v2747_v35, %v2746_v43  ;;  %v2455_v38 = vld [vmem:[#allocation16 + $0x80] sm:$0xff]  ;;  %v2456_v35 = vld [vmem:[#allocation16 + $0x88] sm:$0xff] }
 0xfc0   :  { %2533 = vmatprep.mubr.f32.mxu1 %v4586_v1  ;;  %2616 = vmatprep.mubr.f32.mxu0 %v4586_v1  ;;  %v2380_v34 = vmul.f32 %v2377_v49, %v2334_v45  ;;  %v2778_v45 = vld [vmem:[#allocation18 + $0x340] sm:$0xff] }
 0xfc1   :  { %v4203_v48 = vpop.eup %4202  ;;  %4021 = vmatpush3.bf16.msra.mxu1 %v4020_v41  ;;  %4053 = vmatpush3.bf16.msra.mxu0 %v4052_v30  ;;  %v2779_v41 = vld [vmem:[#allocation18 + $0x348] sm:$0xff]  ;;  %v2764_v30 = vld [vmem:[#allocation18 + $0x2d0] sm:$0xff] }
 0xfc2   :  { %v2383_v56 = vadd.f32 %v3104_v47, %v2380_v34  ;;  %v2378_v29 = vmul.f32 %v4203_v48, %v2369_v52  ;;  %4023 = vmatprep.subr.bf16.mxu1 %v4022_v2  ;;  %4055 = vmatprep.subr.bf16.mxu0 %v4054_v7  ;;  %v4068_v49 = vpack.c.bf16 %v2779_v41, %v2778_v45  ;;  %v2765_v47 = vld [vmem:[#allocation18 + $0x2d8] sm:$0xff]  ;;  %v2796_v52 = vld [vmem:[#allocation18 + $0x3d0] sm:$0xff]  ;;  %v2798_v2 = vld [vmem:[#allocation18 + $0x3e0] sm:$0xff] }
 0xfc3   :  { %v2797_v34 = vld [vmem:[#allocation18 + $0x3d8] sm:$0xff]  ;;  %v4038_v48 = vpack.c.bf16 %v2765_v47, %v2764_v30  ;;  %v4074_v20 = vpack.c.bf16 %v2799_v4, %v2798_v2  ;;  %v2460_v2 = vld [vmem:[#allocation16 + $0xa8] sm:$0xff] }
 0xfc4   :  { %2534 = vmatmul.mubr.f32.gmra.mrb[44].mxu1 %v2383_v56  ;;  %2617 = vmatmul.mubr.f32.gmra.mrb[50].mxu0 %v2383_v56  ;;  %v2381_v14 = vmul.f32 %v2378_v29, %v2335_v51  ;;  %v4070_v51 = vpack.c.bf16 %v2797_v34, %v2796_v52  ;;  %v2748_v56 = vld [vmem:[#allocation18 + $0x250] sm:$0xff]  ;;  %v2749_v29 = vld [vmem:[#allocation18 + $0x258] sm:$0xff] }
 0xfc5   :  { %2539 = vmatprep.mubr.f32.mxu1 %v4586_v1  ;;  %2622 = vmatprep.mubr.f32.mxu0 %v4586_v1  ;;  %v4040_v61 = vpack.c.bf16 %v2749_v29, %v2748_v56  ;;  %v2462_v4 = vld [vmem:[#allocation16 + $0xb8] sm:$0xff] }
 0xfc6   :  { %v2384_v46 = vadd.f32 %v3105_v57, %v2381_v14  ;;  %4025 = vmatpush3.bf16.msra.mxu1 %v4024_v55  ;;  %4057 = vmatpush3.bf16.msra.mxu0 %v4056_v23  ;;  %v2780_v57 = vld [vmem:[#allocation18 + $0x350] sm:$0xff]  ;;  %v2781_v14 = vld [vmem:[#allocation18 + $0x358] sm:$0xff]  ;;  %v2751_v55 = vld [vmem:[#allocation18 + $0x268] sm:$0xff] }
 0xfc7   :  { %4027 = vmatprep.subr.bf16.mxu1 %v4026_v53  ;;  %4059 = vmatprep.subr.bf16.mxu0 %v4058_v5  ;;  %v4072_v63 = vpack.c.bf16 %v2781_v14, %v2780_v57  ;;  %v2768_v23 = vld [vmem:[#allocation18 + $0x2f0] sm:$0xff]  ;;  %v4044_v53 = vpack.c.bf16 %v2751_v55, %v2750_v8  ;;  %v4078_v5 = vpack.c.bf16 %v2801_v6, %v2800_v3 }
 0xfc8   :  { %2540 = vmatmul.mubr.f32.gmra.mrb[46].mxu1 %v2384_v46  ;;  %2623 = vmatmul.mubr.f32.gmra.mrb[52].mxu0 %v2384_v46  ;;  %v2766_v46 = vld [vmem:[#allocation18 + $0x2e0] sm:$0xff]  ;;  %v4046_v60 = vpack.c.bf16 %v2769_v62, %v2768_v23 }
 0xfc9   :  { %v4042_v7 = vpack.c.bf16 %v2767_v59, %v2766_v46  ;;  %v2459_v46 = vld [vmem:[#allocation16 + $0xa0] sm:$0xff]  ;;  %v2461_v59 = vld [vmem:[#allocation16 + $0xb0] sm:$0xff] }
 0xfca   :  { %4029 = vmatpush3.bf16.msra.mxu1 %v4028_v11  ;;  %4061 = vmatpush3.bf16.msra.mxu0 %v4060_v16  ;;  %v2753_v11 = vld [vmem:[#allocation18 + $0x278] sm:$0xff] }
 0xfcb   :  { %4031 = vmatprep.subr.bf16.mxu1 %v4030_v21  ;;  %4063 = vmatprep.subr.bf16.mxu0 %v4062_v27  ;;  %v4048_v16 = vpack.c.bf16 %v2753_v11, %v2752_v15  ;;  %v2452_v21 = vld [vmem:[#allocation16 + $0x68] sm:$0xff] }
 0xfce   :  { %4033 = vmatpush3.bf16.msra.mxu1 %v4032_v33  ;;  %4065 = vmatpush3.bf16.msra.mxu0 %v4064_v36 }
 0xfcf   :  { %4035 = vmatprep.subr.bf16.mxu1 %v4034_v39  ;;  %4067 = vmatprep.subr.bf16.mxu0 %v4066_v25  ;;  %v2457_v39 = vld [vmem:[#allocation16 + $0x90] sm:$0xff]  ;;  %v2458_v25 = vld [vmem:[#allocation16 + $0x98] sm:$0xff] }
 0xfd2   :  { %4037 = vmatpush3.bf16.msra.mxu1 %v4036_v44  ;;  %4069 = vmatpush3.bf16.msra.mxu0 %v4068_v49 }
 0xfd3   :  { %4039 = vmatprep.subr.bf16.mxu1 %v4038_v48  ;;  %4071 = vmatprep.subr.bf16.mxu0 %v4070_v51 }
 0xfd6   :  { %4041 = vmatpush3.bf16.msra.mxu1 %v4040_v61  ;;  %4073 = vmatpush3.bf16.msra.mxu0 %v4072_v63 }
 0xfd7   :  { %4043 = vmatprep.subr.bf16.mxu1 %v4042_v7  ;;  %4075 = vmatprep.subr.bf16.mxu0 %v4074_v20 }
 0xfda   :  { %4045 = vmatpush3.bf16.msra.mxu1 %v4044_v53  ;;  %4077 = vmatpush3.bf16.msra.mxu0 %v4076_v10 }
 0xfdb   :  { %4047 = vmatprep.subr.bf16.mxu1 %v4046_v60  ;;  %4079 = vmatprep.subr.bf16.mxu0 %v4078_v5 }
 0xfde   :  { %4049 = vmatpush3.bf16.msra.mxu1 %v4048_v16  ;;  %4081 = vmatpush3.bf16.msra.mxu0 %v4080_v17 }
 0xfdf   :  { %4082 = vmatprep.subr.bf16.mxu1 %v4584_v0 }
0x1092   :  { %v2529_v26 = vpop.f32.mrb[42].mxu1  ;;  %v2612_v27 = vpop.f32.mrb[48].mxu0 }
0x1093   :  { %v5342_v28 = vadd.f32 %v2529_v26, %v2451_v18  ;;  %v5344_v31 = vadd.f32 %v2612_v27, %v2453_v19  ;;  %v2531_v32 = vpop.f32.mrb[43].mxu1  ;;  %v2614_v33 = vpop.f32.mrb[49].mxu0 }
0x1094   :  { %v5346_v36 = vadd.f32 %v2531_v32, %v2452_v21  ;;  %v5348_v24 = vadd.f32 %v2614_v33, %v2454_v22 }
0x1095   :  { %v2641_v37 = vmul.f32 0.044715, %v5342_v28  ;;  %v2643_v0 = vmul.f32 0.044715, %v5344_v31 }
0x1096   :  { %v2642_v42 = vmul.f32 0.044715, %v5346_v36  ;;  %v2644_v43 = vmul.f32 0.044715, %v5348_v24 }
0x1097   :  { %v2653_v44 = vmul.f32 %v2641_v37, %v5342_v28  ;;  %v2655_v45 = vmul.f32 %v2643_v0, %v5344_v31  ;;  %v2535_v41 = vpop.f32.mrb[44].mxu1  ;;  %v2618_v30 = vpop.f32.mrb[50].mxu0 }
0x1098   :  { %v2654_v49 = vmul.f32 %v2642_v42, %v5346_v36  ;;  %v2656_v47 = vmul.f32 %v2644_v43, %v5348_v24  ;;  %v5358_v52 = vadd.f32 %v2535_v41, %v2455_v38  ;;  %v5360_v34 = vadd.f32 %v2618_v30, %v2457_v39  ;;  %v2537_v48 = vpop.f32.mrb[45].mxu1  ;;  %v2620_v51 = vpop.f32.mrb[51].mxu0 }
0x1099   :  { %v2665_v56 = vmul.f32 %v2653_v44, %v5342_v28  ;;  %v2667_v29 = vmul.f32 %v2655_v45, %v5344_v31  ;;  %v5364_v57 = vadd.f32 %v2537_v48, %v2456_v35  ;;  %v5366_v14 = vadd.f32 %v2620_v51, %v2458_v25 }
0x109a   :  { %v2645_v61 = vmul.f32 0.044715, %v5358_v52  ;;  %v2647_v63 = vmul.f32 0.044715, %v5360_v34  ;;  %v2666_v8 = vmul.f32 %v2654_v49, %v5346_v36  ;;  %v2668_v7 = vmul.f32 %v2656_v47, %v5348_v24 }
0x109b   :  { %v2677_v20 = vadd.f32 %v2665_v56, %v5342_v28  ;;  %v2679_v55 = vadd.f32 %v2667_v29, %v5344_v31  ;;  %v2646_v58 = vmul.f32 0.044715, %v5364_v57  ;;  %v2648_v9 = vmul.f32 0.044715, %v5366_v14  ;;  %v2541_v23 = vpop.f32.mrb[46].mxu1  ;;  %v2624_v62 = vpop.f32.mrb[52].mxu0 }
0x109c   :  { %v5376_v3 = vadd.f32 %v2541_v23, %v2459_v46  ;;  %v5378_v6 = vadd.f32 %v2624_v62, %v2461_v59  ;;  %v2543_v53 = vpop.f32.mrb[47].mxu1  ;;  %v2626_v10 = vpop.f32.mrb[53].mxu0  ;;  %v2657_v11 = vmul.f32 %v2645_v61, %v5358_v52  ;;  %v2659_v17 = vmul.f32 %v2647_v63, %v5360_v34 }
0x109d   :  { %v2689_v15 = vmul.f32 0.7978846, %v2677_v20  ;;  %v2691_v60 = vmul.f32 0.7978846, %v2679_v55  ;;  %v2658_v5 = vmul.f32 %v2646_v58, %v5364_v57  ;;  %v2660_v12 = vmul.f32 %v2648_v9, %v5366_v14 }
0x109e   :  { %v5383_v13 = vadd.f32 %v2543_v53, %v2460_v2  ;;  %v5385_v16 = vadd.f32 %v2626_v10, %v2462_v4  ;;  %v2678_v18 = vadd.f32 %v2666_v8, %v5346_v36  ;;  %v2680_v19 = vadd.f32 %v2668_v7, %v5348_v24 }
0x109f   :  { %4204 = vtanh.f32 %v2689_v15  ;;  %v2649_v21 = vmul.f32 0.044715, %v5376_v3  ;;  %v2651_v22 = vmul.f32 0.044715, %v5378_v6  ;;  %v2670_v37 = vmul.f32 %v2658_v5, %v5364_v57 }
0x10a0   :  { %4206 = vtanh.f32 %v2691_v60  ;;  %v2650_v26 = vmul.f32 0.044715, %v5383_v13  ;;  %v2652_v27 = vmul.f32 0.044715, %v5385_v16  ;;  %v2690_v32 = vmul.f32 0.7978846, %v2678_v18 }
0x10a1   :  { %v2692_v33 = vmul.f32 0.7978846, %v2680_v19  ;;  %v2672_v38 = vmul.f32 %v2660_v12, %v5366_v14  ;;  %v2682_v42 = vadd.f32 %v2670_v37, %v5364_v57  ;;  %v2669_v43 = vmul.f32 %v2657_v11, %v5358_v52 }
0x10a2   :  { %v2662_v0 = vmul.f32 %v2650_v26, %v5383_v13  ;;  %v2664_v39 = vmul.f32 %v2652_v27, %v5385_v16  ;;  %4208 = vtanh.f32 %v2690_v32  ;;  %v2661_v35 = vmul.f32 %v2649_v21, %v5376_v3 }
0x10a3   :  { %4210 = vtanh.f32 %v2692_v33  ;;  %v2684_v25 = vadd.f32 %v2672_v38, %v5366_v14  ;;  %v2671_v44 = vmul.f32 %v2659_v17, %v5360_v34  ;;  %v2663_v45 = vmul.f32 %v2651_v22, %v5378_v6 }
0x10a4   :  { %v2694_v41 = vmul.f32 0.7978846, %v2682_v42  ;;  %v2681_v30 = vadd.f32 %v2669_v43, %v5358_v52  ;;  %v2674_v49 = vmul.f32 %v2662_v0, %v5383_v13  ;;  %v2676_v51 = vmul.f32 %v2664_v39, %v5385_v16 }
0x10a5   :  { %v2696_v47 = vmul.f32 0.7978846, %v2684_v25  ;;  %v2683_v48 = vadd.f32 %v2671_v44, %v5360_v34  ;;  %v2673_v61 = vmul.f32 %v2661_v35, %v5376_v3  ;;  %v2675_v4 = vmul.f32 %v2663_v45, %v5378_v6 }
0x10a6   :  { %4212 = vtanh.f32 %v2694_v41  ;;  %v2693_v56 = vmul.f32 0.7978846, %v2681_v30  ;;  %v2686_v29 = vadd.f32 %v2674_v49, %v5383_v13  ;;  %v2688_v59 = vadd.f32 %v2676_v51, %v5385_v16 }
0x10a7   :  { %4214 = vtanh.f32 %v2696_v47  ;;  %v2695_v46 = vmul.f32 0.7978846, %v2683_v48  ;;  %v2685_v20 = vadd.f32 %v2673_v61, %v5376_v3  ;;  %v2687_v55 = vadd.f32 %v2675_v4, %v5378_v6 }
0x10a8   :  { %4216 = vtanh.f32 %v2693_v56  ;;  %v2698_v2 = vmul.f32 0.7978846, %v2686_v29  ;;  %v2700_v7 = vmul.f32 0.7978846, %v2688_v59  ;;  %v2630_v10 = vmul.f32 0.5, %v5346_v36 }
0x10a9   :  { %v4205_v63 = vpop.eup %4204  ;;  %4218 = vtanh.f32 %v2695_v46  ;;  %v2697_v58 = vmul.f32 0.7978846, %v2685_v20  ;;  %v2699_v62 = vmul.f32 0.7978846, %v2687_v55  ;;  %v2629_v5 = vmul.f32 0.5, %v5342_v28 }
0x10aa   :  { %v4207_v8 = vpop.eup %4206  ;;  %4220 = vtanh.f32 %v2698_v2  ;;  %v2713_v23 = vadd.f32 1.0, %v4205_v63  ;;  %v2632_v11 = vmul.f32 0.5, %v5348_v24  ;;  %v2631_v17 = vmul.f32 0.5, %v5344_v31 }
0x10ab   :  { %4222 = vtanh.f32 %v2700_v7  ;;  %v2715_v60 = vadd.f32 1.0, %v4207_v8  ;;  %v2634_v36 = vmul.f32 0.5, %v5364_v57  ;;  %v2636_v28 = vmul.f32 0.5, %v5366_v14 }
0x10ac   :  { %v4209_v9 = vpop.eup %4208  ;;  %4224 = vtanh.f32 %v2697_v58  ;;  %v2725_v22 = vmul.f32 %v2713_v23, %v2629_v5  ;;  %v2633_v31 = vmul.f32 0.5, %v5358_v52  ;;  %v2635_v43 = vmul.f32 0.5, %v5360_v34 }
0x10ad   :  { %v4211_v53 = vpop.eup %4210  ;;  %v2714_v15 = vadd.f32 1.0, %v4209_v9  ;;  %4226 = vtanh.f32 %v2699_v62  ;;  %v2727_v27 = vmul.f32 %v2715_v60, %v2631_v17  ;;  %v2638_v44 = vmul.f32 0.5, %v5383_v13  ;;  %v2972_v62 = vld [vmem:[%s5461_s13] sm:$0xff] }
0x10ae   :  { %v2716_v12 = vadd.f32 1.0, %v4211_v53  ;;  %v2640_v41 = vmul.f32 0.5, %v5385_v16  ;;  %v2637_v34 = vmul.f32 0.5, %v5376_v3  ;;  %v2639_v56 = vmul.f32 0.5, %v5378_v6  ;;  %v2966_v6 = vld [vmem:[#allocation19 + $0x18] sm:$0xff] }
0x10af   :  { %v2726_v18 = vmul.f32 %v2714_v15, %v2630_v10 }
0x10b0   :  { %v4213_v19 = vpop.eup %4212  ;;  %v2728_v21 = vmul.f32 %v2716_v12, %v2632_v11  ;;  %v2967_v12 = vld [vmem:[#allocation19 + $0x20] sm:$0xff] }
0x10b1   :  { %v4215_v26 = vpop.eup %4214  ;;  %2866 = vmatprep.mubr.f32.mxu1 %v2726_v18  ;;  %v2718_v32 = vadd.f32 1.0, %v4213_v19 }
0x10b2   :  { %v4217_v33 = vpop.eup %4216  ;;  %2946 = vmatprep.mubr.f32.mxu0 %v2728_v21  ;;  %2867 = vmatmul.mubr.f32.vlgmr.msra.gmra.mrb[48].mxu1 %v2725_v22  ;;  %v2720_v24 = vadd.f32 1.0, %v4215_v26 }
0x10b3   :  { %v4219_v37 = vpop.eup %4218  ;;  %2947 = vmatmul.mubr.f32.vlgmr.msra.gmra.mrb[54].mxu0 %v2727_v27  ;;  %v2730_v0 = vmul.f32 %v2718_v32, %v2634_v36  ;;  %v2717_v38 = vadd.f32 1.0, %v4217_v33  ;;  %v2968_v36 = vld [vmem:[#allocation19 + $0x28] sm:$0xff]  ;;  %v2974_v33 = vld [vmem:[%s5461_s13 + $0x10] sm:$0xff] }
0x10b4   :  { %v4221_v39 = vpop.eup %4220  ;;  %v2732_v42 = vmul.f32 %v2720_v24, %v2636_v28  ;;  %v2719_v35 = vadd.f32 1.0, %v4219_v37 }
0x10b5   :  { %v4223_v25 = vpop.eup %4222  ;;  %2871 = vmatprep.mubr.f32.mxu1 %v2730_v0  ;;  %v2729_v57 = vmul.f32 %v2717_v38, %v2633_v31  ;;  %v2722_v45 = vadd.f32 1.0, %v4221_v39  ;;  %v2984_v31 = vld [vmem:[#allocation21] sm:$0x3f] }
0x10b6   :  { %2951 = vmatprep.mubr.f32.mxu0 %v2732_v42  ;;  %v2731_v14 = vmul.f32 %v2719_v35, %v2635_v43  ;;  %v2724_v30 = vadd.f32 1.0, %v4223_v25  ;;  %v4225_v49 = vpop.eup %4224 }
0x10b7   :  { %2872 = vmatmul.mubr.f32.gmra.mrb[50].mxu1 %v2729_v57  ;;  %v2734_v52 = vmul.f32 %v2722_v45, %v2638_v44  ;;  %v4227_v47 = vpop.eup %4226  ;;  %v2721_v51 = vadd.f32 1.0, %v4225_v49 }
0x10b8   :  { %2952 = vmatmul.mubr.f32.gmra.mrb[56].mxu0 %v2731_v14  ;;  %v2736_v48 = vmul.f32 %v2724_v30, %v2640_v41  ;;  %v2723_v29 = vadd.f32 1.0, %v4227_v47 }
0x10b9   :  { %2876 = vmatprep.mubr.f32.mxu1 %v2734_v52  ;;  %v2733_v13 = vmul.f32 %v2721_v51, %v2637_v34 }
0x10ba   :  { %2956 = vmatprep.mubr.f32.mxu0 %v2736_v48  ;;  %v2735_v46 = vmul.f32 %v2723_v29, %v2639_v56 }
0x10bb   :  { %2877 = vmatmul.mubr.f32.gmra.mrb[52].mxu1 %v2733_v13 }
0x10bc   :  { %2957 = vmatmul.mubr.f32.gmra.mrb[58].mxu0 %v2735_v46  ;;  %3641 = vmatprep.mubr.msk.f32.mxu1 %vm4585_vm0, %v4586_v1 }
0x1185   :  { %v3340_v16 = vpop.f32.mrb[48].mxu1 }
0x1186   :  { %v3381_v59 = vpop.f32.mrb[54].mxu0  ;;  %v3341_v61 = vpop.f32.mrb[49].mxu1 }
0x1187   :  { %v3342_v63 = vadd.f32 %v3341_v61, %v3340_v16  ;;  %v3382_v2 = vpop.f32.mrb[55].mxu0 }
0x1188   :  { %v3383_v4 = vadd.f32 %v3382_v2, %v3381_v59 }
0x118a   :  { %v2949_v3 = vadd.f32 %v3383_v4, %v3342_v63  ;;  %v3343_v8 = vpop.f32.mrb[50].mxu1 }
0x118b   :  { %v3384_v7 = vpop.f32.mrb[56].mxu0  ;;  %v3344_v20 = vpop.f32.mrb[51].mxu1 }
0x118c   :  { %v2962_v55 = vadd.f32 %v2949_v3, %v5308_v40  ;;  %v3345_v58 = vadd.f32 %v3344_v20, %v3343_v8  ;;  %v3385_v9 = vpop.f32.mrb[57].mxu0  ;;  %v2973_v40 = vld [vmem:[%s5461_s13 + $0x8] sm:$0xff] }
0x118d   :  { %v3386_v23 = vadd.f32 %v3385_v9, %v3384_v7 }
0x118e   :  { %v2969_v53 = vadd.f32 %v2966_v6, %v2962_v55  ;;  %v3346_v15 = vpop.f32.mrb[52].mxu1 }
0x118f   :  { %v2954_v10 = vadd.f32 %v3386_v23, %v3345_v58  ;;  %v3387_v60 = vpop.f32.mrb[58].mxu0  ;;  %v3347_v5 = vpop.f32.mrb[53].mxu1 }
0x1190   :  { %v2975_v11 = vmul.f32 %v2972_v62, %v2969_v53  ;;  %v3348_v18 = vadd.f32 %v3347_v5, %v3346_v15  ;;  %v3388_v19 = vpop.f32.mrb[59].mxu0 }
0x1191   :  { %v2963_v17 = vadd.f32 %v2954_v10, %v5314_v54  ;;  %v3389_v21 = vadd.f32 %v3388_v19, %v3387_v60 }
0x1192   :  { %2978 = vadd.xlane.f32.xlu0 %v2975_v11 }
0x1193   :  { %v2970_v22 = vadd.f32 %v2967_v12, %v2963_v17  ;;  %v2959_v26 = vadd.f32 %v3389_v21, %v3348_v18 }
0x1195   :  { %v2976_v27 = vmul.f32 %v2973_v40, %v2970_v22  ;;  %v2964_v32 = vadd.f32 %v2959_v26, %v5320_v50  ;;  %v2985_v50 = vld [vmem:[%s5462_s14] sm:$0x3f] }
0x1197   :  { %2980 = vadd.xlane.f32.xlu1 %v2976_v27  ;;  %v2971_v54 = vadd.f32 %v2968_v36, %v2964_v32 }
0x1199   :  { %v2977_v28 = vmul.f32 %v2974_v33, %v2971_v54 }
0x119b   :  { %2982 = vadd.xlane.f32.xlu0 %v2977_v28 }
0x121f   :  { %v2979_v24 = vpop.xlane.xlu0 %2978 }
0x1224   :  { %v2981_v37 = vpop.xlane.xlu1 %2980 }
0x1225   :  { %v4083_v0 = vpack.c.bf16 %v2981_v37, %v2979_v24 }
0x1227   :  { %4084 = vmatpush3.bf16.msra.mxu1 %v4083_v0 }
0x1228   :  { %3639 = vmatprep.subr.mxu1 %v4586_v1  ;;  %v2983_v38 = vpop.xlane.xlu0 %2982 }
0x122b   :  { %3640 = vmatpush3.msra.mxu1 %v2983_v38 }
0x122c   :  { %3642 = vmatmul.mubr.msk.f32.vlgmr.msra.gmra.mrb[54].mxu1 %vm731_vm2, %v2984_v31 }
0x12ff   :  { %v3055_v39 = vpop.f32.mrb[54].mxu1 }
0x1300   :  { %v3056_v42 = vadd.f32 %v3055_v39, %v2985_v50  ;;  %v3643_v43 = vpop.f32.mrb[55].mxu1 }
0x1302   :  { %v3059_v35 = vmin.f32 %v3056_v42, 0.0 }
0x1304   :  { %v3061_v25 = vrot.slane %v3059_v35, 2  ;;  %v3064_v44 = vrot.slane %v3059_v35, 4 }
0x1306   :  { %v3063_v57 = vadd.f32 %v3061_v25, %v3059_v35 }
0x1308   :  { %v3066_v45 = vadd.f32 %v3064_v44, %v3063_v57 }
0x130a   :  { %v3067_v14 = vmul.f32 0.33333334, %v3066_v45 }
0x130c   :  { %3069 = vst.msk [vmem:[%s5479_s25] sm:$0x3] %vm3068_vm3, %v3067_v14 }
0x130d   :  { %3074 = vsyncpa [#allocation3], 1 }
0x130e   :  { %3075 = vsyncpa [#allocation5], 1 }
0x130f   :  { %3076 = vsyncpa [#allocation8], 1 }
0x1310   :  { %3077 = vsyncpa [#allocation11], 1 }
0x1311   :  { %3078 = vsyncpa [#allocation14], 1 }
0x1312   :  { %3079 = vsyncpa [#allocation17], 1 }
0x1313   :  { %3080 = vsyncpa [#allocation20], 1 }
0x1314   :  { %3081 = vsyncpa [#allocation23], 1 }

</bundles_post_ra>
